<compile_context>
chip_gen: v7x
topology: tpu7x:2x2x1
jax: 0.10.0
libtpu: 0.0.40
codegen_flags: <defaults>
</compile_context>

<pallas_src>
import functools
import math

import jax
import jax.numpy as jnp
from jax.experimental import pallas as pl
from jax.experimental.pallas import tpu as pltpu

_F32_BYTES = 4
_LN_EPS = 1e-5  # nn.LayerNorm default


# ----------------------------- shared helpers --------------------------------

def _layer_norm(x, gamma, beta, eps=_LN_EPS):
    mu = jnp.mean(x, axis=-1, keepdims=True)
    var = jnp.mean((x - mu) ** 2, axis=-1, keepdims=True)
    return (x - mu) * jax.lax.rsqrt(var + eps) * gamma + beta


def _round_up(v, m):
    return -(-v // m) * m


def _vmem_capacity_bytes():
    try:
        cap = int(pltpu.get_tpu_info().vmem_capacity_bytes)
        if cap > 0:
            return cap
    except Exception:          # best-effort query; fall back conservatively
        pass
    return 64 * 1024 * 1024    # v7x-sized fallback (safe on v5e/v6e too)


def _estimate_layer_vmem_bytes(*, seq, ts, kv, hidden, num_heads, head_dim,
                               fcn_hidden, act_itemsize, mm_itemsize):
    """Upper-bound VMEM estimate: pipeline double-buffers (incl. resident
    weights), lane-padded K/V scratch, and live f32 intermediates."""
    hd_lane = _round_up(head_dim, 128)
    h_lane = _round_up(hidden, 128)
    f_lane = _round_up(fcn_hidden, 128)
    kv_lane = _round_up(kv, 128)
    s_sub = _round_up(seq, 8)
    ts_sub = _round_up(ts, 8)
    # Pipeline buffers: Pallas double-buffers every input/output block, even
    # constant-index resident weights.
    # TODO(synk): pipeline_mode=pl.Buffered(1) on the resident weight / x specs
    # would halve this share (make-or-break for big models on v7x's 64 MiB).
    qkv_w = 3 * num_heads * _round_up(hidden, 8) * hd_lane
    out_w = num_heads * _round_up(head_dim, 8) * h_lane
    ffn_w = _round_up(hidden, 8) * f_lane + _round_up(fcn_hidden, 8) * h_lane
    weight_bytes = mm_itemsize * (qkv_w + out_w + ffn_w)
    small_bytes = _F32_BYTES * (3 * num_heads * 8 * hd_lane
                                + 6 * 8 * h_lane + 8 * f_lane)
    act_bytes = act_itemsize * (s_sub + ts_sub) * h_lane
    pipeline = 2 * (weight_bytes + small_bytes + act_bytes)
    # Resident K/V scratch (lane padding when head_dim < 128).
    scratch = 2 * mm_itemsize * num_heads * s_sub * hd_lane
    # Live in-kernel intermediates (f32 unless noted).
    interm = _F32_BYTES * (4 * ts_sub * h_lane + ts_sub * f_lane
                           + ts_sub * (2 * kv_lane + 4 * hd_lane)
                           + 2 * s_sub * hd_lane)
    interm += mm_itemsize * (ts_sub + s_sub) * h_lane
    return pipeline + scratch + interm


def _select_tiles(*, budget_bytes, **est_kw):
    """Largest (query tile, kv tile) dividing seq whose VMEM estimate fits."""
    seq = est_kw["seq"]
    cands = [c for c in (512, 256, 128, 64, 32, 16, 8)
             if c <= seq and seq % c == 0]
    if not cands:
        cands = [seq]
    for ts in cands:
        for kv in cands:
            if _estimate_layer_vmem_bytes(ts=ts, kv=kv, **est_kw) <= budget_bytes:
                return ts, kv
    return cands[-1], cands[-1]


# --------------------------------- kernel ------------------------------------

def _encoder_layer_kernel(
        x_ref,
        wq_ref, bq_ref, wk_ref, bk_ref, wv_ref, bv_ref, wo_ref, bo_ref,
        g1_ref, be1_ref, w1_ref, bf1_ref, w2_ref, bf2_ref, g2_ref, be2_ref,
        o_ref, k_scratch, v_scratch,
        *, num_heads, kv_tile, causal, mm_dtype, approx_recip,
        add_pre_attention_residual):
    """One TransformerEncoderLayer for one (batch, query-tile) grid step.

    x_ref   : (1, S, H)    full sequence of the current batch element
    wq/wk/wv: (nh, H, hd)  head-major projections    bq/bk/bv: (nh, 1, hd)
    wo      : (nh, hd, H)  head-major output proj.   bo: (1, H)
    w1/w2   : (H, F)/(F, H) FFN;  g*/be*: (1, H) LayerNorm scale/shift
    o_ref   : (1, TS, H)   output tile
    k/v_scratch: (nh, S, hd) VMEM, resident across one batch element's tiles
    """
    s_idx = pl.program_id(1)
    seq, hidden = x_ref.shape[1], x_ref.shape[2]
    ts = o_ref.shape[1]
    head_dim = wq_ref.shape[2]
    num_kv = seq // kv_tile
    scale = 1.0 / math.sqrt(head_dim)

    # --- K/V: once per batch element, kept resident in VMEM scratch (the s
    #     grid axis is "arbitrary", so the cross-step carry is legal).
    #     Per-head 2-D matmuls: no (nh, S, H) broadcast of the activations.
    @pl.when(s_idx == 0)
    def _():
        x_kv = x_ref[0].astype(mm_dtype)                          # (S, H)
        for h in range(num_heads):
            k = jnp.dot(x_kv, wk_ref[h],
                        preferred_element_type=jnp.float32) + bk_ref[h]
            v = jnp.dot(x_kv, wv_ref[h],
                        preferred_element_type=jnp.float32) + bv_ref[h]
            # TODO(synk): store K transposed (nh, hd, S) to avoid lane padding
            # of the scratch when head_dim < 128.
            k_scratch[h] = k.astype(mm_dtype)
            v_scratch[h] = v.astype(mm_dtype)

    # --- query tile sliced out of the resident full-seq block (no second DMA)
    q_start = pl.multiple_of(s_idx * ts, ts)
    x_q = x_ref[0, pl.ds(q_start, ts), :]                         # (TS, H)
    x_q_mm = x_q.astype(mm_dtype)

    # --- attention: per-head flash-style online softmax over KV tiles; the
    #     per-head context is folded straight into the (TS, H) output-
    #     projection accumulator (no (nh, TS, S) / (nh, TS, H) intermediates).
    # TODO(synk): for head_dim < 128, group 128 // head_dim heads per matmul so
    # projection outputs are lane-dense on the 256-wide MXU.
    attn = jnp.zeros((ts, hidden), jnp.float32)
    for h in range(num_heads):
        q = jnp.dot(x_q_mm, wq_ref[h],
                    preferred_element_type=jnp.float32) + bq_ref[h]
        q = (q * scale).astype(mm_dtype)          # fold 1/sqrt(hd) into Q
        m_run = jnp.full((ts, 1), -jnp.inf, jnp.float32)
        l_run = jnp.zeros((ts, 1), jnp.float32)
        acc = jnp.zeros((ts, head_dim), jnp.float32)
        for kt in range(num_kv):
            k_blk = k_scratch[h, pl.ds(kt * kv_tile, kv_tile), :]
            v_blk = v_scratch[h, pl.ds(kt * kv_tile, kv_tile), :]
            sc = jax.lax.dot_general(q, k_blk, (((1,), (1,)), ((), ())),
                                     preferred_element_type=jnp.float32)
            if causal:
                # TODO(synk): statically skip fully-masked KV tiles (needs a
                # static query-tile position, e.g. an unrolled s axis).
                q_pos = q_start + jax.lax.broadcasted_iota(
                    jnp.int32, (ts, kv_tile), 0)
                k_pos = kt * kv_tile + jax.lax.broadcasted_iota(
                    jnp.int32, (ts, kv_tile), 1)
                sc = jnp.where(k_pos <= q_pos, sc, -1e30)
            m_new = jnp.maximum(m_run, jnp.max(sc, axis=-1, keepdims=True))
            alpha = jnp.exp(m_run - m_new)
            # TODO(synk): on v6e/v7x exp could run in bf16 (EUP) in the perf
            # config; kept f32 here for cross-generation safety (v5e).
            p = jnp.exp(sc - m_new)
            l_run = alpha * l_run + jnp.sum(p, axis=-1, keepdims=True)
            acc = alpha * acc + jnp.dot(p.astype(mm_dtype), v_blk,
                                        preferred_element_type=jnp.float32)
            m_run = m_new
        ctx = acc * pl.reciprocal(l_run, approx=approx_recip)     # (TS, hd)
        attn = attn + jnp.dot(ctx.astype(mm_dtype), wo_ref[h],
                              preferred_element_type=jnp.float32)
    attn = attn + bo_ref[...]

    # NOTE: the reference layer assigns `residual = x` but never adds it back;
    # the standard behaviour is available behind the explicit flag below.
    if add_pre_attention_residual:
        attn = attn + x_q.astype(jnp.float32)
    h1 = _layer_norm(attn, g1_ref[...], be1_ref[...])

    ff = jnp.dot(h1.astype(mm_dtype), w1_ref[...],
                 preferred_element_type=jnp.float32) + bf1_ref[...]
    ff = jnp.maximum(ff, 0.0)
    ff = jnp.dot(ff.astype(mm_dtype), w2_ref[...],
                 preferred_element_type=jnp.float32) + bf2_ref[...]

    y = _layer_norm(ff + h1, g2_ref[...], be2_ref[...])
    o_ref[0] = y.astype(o_ref.dtype)


# --------------------------------- wrapper ------------------------------------

def encoder_layer_pallas(x, lp, *, num_heads, causal=False,
                         mm_dtype=jnp.bfloat16, seq_tile=None, kv_tile=None,
                         add_pre_attention_residual=False):
    """One encoder layer as a single pallas_call, gridded over (batch, q-tiles)."""
    batch, seq, hidden = x.shape
    assert hidden % num_heads == 0
    head_dim = hidden // num_heads
    fcn_hidden = lp["w1"].shape[1]
    mm_dtype = jnp.dtype(mm_dtype)
    approx_recip = mm_dtype != jnp.dtype(jnp.float32)

    # Generation-aware VMEM budgeting / tile selection.
    vmem_cap = _vmem_capacity_bytes()
    est_kw = dict(seq=seq, hidden=hidden, num_heads=num_heads,
                  head_dim=head_dim, fcn_hidden=fcn_hidden,
                  act_itemsize=jnp.dtype(x.dtype).itemsize,
                  mm_itemsize=mm_dtype.itemsize)
    ts_auto, kv_auto = _select_tiles(budget_bytes=int(0.75 * vmem_cap), **est_kw)
    ts = seq_tile if seq_tile is not None else ts_auto
    kv = kv_tile if kv_tile is not None else kv_auto
    assert seq % ts == 0 and seq % kv == 0
    num_s = seq // ts
    est = _estimate_layer_vmem_bytes(ts=ts, kv=kv, **est_kw)
    vmem_limit = int(min(0.8 * vmem_cap, max(32 * 2 ** 20, 2 * est)))

    # Host-side weight re-layout: head-major Q/K/V/O so the kernel only uses
    # leading-axis indexing (no lane slicing). Matmul weights in the MXU
    # operand dtype, biases / LayerNorm params in f32.
    def _head_major(w, b):  # w: (H, H) [in, out], out column = head*hd + d
        w3 = w.reshape(hidden, num_heads, head_dim).transpose(1, 0, 2)
        b3 = b.reshape(1, num_heads, head_dim).transpose(1, 0, 2)
        return w3.astype(mm_dtype), b3.astype(jnp.float32)

    wq3, bq3 = _head_major(lp["wq"], lp["bq"])
    wk3, bk3 = _head_major(lp["wk"], lp["bk"])
    wv3, bv3 = _head_major(lp["wv"], lp["bv"])
    wo3 = lp["wo"].reshape(num_heads, head_dim, hidden).astype(mm_dtype)

    weights = [wq3, bq3, wk3, bk3, wv3, bv3, wo3,
               lp["bo"].astype(jnp.float32),
               lp["g1"].astype(jnp.float32), lp["be1"].astype(jnp.float32),
               lp["w1"].astype(mm_dtype), lp["bf1"].astype(jnp.float32),
               lp["w2"].astype(mm_dtype), lp["bf2"].astype(jnp.float32),
               lp["g2"].astype(jnp.float32), lp["be2"].astype(jnp.float32)]

    def _resident(a):   # whole array, constant block index -> stays in VMEM
        nd = a.ndim
        return pl.BlockSpec(a.shape, lambda b, s, nd=nd: (0,) * nd)

    in_specs = [
        # Single activation input: the query tile is sliced in-kernel out of
        # the same resident full-sequence block used for K/V.
        pl.BlockSpec((1, seq, hidden), lambda b, s: (b, 0, 0)),
    ] + [_resident(w) for w in weights]
    out_spec = pl.BlockSpec((1, ts, hidden), lambda b, s: (b, s, 0))

    kernel = functools.partial(
        _encoder_layer_kernel, num_heads=num_heads, kv_tile=kv, causal=causal,
        mm_dtype=mm_dtype, approx_recip=approx_recip,
        add_pre_attention_residual=add_pre_attention_residual)

    # TODO(synk): when batch < 2 on a 2-TC chip (v7x), also split the
    # query-tile axis across cores instead of only the batch axis.
    return pl.pallas_call(
        kernel,
        out_shape=jax.ShapeDtypeStruct((batch, seq, hidden), x.dtype),
        grid_spec=pltpu.PrefetchScalarGridSpec(
            num_scalar_prefetch=0,
            grid=(batch, num_s),
            in_specs=in_specs,
            out_specs=out_spec,
            scratch_shapes=[
                pltpu.VMEM((num_heads, seq, head_dim), mm_dtype),  # K resident
                pltpu.VMEM((num_heads, seq, head_dim), mm_dtype),  # V resident
            ],
        ),
        compiler_params=pltpu.CompilerParams(
            # batch axis parallel (megacore); query-tile axis arbitrary because
            # the K/V scratch carries state across it.
            dimension_semantics=("parallel", "arbitrary"),
            vmem_limit_bytes=vmem_limit,
        ),
    )(x, *weights)


# ------------------------------ parameter init --------------------------------

def _linear_init(key, fan_in, fan_out):
    kw, kb = jax.random.split(key)
    w = jax.random.normal(kw, (fan_in, fan_out), jnp.float32) / math.sqrt(fan_in)
    b = 0.02 * jax.random.normal(kb, (1, fan_out), jnp.float32)
    return w, b


def init_layer_params(key, hidden, fcn_hidden):
    ks = jax.random.split(key, 10)
    wq, bq = _linear_init(ks[0], hidden, hidden)
    wk, bk = _linear_init(ks[1], hidden, hidden)
    wv, bv = _linear_init(ks[2], hidden, hidden)
    wo, bo = _linear_init(ks[3], hidden, hidden)
    w1, bf1 = _linear_init(ks[4], hidden, fcn_hidden)
    w2, bf2 = _linear_init(ks[5], fcn_hidden, hidden)
    g1 = 1.0 + 0.1 * jax.random.normal(ks[6], (1, hidden), jnp.float32)
    be1 = 0.1 * jax.random.normal(ks[7], (1, hidden), jnp.float32)
    g2 = 1.0 + 0.1 * jax.random.normal(ks[8], (1, hidden), jnp.float32)
    be2 = 0.1 * jax.random.normal(ks[9], (1, hidden), jnp.float32)
    return dict(wq=wq, bq=bq, wk=wk, bk=bk, wv=wv, bv=bv, wo=wo, bo=bo,
                g1=g1, be1=be1, w1=w1, bf1=bf1, w2=w2, bf2=bf2, g2=g2, be2=be2)


def init_encoder_params(key, num_layers, hidden, fcn_hidden, vocab_size,
                        max_seq_len):
    ks = jax.random.split(key, num_layers + 2)
    tok_emb = 0.02 * jax.random.normal(ks[0], (vocab_size, hidden), jnp.float32)
    pos_emb = 0.02 * jax.random.normal(ks[1], (max_seq_len, hidden), jnp.float32)
    layers = [init_layer_params(ks[2 + i], hidden, fcn_hidden)
              for i in range(num_layers)]
    # TODO(synk): logit_proj exists in __init__ but is unused by forward(); omitted.
    return dict(tok_emb=tok_emb, pos_emb=pos_emb, layers=layers)


# ------------------------------ full forward ----------------------------------

@functools.partial(jax.jit, static_argnames=("num_heads", "causal", "mm_dtype",
                                              "add_pre_attention_residual"))
def transformer_encoder(input_ids, params, *, num_heads, causal=False,
                        mm_dtype=jnp.bfloat16, add_pre_attention_residual=False):
    """input_ids: int32[B, S]  ->  float32[B, S, hidden]"""
    seq = input_ids.shape[1]
    x = params["tok_emb"][input_ids] + params["pos_emb"][:seq][None, :, :]
    # Dropout layers are identity in eval mode (train mode not implemented).
    act_dtype = (jnp.float32 if jnp.dtype(mm_dtype) == jnp.dtype(jnp.float32)
                 else jnp.bfloat16)
    x = x.astype(act_dtype)   # bf16 activation carry in the perf config
    for lp in params["layers"]:
        x = encoder_layer_pallas(
            x, lp, num_heads=num_heads, causal=causal, mm_dtype=mm_dtype,
            add_pre_attention_residual=add_pre_attention_residual)
    # TODO(synk): fuse layers into one pallas_call (stream per-layer weights
    # via emit_pipeline) or prefetch layer l+1 weights during layer l to cut
    # the per-layer HBM round trip of x.
    return x.astype(jnp.float32)


# ------------------------- pure-JAX reference (f32) ---------------------------

def _ref_layer(x, p, num_heads, causal, add_pre_attention_residual=False):
    b, s, h = x.shape
    hd = h // num_heads
    q = x @ p["wq"] + p["bq"]
    k = x @ p["wk"] + p["bk"]
    v = x @ p["wv"] + p["bv"]

    def heads(t):
        return t.reshape(b, s, num_heads, hd).transpose(0, 2, 1, 3)

    qh, kh, vh = heads(q), heads(k), heads(v)
    sc = jnp.einsum("bhqd,bhkd->bhqk", qh, kh) / math.sqrt(hd)
    if causal:
        qi = jax.lax.broadcasted_iota(jnp.int32, (s, s), 0)
        ki = jax.lax.broadcasted_iota(jnp.int32, (s, s), 1)
        sc = jnp.where((ki <= qi)[None, None], sc, -1e30)
    probs = jax.nn.softmax(sc, axis=-1)
    ctx = jnp.einsum("bhqk,bhkd->bhqd", probs, vh)
    ctx = ctx.transpose(0, 2, 1, 3).reshape(b, s, h)
    attn = ctx @ p["wo"] + p["bo"]
    if add_pre_attention_residual:
        attn = attn + x
    h1 = _layer_norm(attn, p["g1"], p["be1"])   # reference drops the residual
    ff = jnp.maximum(h1 @ p["w1"] + p["bf1"], 0.0)
    ff = ff @ p["w2"] + p["bf2"]
    return _layer_norm(ff + h1, p["g2"], p["be2"])


def transformer_encoder_ref(input_ids, params, num_heads, causal=False,
                            add_pre_attention_residual=False):
    seq = input_ids.shape[1]
    x = params["tok_emb"][input_ids] + params["pos_emb"][:seq][None, :, :]
    for lp in params["layers"]:
        x = _ref_layer(x, lp, num_heads, causal, add_pre_attention_residual)
    return x


# ----------------------------------- main --------------------------------------

if __name__ == "__main__":
    B, S = 2, 8
    num_layers, hidden, num_heads, fcn_hidden = 2, 32, 4, 64
    vocab_size, max_seq_len = 50, 16

    key = jax.random.PRNGKey(0)
    k_ids, k_par = jax.random.split(key)
    input_ids = jax.random.randint(k_ids, (B, S), 0, vocab_size, dtype=jnp.int32)
    params = init_encoder_params(k_par, num_layers, hidden, fcn_hidden,
                                 vocab_size, max_seq_len)

    ref = transformer_encoder_ref(input_ids, params, num_heads)

    # 1) Exact-semantics check: f32 MXU operands / f32 activation carry must
    #    match the pure-JAX (PyTorch-equivalent) reference tightly.
    out_f32 = jax.block_until_ready(
        transformer_encoder(input_ids, params, num_heads=num_heads,
                            causal=False, mm_dtype=jnp.float32))
    assert out_f32.shape == (B, S, hidden), out_f32.shape
    assert bool(jnp.all(jnp.isfinite(out_f32)))
    assert bool(jnp.allclose(out_f32, ref, rtol=1e-4, atol=1e-4)), \
        float(jnp.max(jnp.abs(out_f32 - ref)))

    # 1b) Causal-mask path (f32).
    ref_c = transformer_encoder_ref(input_ids, params, num_heads, causal=True)
    out_c = jax.block_until_ready(
        transformer_encoder(input_ids, params, num_heads=num_heads,
                            causal=True, mm_dtype=jnp.float32))
    assert bool(jnp.all(jnp.isfinite(out_c)))
    assert bool(jnp.allclose(out_c, ref_c, rtol=1e-4, atol=1e-4)), \
        float(jnp.max(jnp.abs(out_c - ref_c)))

    # 2) Performance configuration: bf16 MXU operands + bf16 activation carry,
    #    f32 accumulation / LayerNorm / softmax, approx reciprocal. Coarse
    #    tolerance (bf16 rounding compounds over 2 layers x ~5 matmuls); the
    #    f32 check above is the semantic check.
    out = jax.block_until_ready(
        transformer_encoder(input_ids, params, num_heads=num_heads,
                            causal=False))
    assert out.shape == (B, S, hidden), out.shape
    assert bool(jnp.all(jnp.isfinite(out)))
    assert bool(jnp.allclose(out, ref, rtol=2e-1, atol=2e-1)), \
        float(jnp.max(jnp.abs(out - ref)))

    print("KERNEL_OK")
</pallas_src>

<mosaic_0001>
module attributes {stable_mosaic.version = 11 : i64} {
  func.func @_encoder_layer_kernel(%arg0: i32, %arg1: i32, %arg2: memref<1x8x32xf32, #tpu.memory_space<vmem>>, %arg3: memref<4x32x8xf32, #tpu.memory_space<vmem>>, %arg4: memref<4x1x8xf32, #tpu.memory_space<vmem>>, %arg5: memref<4x32x8xf32, #tpu.memory_space<vmem>>, %arg6: memref<4x1x8xf32, #tpu.memory_space<vmem>>, %arg7: memref<4x32x8xf32, #tpu.memory_space<vmem>>, %arg8: memref<4x1x8xf32, #tpu.memory_space<vmem>>, %arg9: memref<4x8x32xf32, #tpu.memory_space<vmem>>, %arg10: memref<1x32xf32, #tpu.memory_space<vmem>>, %arg11: memref<1x32xf32, #tpu.memory_space<vmem>>, %arg12: memref<1x32xf32, #tpu.memory_space<vmem>>, %arg13: memref<32x64xf32, #tpu.memory_space<vmem>>, %arg14: memref<1x64xf32, #tpu.memory_space<vmem>>, %arg15: memref<64x32xf32, #tpu.memory_space<vmem>>, %arg16: memref<1x32xf32, #tpu.memory_space<vmem>>, %arg17: memref<1x32xf32, #tpu.memory_space<vmem>>, %arg18: memref<1x32xf32, #tpu.memory_space<vmem>>, %arg19: memref<1x8x32xf32, #tpu.memory_space<vmem>>, %arg20: memref<4x8x8xf32, #tpu.memory_space<vmem>>, %arg21: memref<4x8x8xf32, #tpu.memory_space<vmem>>) attributes {dimension_semantics = [#tpu.dimension_semantics<parallel>, #tpu.dimension_semantics<arbitrary>], iteration_bounds = array<i64: 2, 1>, scalar_prefetch = 0 : i64, scratch_operands = 2 : i64, tpu.core_type = #tpu.core_type<tc>, window_params = [{transform_indices = @transform_0, window_bounds = array<i64: 1, 8, 32>}, {pipeline_mode = #tpu.pipeline_mode<synchronous>, transform_indices = @transform_1, window_bounds = array<i64: 4, 32, 8>}, {pipeline_mode = #tpu.pipeline_mode<synchronous>, transform_indices = @transform_2, window_bounds = array<i64: 4, 1, 8>}, {pipeline_mode = #tpu.pipeline_mode<synchronous>, transform_indices = @transform_3, window_bounds = array<i64: 4, 32, 8>}, {pipeline_mode = #tpu.pipeline_mode<synchronous>, transform_indices = @transform_4, window_bounds = array<i64: 4, 1, 8>}, {pipeline_mode = #tpu.pipeline_mode<synchronous>, transform_indices = @transform_5, window_bounds = array<i64: 4, 32, 8>}, {pipeline_mode = #tpu.pipeline_mode<synchronous>, transform_indices = @transform_6, window_bounds = array<i64: 4, 1, 8>}, {pipeline_mode = #tpu.pipeline_mode<synchronous>, transform_indices = @transform_7, window_bounds = array<i64: 4, 8, 32>}, {pipeline_mode = #tpu.pipeline_mode<synchronous>, transform_indices = @transform_8, window_bounds = array<i64: 1, 32>}, {pipeline_mode = #tpu.pipeline_mode<synchronous>, transform_indices = @transform_9, window_bounds = array<i64: 1, 32>}, {pipeline_mode = #tpu.pipeline_mode<synchronous>, transform_indices = @transform_10, window_bounds = array<i64: 1, 32>}, {pipeline_mode = #tpu.pipeline_mode<synchronous>, transform_indices = @transform_11, window_bounds = array<i64: 32, 64>}, {pipeline_mode = #tpu.pipeline_mode<synchronous>, transform_indices = @transform_12, window_bounds = array<i64: 1, 64>}, {pipeline_mode = #tpu.pipeline_mode<synchronous>, transform_indices = @transform_13, window_bounds = array<i64: 64, 32>}, {pipeline_mode = #tpu.pipeline_mode<synchronous>, transform_indices = @transform_14, window_bounds = array<i64: 1, 32>}, {pipeline_mode = #tpu.pipeline_mode<synchronous>, transform_indices = @transform_15, window_bounds = array<i64: 1, 32>}, {pipeline_mode = #tpu.pipeline_mode<synchronous>, transform_indices = @transform_16, window_bounds = array<i64: 1, 32>}, {transform_indices = @transform_17, window_bounds = array<i64: 1, 8, 32>}]} {
    %c0_i32 = arith.constant 0 : i32
    %0 = arith.cmpi eq, %arg1, %c0_i32 : i32
    %1 = arith.extui %0 : i1 to i32
    %c0_i32_0 = arith.constant 0 : i32
    %2 = arith.cmpi ne, %1, %c0_i32_0 : i32
    scf.if %2 {
      %c0_133 = arith.constant 0 : index
      %c0_134 = arith.constant 0 : index
      %c0_135 = arith.constant 0 : index
      %236 = vector.load %arg2[%c0_133, %c0_134, %c0_135] : memref<1x8x32xf32, #tpu.memory_space<vmem>>, vector<1x8x32xf32>
      %237 = vector.shape_cast %236 : vector<1x8x32xf32> to vector<8x32xf32>
      %c0_136 = arith.constant 0 : index
      %c0_137 = arith.constant 0 : index
      %c0_138 = arith.constant 0 : index
      %238 = vector.load %arg5[%c0_136, %c0_137, %c0_138] : memref<4x32x8xf32, #tpu.memory_space<vmem>>, vector<1x32x8xf32>
      %239 = vector.shape_cast %238 : vector<1x32x8xf32> to vector<32x8xf32>
      %cst_139 = arith.constant dense<0.000000e+00> : vector<8x8xf32>
      %240 = tpu.matmul %237, %239, %cst_139 {dimension_numbers = #tpu.dot_dimension_numbers<[1], [0], [0], [1], [0, 0, 1, 1], [], []>} : vector<8x32xf32>, vector<32x8xf32>, vector<8x8xf32> -> vector<8x8xf32>
      %c0_140 = arith.constant 0 : index
      %c0_141 = arith.constant 0 : index
      %c0_142 = arith.constant 0 : index
      %241 = vector.load %arg6[%c0_140, %c0_141, %c0_142] : memref<4x1x8xf32, #tpu.memory_space<vmem>>, vector<1x1x8xf32>
      %242 = vector.shape_cast %241 : vector<1x1x8xf32> to vector<1x8xf32>
      %243 = vector.broadcast %242 : vector<1x8xf32> to vector<8x8xf32>
      %244 = arith.addf %240, %243 : vector<8x8xf32>
      %c0_143 = arith.constant 0 : index
      %c0_144 = arith.constant 0 : index
      %c0_145 = arith.constant 0 : index
      %245 = vector.load %arg7[%c0_143, %c0_144, %c0_145] : memref<4x32x8xf32, #tpu.memory_space<vmem>>, vector<1x32x8xf32>
      %246 = vector.shape_cast %245 : vector<1x32x8xf32> to vector<32x8xf32>
      %cst_146 = arith.constant dense<0.000000e+00> : vector<8x8xf32>
      %247 = tpu.matmul %237, %246, %cst_146 {dimension_numbers = #tpu.dot_dimension_numbers<[1], [0], [0], [1], [0, 0, 1, 1], [], []>} : vector<8x32xf32>, vector<32x8xf32>, vector<8x8xf32> -> vector<8x8xf32>
      %c0_147 = arith.constant 0 : index
      %c0_148 = arith.constant 0 : index
      %c0_149 = arith.constant 0 : index
      %248 = vector.load %arg8[%c0_147, %c0_148, %c0_149] : memref<4x1x8xf32, #tpu.memory_space<vmem>>, vector<1x1x8xf32>
      %249 = vector.shape_cast %248 : vector<1x1x8xf32> to vector<1x8xf32>
      %250 = vector.broadcast %249 : vector<1x8xf32> to vector<8x8xf32>
      %251 = arith.addf %247, %250 : vector<8x8xf32>
      %c0_150 = arith.constant 0 : index
      %c0_151 = arith.constant 0 : index
      %c0_152 = arith.constant 0 : index
      %252 = vector.load %arg20[%c0_150, %c0_151, %c0_152] : memref<4x8x8xf32, #tpu.memory_space<vmem>>, vector<1x8x8xf32>
      %253 = vector.shape_cast %252 : vector<1x8x8xf32> to vector<8x8xf32>
      %254 = vector.shape_cast %244 : vector<8x8xf32> to vector<1x8x8xf32>
      tpu.vector_store %arg20[%c0_150, %c0_151, %c0_152], %254 {strides = array<i32>} : memref<4x8x8xf32, #tpu.memory_space<vmem>>, vector<1x8x8xf32>,
      %c0_153 = arith.constant 0 : index
      %c0_154 = arith.constant 0 : index
      %c0_155 = arith.constant 0 : index
      %255 = vector.load %arg21[%c0_153, %c0_154, %c0_155] : memref<4x8x8xf32, #tpu.memory_space<vmem>>, vector<1x8x8xf32>
      %256 = vector.shape_cast %255 : vector<1x8x8xf32> to vector<8x8xf32>
      %257 = vector.shape_cast %251 : vector<8x8xf32> to vector<1x8x8xf32>
      tpu.vector_store %arg21[%c0_153, %c0_154, %c0_155], %257 {strides = array<i32>} : memref<4x8x8xf32, #tpu.memory_space<vmem>>, vector<1x8x8xf32>,
      %c1_156 = arith.constant 1 : index
      %c0_157 = arith.constant 0 : index
      %c0_158 = arith.constant 0 : index
      %258 = vector.load %arg5[%c1_156, %c0_157, %c0_158] : memref<4x32x8xf32, #tpu.memory_space<vmem>>, vector<1x32x8xf32>
      %259 = vector.shape_cast %258 : vector<1x32x8xf32> to vector<32x8xf32>
      %cst_159 = arith.constant dense<0.000000e+00> : vector<8x8xf32>
      %260 = tpu.matmul %237, %259, %cst_159 {dimension_numbers = #tpu.dot_dimension_numbers<[1], [0], [0], [1], [0, 0, 1, 1], [], []>} : vector<8x32xf32>, vector<32x8xf32>, vector<8x8xf32> -> vector<8x8xf32>
      %c1_160 = arith.constant 1 : index
      %c0_161 = arith.constant 0 : index
      %c0_162 = arith.constant 0 : index
      %261 = vector.load %arg6[%c1_160, %c0_161, %c0_162] : memref<4x1x8xf32, #tpu.memory_space<vmem>>, vector<1x1x8xf32>
      %262 = vector.shape_cast %261 : vector<1x1x8xf32> to vector<1x8xf32>
      %263 = vector.broadcast %262 : vector<1x8xf32> to vector<8x8xf32>
      %264 = arith.addf %260, %263 : vector<8x8xf32>
      %c1_163 = arith.constant 1 : index
      %c0_164 = arith.constant 0 : index
      %c0_165 = arith.constant 0 : index
      %265 = vector.load %arg7[%c1_163, %c0_164, %c0_165] : memref<4x32x8xf32, #tpu.memory_space<vmem>>, vector<1x32x8xf32>
      %266 = vector.shape_cast %265 : vector<1x32x8xf32> to vector<32x8xf32>
      %cst_166 = arith.constant dense<0.000000e+00> : vector<8x8xf32>
      %267 = tpu.matmul %237, %266, %cst_166 {dimension_numbers = #tpu.dot_dimension_numbers<[1], [0], [0], [1], [0, 0, 1, 1], [], []>} : vector<8x32xf32>, vector<32x8xf32>, vector<8x8xf32> -> vector<8x8xf32>
      %c1_167 = arith.constant 1 : index
      %c0_168 = arith.constant 0 : index
      %c0_169 = arith.constant 0 : index
      %268 = vector.load %arg8[%c1_167, %c0_168, %c0_169] : memref<4x1x8xf32, #tpu.memory_space<vmem>>, vector<1x1x8xf32>
      %269 = vector.shape_cast %268 : vector<1x1x8xf32> to vector<1x8xf32>
      %270 = vector.broadcast %269 : vector<1x8xf32> to vector<8x8xf32>
      %271 = arith.addf %267, %270 : vector<8x8xf32>
      %c1_170 = arith.constant 1 : index
      %c0_171 = arith.constant 0 : index
      %c0_172 = arith.constant 0 : index
      %272 = vector.load %arg20[%c1_170, %c0_171, %c0_172] : memref<4x8x8xf32, #tpu.memory_space<vmem>>, vector<1x8x8xf32>
      %273 = vector.shape_cast %272 : vector<1x8x8xf32> to vector<8x8xf32>
      %274 = vector.shape_cast %264 : vector<8x8xf32> to vector<1x8x8xf32>
      tpu.vector_store %arg20[%c1_170, %c0_171, %c0_172], %274 {strides = array<i32>} : memref<4x8x8xf32, #tpu.memory_space<vmem>>, vector<1x8x8xf32>,
      %c1_173 = arith.constant 1 : index
      %c0_174 = arith.constant 0 : index
      %c0_175 = arith.constant 0 : index
      %275 = vector.load %arg21[%c1_173, %c0_174, %c0_175] : memref<4x8x8xf32, #tpu.memory_space<vmem>>, vector<1x8x8xf32>
      %276 = vector.shape_cast %275 : vector<1x8x8xf32> to vector<8x8xf32>
      %277 = vector.shape_cast %271 : vector<8x8xf32> to vector<1x8x8xf32>
      tpu.vector_store %arg21[%c1_173, %c0_174, %c0_175], %277 {strides = array<i32>} : memref<4x8x8xf32, #tpu.memory_space<vmem>>, vector<1x8x8xf32>,
      %c2_176 = arith.constant 2 : index
      %c0_177 = arith.constant 0 : index
      %c0_178 = arith.constant 0 : index
      %278 = vector.load %arg5[%c2_176, %c0_177, %c0_178] : memref<4x32x8xf32, #tpu.memory_space<vmem>>, vector<1x32x8xf32>
      %279 = vector.shape_cast %278 : vector<1x32x8xf32> to vector<32x8xf32>
      %cst_179 = arith.constant dense<0.000000e+00> : vector<8x8xf32>
      %280 = tpu.matmul %237, %279, %cst_179 {dimension_numbers = #tpu.dot_dimension_numbers<[1], [0], [0], [1], [0, 0, 1, 1], [], []>} : vector<8x32xf32>, vector<32x8xf32>, vector<8x8xf32> -> vector<8x8xf32>
      %c2_180 = arith.constant 2 : index
      %c0_181 = arith.constant 0 : index
      %c0_182 = arith.constant 0 : index
      %281 = vector.load %arg6[%c2_180, %c0_181, %c0_182] : memref<4x1x8xf32, #tpu.memory_space<vmem>>, vector<1x1x8xf32>
      %282 = vector.shape_cast %281 : vector<1x1x8xf32> to vector<1x8xf32>
      %283 = vector.broadcast %282 : vector<1x8xf32> to vector<8x8xf32>
      %284 = arith.addf %280, %283 : vector<8x8xf32>
      %c2_183 = arith.constant 2 : index
      %c0_184 = arith.constant 0 : index
      %c0_185 = arith.constant 0 : index
      %285 = vector.load %arg7[%c2_183, %c0_184, %c0_185] : memref<4x32x8xf32, #tpu.memory_space<vmem>>, vector<1x32x8xf32>
      %286 = vector.shape_cast %285 : vector<1x32x8xf32> to vector<32x8xf32>
      %cst_186 = arith.constant dense<0.000000e+00> : vector<8x8xf32>
      %287 = tpu.matmul %237, %286, %cst_186 {dimension_numbers = #tpu.dot_dimension_numbers<[1], [0], [0], [1], [0, 0, 1, 1], [], []>} : vector<8x32xf32>, vector<32x8xf32>, vector<8x8xf32> -> vector<8x8xf32>
      %c2_187 = arith.constant 2 : index
      %c0_188 = arith.constant 0 : index
      %c0_189 = arith.constant 0 : index
      %288 = vector.load %arg8[%c2_187, %c0_188, %c0_189] : memref<4x1x8xf32, #tpu.memory_space<vmem>>, vector<1x1x8xf32>
      %289 = vector.shape_cast %288 : vector<1x1x8xf32> to vector<1x8xf32>
      %290 = vector.broadcast %289 : vector<1x8xf32> to vector<8x8xf32>
      %291 = arith.addf %287, %290 : vector<8x8xf32>
      %c2_190 = arith.constant 2 : index
      %c0_191 = arith.constant 0 : index
      %c0_192 = arith.constant 0 : index
      %292 = vector.load %arg20[%c2_190, %c0_191, %c0_192] : memref<4x8x8xf32, #tpu.memory_space<vmem>>, vector<1x8x8xf32>
      %293 = vector.shape_cast %292 : vector<1x8x8xf32> to vector<8x8xf32>
      %294 = vector.shape_cast %284 : vector<8x8xf32> to vector<1x8x8xf32>
      tpu.vector_store %arg20[%c2_190, %c0_191, %c0_192], %294 {strides = array<i32>} : memref<4x8x8xf32, #tpu.memory_space<vmem>>, vector<1x8x8xf32>,
      %c2_193 = arith.constant 2 : index
      %c0_194 = arith.constant 0 : index
      %c0_195 = arith.constant 0 : index
      %295 = vector.load %arg21[%c2_193, %c0_194, %c0_195] : memref<4x8x8xf32, #tpu.memory_space<vmem>>, vector<1x8x8xf32>
      %296 = vector.shape_cast %295 : vector<1x8x8xf32> to vector<8x8xf32>
      %297 = vector.shape_cast %291 : vector<8x8xf32> to vector<1x8x8xf32>
      tpu.vector_store %arg21[%c2_193, %c0_194, %c0_195], %297 {strides = array<i32>} : memref<4x8x8xf32, #tpu.memory_space<vmem>>, vector<1x8x8xf32>,
      %c3_196 = arith.constant 3 : index
      %c0_197 = arith.constant 0 : index
      %c0_198 = arith.constant 0 : index
      %298 = vector.load %arg5[%c3_196, %c0_197, %c0_198] : memref<4x32x8xf32, #tpu.memory_space<vmem>>, vector<1x32x8xf32>
      %299 = vector.shape_cast %298 : vector<1x32x8xf32> to vector<32x8xf32>
      %cst_199 = arith.constant dense<0.000000e+00> : vector<8x8xf32>
      %300 = tpu.matmul %237, %299, %cst_199 {dimension_numbers = #tpu.dot_dimension_numbers<[1], [0], [0], [1], [0, 0, 1, 1], [], []>} : vector<8x32xf32>, vector<32x8xf32>, vector<8x8xf32> -> vector<8x8xf32>
      %c3_200 = arith.constant 3 : index
      %c0_201 = arith.constant 0 : index
      %c0_202 = arith.constant 0 : index
      %301 = vector.load %arg6[%c3_200, %c0_201, %c0_202] : memref<4x1x8xf32, #tpu.memory_space<vmem>>, vector<1x1x8xf32>
      %302 = vector.shape_cast %301 : vector<1x1x8xf32> to vector<1x8xf32>
      %303 = vector.broadcast %302 : vector<1x8xf32> to vector<8x8xf32>
      %304 = arith.addf %300, %303 : vector<8x8xf32>
      %c3_203 = arith.constant 3 : index
      %c0_204 = arith.constant 0 : index
      %c0_205 = arith.constant 0 : index
      %305 = vector.load %arg7[%c3_203, %c0_204, %c0_205] : memref<4x32x8xf32, #tpu.memory_space<vmem>>, vector<1x32x8xf32>
      %306 = vector.shape_cast %305 : vector<1x32x8xf32> to vector<32x8xf32>
      %cst_206 = arith.constant dense<0.000000e+00> : vector<8x8xf32>
      %307 = tpu.matmul %237, %306, %cst_206 {dimension_numbers = #tpu.dot_dimension_numbers<[1], [0], [0], [1], [0, 0, 1, 1], [], []>} : vector<8x32xf32>, vector<32x8xf32>, vector<8x8xf32> -> vector<8x8xf32>
      %c3_207 = arith.constant 3 : index
      %c0_208 = arith.constant 0 : index
      %c0_209 = arith.constant 0 : index
      %308 = vector.load %arg8[%c3_207, %c0_208, %c0_209] : memref<4x1x8xf32, #tpu.memory_space<vmem>>, vector<1x1x8xf32>
      %309 = vector.shape_cast %308 : vector<1x1x8xf32> to vector<1x8xf32>
      %310 = vector.broadcast %309 : vector<1x8xf32> to vector<8x8xf32>
      %311 = arith.addf %307, %310 : vector<8x8xf32>
      %c3_210 = arith.constant 3 : index
      %c0_211 = arith.constant 0 : index
      %c0_212 = arith.constant 0 : index
      %312 = vector.load %arg20[%c3_210, %c0_211, %c0_212] : memref<4x8x8xf32, #tpu.memory_space<vmem>>, vector<1x8x8xf32>
      %313 = vector.shape_cast %312 : vector<1x8x8xf32> to vector<8x8xf32>
      %314 = vector.shape_cast %304 : vector<8x8xf32> to vector<1x8x8xf32>
      tpu.vector_store %arg20[%c3_210, %c0_211, %c0_212], %314 {strides = array<i32>} : memref<4x8x8xf32, #tpu.memory_space<vmem>>, vector<1x8x8xf32>,
      %c3_213 = arith.constant 3 : index
      %c0_214 = arith.constant 0 : index
      %c0_215 = arith.constant 0 : index
      %315 = vector.load %arg21[%c3_213, %c0_214, %c0_215] : memref<4x8x8xf32, #tpu.memory_space<vmem>>, vector<1x8x8xf32>
      %316 = vector.shape_cast %315 : vector<1x8x8xf32> to vector<8x8xf32>
      %317 = vector.shape_cast %311 : vector<8x8xf32> to vector<1x8x8xf32>
      tpu.vector_store %arg21[%c3_213, %c0_214, %c0_215], %317 {strides = array<i32>} : memref<4x8x8xf32, #tpu.memory_space<vmem>>, vector<1x8x8xf32>,
    } else {
    }
    %c8_i32 = arith.constant 8 : i32
    %3 = arith.muli %arg1, %c8_i32 : i32
    %4 = tpu.assume_multiple %3, 8 : i32
    %c0 = arith.constant 0 : index
    %5 = arith.index_cast %4 : i32 to index
    %c0_1 = arith.constant 0 : index
    %6 = vector.load %arg2[%c0, %5, %c0_1] : memref<1x8x32xf32, #tpu.memory_space<vmem>>, vector<1x8x32xf32>
    %7 = vector.shape_cast %6 : vector<1x8x32xf32> to vector<8x32xf32>
    %cst = arith.constant 0.000000e+00 : f32
    %8 = vector.broadcast %cst : f32 to vector<8x32xf32>
    %c0_2 = arith.constant 0 : index
    %c0_3 = arith.constant 0 : index
    %c0_4 = arith.constant 0 : index
    %9 = vector.load %arg3[%c0_2, %c0_3, %c0_4] : memref<4x32x8xf32, #tpu.memory_space<vmem>>, vector<1x32x8xf32>
    %10 = vector.shape_cast %9 : vector<1x32x8xf32> to vector<32x8xf32>
    %cst_5 = arith.constant dense<0.000000e+00> : vector<8x8xf32>
    %11 = tpu.matmul %7, %10, %cst_5 {dimension_numbers = #tpu.dot_dimension_numbers<[1], [0], [0], [1], [0, 0, 1, 1], [], []>} : vector<8x32xf32>, vector<32x8xf32>, vector<8x8xf32> -> vector<8x8xf32>
    %c0_6 = arith.constant 0 : index
    %c0_7 = arith.constant 0 : index
    %c0_8 = arith.constant 0 : index
    %12 = vector.load %arg4[%c0_6, %c0_7, %c0_8] : memref<4x1x8xf32, #tpu.memory_space<vmem>>, vector<1x1x8xf32>
    %13 = vector.shape_cast %12 : vector<1x1x8xf32> to vector<1x8xf32>
    %14 = vector.broadcast %13 : vector<1x8xf32> to vector<8x8xf32>
    %15 = arith.addf %11, %14 : vector<8x8xf32>
    %cst_9 = arith.constant 0.353553385 : f32
    %16 = vector.broadcast %cst_9 : f32 to vector<8x8xf32>
    %17 = arith.mulf %15, %16 : vector<8x8xf32>
    %cst_10 = arith.constant 0xFF800000 : f32
    %18 = vector.broadcast %cst_10 : f32 to vector<8x1xf32>
    %cst_11 = arith.constant 0.000000e+00 : f32
    %19 = vector.broadcast %cst_11 : f32 to vector<8x1xf32>
    %cst_12 = arith.constant 0.000000e+00 : f32
    %20 = vector.broadcast %cst_12 : f32 to vector<8x8xf32>
    %c0_13 = arith.constant 0 : index
    %c0_14 = arith.constant 0 : index
    %c0_15 = arith.constant 0 : index
    %21 = vector.load %arg20[%c0_13, %c0_14, %c0_15] : memref<4x8x8xf32, #tpu.memory_space<vmem>>, vector<1x8x8xf32>
    %22 = vector.shape_cast %21 : vector<1x8x8xf32> to vector<8x8xf32>
    %c0_16 = arith.constant 0 : index
    %c0_17 = arith.constant 0 : index
    %c0_18 = arith.constant 0 : index
    %23 = vector.load %arg21[%c0_16, %c0_17, %c0_18] : memref<4x8x8xf32, #tpu.memory_space<vmem>>, vector<1x8x8xf32>
    %24 = vector.shape_cast %23 : vector<1x8x8xf32> to vector<8x8xf32>
    %cst_19 = arith.constant dense<0.000000e+00> : vector<8x8xf32>
    %25 = tpu.matmul %17, %22, %cst_19 {dimension_numbers = #tpu.dot_dimension_numbers<[1], [1], [0], [0], [0, 0, 1, 0], [], []>} : vector<8x8xf32>, vector<8x8xf32>, vector<8x8xf32> -> vector<8x8xf32>
    %cst_20 = arith.constant dense<0xFF800000> : vector<8xf32>
    %26 = vector.multi_reduction <maximumf>, %25, %cst_20 [1] : vector<8x8xf32> to vector<8xf32>
    %27 = vector.shape_cast %26 : vector<8xf32> to vector<8x1xf32>
    %28 = arith.maximumf %18, %27 : vector<8x1xf32>
    %29 = arith.subf %18, %28 : vector<8x1xf32>
    %30 = math.exp %29 : vector<8x1xf32>
    %31 = vector.broadcast %28 : vector<8x1xf32> to vector<8x8xf32>
    %32 = arith.subf %25, %31 : vector<8x8xf32>
    %33 = math.exp %32 : vector<8x8xf32>
    %34 = arith.mulf %30, %19 : vector<8x1xf32>
    %cst_21 = arith.constant dense<0.000000e+00> : vector<8xf32>
    %35 = vector.multi_reduction <add>, %33, %cst_21 [1] : vector<8x8xf32> to vector<8xf32>
    %36 = vector.shape_cast %35 : vector<8xf32> to vector<8x1xf32>
    %37 = arith.addf %34, %36 : vector<8x1xf32>
    %38 = vector.broadcast %30 : vector<8x1xf32> to vector<8x8xf32>
    %39 = arith.mulf %38, %20 : vector<8x8xf32>
    %cst_22 = arith.constant dense<0.000000e+00> : vector<8x8xf32>
    %40 = tpu.matmul %33, %24, %cst_22 {dimension_numbers = #tpu.dot_dimension_numbers<[1], [0], [0], [1], [0, 0, 1, 1], [], []>} : vector<8x8xf32>, vector<8x8xf32>, vector<8x8xf32> -> vector<8x8xf32>
    %41 = arith.addf %39, %40 : vector<8x8xf32>
    %42 = tpu.reciprocal %37 : vector<8x1xf32> -> vector<8x1xf32>
    %43 = vector.broadcast %42 : vector<8x1xf32> to vector<8x8xf32>
    %44 = arith.mulf %41, %43 : vector<8x8xf32>
    %c0_23 = arith.constant 0 : index
    %c0_24 = arith.constant 0 : index
    %c0_25 = arith.constant 0 : index
    %45 = vector.load %arg9[%c0_23, %c0_24, %c0_25] : memref<4x8x32xf32, #tpu.memory_space<vmem>>, vector<1x8x32xf32>
    %46 = vector.shape_cast %45 : vector<1x8x32xf32> to vector<8x32xf32>
    %cst_26 = arith.constant dense<0.000000e+00> : vector<8x32xf32>
    %47 = tpu.matmul %44, %46, %cst_26 {dimension_numbers = #tpu.dot_dimension_numbers<[1], [0], [0], [1], [0, 0, 1, 1], [], []>} : vector<8x8xf32>, vector<8x32xf32>, vector<8x32xf32> -> vector<8x32xf32>
    %48 = arith.addf %8, %47 : vector<8x32xf32>
    %c1 = arith.constant 1 : index
    %c0_27 = arith.constant 0 : index
    %c0_28 = arith.constant 0 : index
    %49 = vector.load %arg3[%c1, %c0_27, %c0_28] : memref<4x32x8xf32, #tpu.memory_space<vmem>>, vector<1x32x8xf32>
    %50 = vector.shape_cast %49 : vector<1x32x8xf32> to vector<32x8xf32>
    %cst_29 = arith.constant dense<0.000000e+00> : vector<8x8xf32>
    %51 = tpu.matmul %7, %50, %cst_29 {dimension_numbers = #tpu.dot_dimension_numbers<[1], [0], [0], [1], [0, 0, 1, 1], [], []>} : vector<8x32xf32>, vector<32x8xf32>, vector<8x8xf32> -> vector<8x8xf32>
    %c1_30 = arith.constant 1 : index
    %c0_31 = arith.constant 0 : index
    %c0_32 = arith.constant 0 : index
    %52 = vector.load %arg4[%c1_30, %c0_31, %c0_32] : memref<4x1x8xf32, #tpu.memory_space<vmem>>, vector<1x1x8xf32>
    %53 = vector.shape_cast %52 : vector<1x1x8xf32> to vector<1x8xf32>
    %54 = vector.broadcast %53 : vector<1x8xf32> to vector<8x8xf32>
    %55 = arith.addf %51, %54 : vector<8x8xf32>
    %cst_33 = arith.constant 0.353553385 : f32
    %56 = vector.broadcast %cst_33 : f32 to vector<8x8xf32>
    %57 = arith.mulf %55, %56 : vector<8x8xf32>
    %cst_34 = arith.constant 0xFF800000 : f32
    %58 = vector.broadcast %cst_34 : f32 to vector<8x1xf32>
    %cst_35 = arith.constant 0.000000e+00 : f32
    %59 = vector.broadcast %cst_35 : f32 to vector<8x1xf32>
    %cst_36 = arith.constant 0.000000e+00 : f32
    %60 = vector.broadcast %cst_36 : f32 to vector<8x8xf32>
    %c1_37 = arith.constant 1 : index
    %c0_38 = arith.constant 0 : index
    %c0_39 = arith.constant 0 : index
    %61 = vector.load %arg20[%c1_37, %c0_38, %c0_39] : memref<4x8x8xf32, #tpu.memory_space<vmem>>, vector<1x8x8xf32>
    %62 = vector.shape_cast %61 : vector<1x8x8xf32> to vector<8x8xf32>
    %c1_40 = arith.constant 1 : index
    %c0_41 = arith.constant 0 : index
    %c0_42 = arith.constant 0 : index
    %63 = vector.load %arg21[%c1_40, %c0_41, %c0_42] : memref<4x8x8xf32, #tpu.memory_space<vmem>>, vector<1x8x8xf32>
    %64 = vector.shape_cast %63 : vector<1x8x8xf32> to vector<8x8xf32>
    %cst_43 = arith.constant dense<0.000000e+00> : vector<8x8xf32>
    %65 = tpu.matmul %57, %62, %cst_43 {dimension_numbers = #tpu.dot_dimension_numbers<[1], [1], [0], [0], [0, 0, 1, 0], [], []>} : vector<8x8xf32>, vector<8x8xf32>, vector<8x8xf32> -> vector<8x8xf32>
    %cst_44 = arith.constant dense<0xFF800000> : vector<8xf32>
    %66 = vector.multi_reduction <maximumf>, %65, %cst_44 [1] : vector<8x8xf32> to vector<8xf32>
    %67 = vector.shape_cast %66 : vector<8xf32> to vector<8x1xf32>
    %68 = arith.maximumf %58, %67 : vector<8x1xf32>
    %69 = arith.subf %58, %68 : vector<8x1xf32>
    %70 = math.exp %69 : vector<8x1xf32>
    %71 = vector.broadcast %68 : vector<8x1xf32> to vector<8x8xf32>
    %72 = arith.subf %65, %71 : vector<8x8xf32>
    %73 = math.exp %72 : vector<8x8xf32>
    %74 = arith.mulf %70, %59 : vector<8x1xf32>
    %cst_45 = arith.constant dense<0.000000e+00> : vector<8xf32>
    %75 = vector.multi_reduction <add>, %73, %cst_45 [1] : vector<8x8xf32> to vector<8xf32>
    %76 = vector.shape_cast %75 : vector<8xf32> to vector<8x1xf32>
    %77 = arith.addf %74, %76 : vector<8x1xf32>
    %78 = vector.broadcast %70 : vector<8x1xf32> to vector<8x8xf32>
    %79 = arith.mulf %78, %60 : vector<8x8xf32>
    %cst_46 = arith.constant dense<0.000000e+00> : vector<8x8xf32>
    %80 = tpu.matmul %73, %64, %cst_46 {dimension_numbers = #tpu.dot_dimension_numbers<[1], [0], [0], [1], [0, 0, 1, 1], [], []>} : vector<8x8xf32>, vector<8x8xf32>, vector<8x8xf32> -> vector<8x8xf32>
    %81 = arith.addf %79, %80 : vector<8x8xf32>
    %82 = tpu.reciprocal %77 : vector<8x1xf32> -> vector<8x1xf32>
    %83 = vector.broadcast %82 : vector<8x1xf32> to vector<8x8xf32>
    %84 = arith.mulf %81, %83 : vector<8x8xf32>
    %c1_47 = arith.constant 1 : index
    %c0_48 = arith.constant 0 : index
    %c0_49 = arith.constant 0 : index
    %85 = vector.load %arg9[%c1_47, %c0_48, %c0_49] : memref<4x8x32xf32, #tpu.memory_space<vmem>>, vector<1x8x32xf32>
    %86 = vector.shape_cast %85 : vector<1x8x32xf32> to vector<8x32xf32>
    %cst_50 = arith.constant dense<0.000000e+00> : vector<8x32xf32>
    %87 = tpu.matmul %84, %86, %cst_50 {dimension_numbers = #tpu.dot_dimension_numbers<[1], [0], [0], [1], [0, 0, 1, 1], [], []>} : vector<8x8xf32>, vector<8x32xf32>, vector<8x32xf32> -> vector<8x32xf32>
    %88 = arith.addf %48, %87 : vector<8x32xf32>
    %c2 = arith.constant 2 : index
    %c0_51 = arith.constant 0 : index
    %c0_52 = arith.constant 0 : index
    %89 = vector.load %arg3[%c2, %c0_51, %c0_52] : memref<4x32x8xf32, #tpu.memory_space<vmem>>, vector<1x32x8xf32>
    %90 = vector.shape_cast %89 : vector<1x32x8xf32> to vector<32x8xf32>
    %cst_53 = arith.constant dense<0.000000e+00> : vector<8x8xf32>
    %91 = tpu.matmul %7, %90, %cst_53 {dimension_numbers = #tpu.dot_dimension_numbers<[1], [0], [0], [1], [0, 0, 1, 1], [], []>} : vector<8x32xf32>, vector<32x8xf32>, vector<8x8xf32> -> vector<8x8xf32>
    %c2_54 = arith.constant 2 : index
    %c0_55 = arith.constant 0 : index
    %c0_56 = arith.constant 0 : index
    %92 = vector.load %arg4[%c2_54, %c0_55, %c0_56] : memref<4x1x8xf32, #tpu.memory_space<vmem>>, vector<1x1x8xf32>
    %93 = vector.shape_cast %92 : vector<1x1x8xf32> to vector<1x8xf32>
    %94 = vector.broadcast %93 : vector<1x8xf32> to vector<8x8xf32>
    %95 = arith.addf %91, %94 : vector<8x8xf32>
    %cst_57 = arith.constant 0.353553385 : f32
    %96 = vector.broadcast %cst_57 : f32 to vector<8x8xf32>
    %97 = arith.mulf %95, %96 : vector<8x8xf32>
    %cst_58 = arith.constant 0xFF800000 : f32
    %98 = vector.broadcast %cst_58 : f32 to vector<8x1xf32>
    %cst_59 = arith.constant 0.000000e+00 : f32
    %99 = vector.broadcast %cst_59 : f32 to vector<8x1xf32>
    %cst_60 = arith.constant 0.000000e+00 : f32
    %100 = vector.broadcast %cst_60 : f32 to vector<8x8xf32>
    %c2_61 = arith.constant 2 : index
    %c0_62 = arith.constant 0 : index
    %c0_63 = arith.constant 0 : index
    %101 = vector.load %arg20[%c2_61, %c0_62, %c0_63] : memref<4x8x8xf32, #tpu.memory_space<vmem>>, vector<1x8x8xf32>
    %102 = vector.shape_cast %101 : vector<1x8x8xf32> to vector<8x8xf32>
    %c2_64 = arith.constant 2 : index
    %c0_65 = arith.constant 0 : index
    %c0_66 = arith.constant 0 : index
    %103 = vector.load %arg21[%c2_64, %c0_65, %c0_66] : memref<4x8x8xf32, #tpu.memory_space<vmem>>, vector<1x8x8xf32>
    %104 = vector.shape_cast %103 : vector<1x8x8xf32> to vector<8x8xf32>
    %cst_67 = arith.constant dense<0.000000e+00> : vector<8x8xf32>
    %105 = tpu.matmul %97, %102, %cst_67 {dimension_numbers = #tpu.dot_dimension_numbers<[1], [1], [0], [0], [0, 0, 1, 0], [], []>} : vector<8x8xf32>, vector<8x8xf32>, vector<8x8xf32> -> vector<8x8xf32>
    %cst_68 = arith.constant dense<0xFF800000> : vector<8xf32>
    %106 = vector.multi_reduction <maximumf>, %105, %cst_68 [1] : vector<8x8xf32> to vector<8xf32>
    %107 = vector.shape_cast %106 : vector<8xf32> to vector<8x1xf32>
    %108 = arith.maximumf %98, %107 : vector<8x1xf32>
    %109 = arith.subf %98, %108 : vector<8x1xf32>
    %110 = math.exp %109 : vector<8x1xf32>
    %111 = vector.broadcast %108 : vector<8x1xf32> to vector<8x8xf32>
    %112 = arith.subf %105, %111 : vector<8x8xf32>
    %113 = math.exp %112 : vector<8x8xf32>
    %114 = arith.mulf %110, %99 : vector<8x1xf32>
    %cst_69 = arith.constant dense<0.000000e+00> : vector<8xf32>
    %115 = vector.multi_reduction <add>, %113, %cst_69 [1] : vector<8x8xf32> to vector<8xf32>
    %116 = vector.shape_cast %115 : vector<8xf32> to vector<8x1xf32>
    %117 = arith.addf %114, %116 : vector<8x1xf32>
    %118 = vector.broadcast %110 : vector<8x1xf32> to vector<8x8xf32>
    %119 = arith.mulf %118, %100 : vector<8x8xf32>
    %cst_70 = arith.constant dense<0.000000e+00> : vector<8x8xf32>
    %120 = tpu.matmul %113, %104, %cst_70 {dimension_numbers = #tpu.dot_dimension_numbers<[1], [0], [0], [1], [0, 0, 1, 1], [], []>} : vector<8x8xf32>, vector<8x8xf32>, vector<8x8xf32> -> vector<8x8xf32>
    %121 = arith.addf %119, %120 : vector<8x8xf32>
    %122 = tpu.reciprocal %117 : vector<8x1xf32> -> vector<8x1xf32>
    %123 = vector.broadcast %122 : vector<8x1xf32> to vector<8x8xf32>
    %124 = arith.mulf %121, %123 : vector<8x8xf32>
    %c2_71 = arith.constant 2 : index
    %c0_72 = arith.constant 0 : index
    %c0_73 = arith.constant 0 : index
    %125 = vector.load %arg9[%c2_71, %c0_72, %c0_73] : memref<4x8x32xf32, #tpu.memory_space<vmem>>, vector<1x8x32xf32>
    %126 = vector.shape_cast %125 : vector<1x8x32xf32> to vector<8x32xf32>
    %cst_74 = arith.constant dense<0.000000e+00> : vector<8x32xf32>
    %127 = tpu.matmul %124, %126, %cst_74 {dimension_numbers = #tpu.dot_dimension_numbers<[1], [0], [0], [1], [0, 0, 1, 1], [], []>} : vector<8x8xf32>, vector<8x32xf32>, vector<8x32xf32> -> vector<8x32xf32>
    %128 = arith.addf %88, %127 : vector<8x32xf32>
    %c3 = arith.constant 3 : index
    %c0_75 = arith.constant 0 : index
    %c0_76 = arith.constant 0 : index
    %129 = vector.load %arg3[%c3, %c0_75, %c0_76] : memref<4x32x8xf32, #tpu.memory_space<vmem>>, vector<1x32x8xf32>
    %130 = vector.shape_cast %129 : vector<1x32x8xf32> to vector<32x8xf32>
    %cst_77 = arith.constant dense<0.000000e+00> : vector<8x8xf32>
    %131 = tpu.matmul %7, %130, %cst_77 {dimension_numbers = #tpu.dot_dimension_numbers<[1], [0], [0], [1], [0, 0, 1, 1], [], []>} : vector<8x32xf32>, vector<32x8xf32>, vector<8x8xf32> -> vector<8x8xf32>
    %c3_78 = arith.constant 3 : index
    %c0_79 = arith.constant 0 : index
    %c0_80 = arith.constant 0 : index
    %132 = vector.load %arg4[%c3_78, %c0_79, %c0_80] : memref<4x1x8xf32, #tpu.memory_space<vmem>>, vector<1x1x8xf32>
    %133 = vector.shape_cast %132 : vector<1x1x8xf32> to vector<1x8xf32>
    %134 = vector.broadcast %133 : vector<1x8xf32> to vector<8x8xf32>
    %135 = arith.addf %131, %134 : vector<8x8xf32>
    %cst_81 = arith.constant 0.353553385 : f32
    %136 = vector.broadcast %cst_81 : f32 to vector<8x8xf32>
    %137 = arith.mulf %135, %136 : vector<8x8xf32>
    %cst_82 = arith.constant 0xFF800000 : f32
    %138 = vector.broadcast %cst_82 : f32 to vector<8x1xf32>
    %cst_83 = arith.constant 0.000000e+00 : f32
    %139 = vector.broadcast %cst_83 : f32 to vector<8x1xf32>
    %cst_84 = arith.constant 0.000000e+00 : f32
    %140 = vector.broadcast %cst_84 : f32 to vector<8x8xf32>
    %c3_85 = arith.constant 3 : index
    %c0_86 = arith.constant 0 : index
    %c0_87 = arith.constant 0 : index
    %141 = vector.load %arg20[%c3_85, %c0_86, %c0_87] : memref<4x8x8xf32, #tpu.memory_space<vmem>>, vector<1x8x8xf32>
    %142 = vector.shape_cast %141 : vector<1x8x8xf32> to vector<8x8xf32>
    %c3_88 = arith.constant 3 : index
    %c0_89 = arith.constant 0 : index
    %c0_90 = arith.constant 0 : index
    %143 = vector.load %arg21[%c3_88, %c0_89, %c0_90] : memref<4x8x8xf32, #tpu.memory_space<vmem>>, vector<1x8x8xf32>
    %144 = vector.shape_cast %143 : vector<1x8x8xf32> to vector<8x8xf32>
    %cst_91 = arith.constant dense<0.000000e+00> : vector<8x8xf32>
    %145 = tpu.matmul %137, %142, %cst_91 {dimension_numbers = #tpu.dot_dimension_numbers<[1], [1], [0], [0], [0, 0, 1, 0], [], []>} : vector<8x8xf32>, vector<8x8xf32>, vector<8x8xf32> -> vector<8x8xf32>
    %cst_92 = arith.constant dense<0xFF800000> : vector<8xf32>
    %146 = vector.multi_reduction <maximumf>, %145, %cst_92 [1] : vector<8x8xf32> to vector<8xf32>
    %147 = vector.shape_cast %146 : vector<8xf32> to vector<8x1xf32>
    %148 = arith.maximumf %138, %147 : vector<8x1xf32>
    %149 = arith.subf %138, %148 : vector<8x1xf32>
    %150 = math.exp %149 : vector<8x1xf32>
    %151 = vector.broadcast %148 : vector<8x1xf32> to vector<8x8xf32>
    %152 = arith.subf %145, %151 : vector<8x8xf32>
    %153 = math.exp %152 : vector<8x8xf32>
    %154 = arith.mulf %150, %139 : vector<8x1xf32>
    %cst_93 = arith.constant dense<0.000000e+00> : vector<8xf32>
    %155 = vector.multi_reduction <add>, %153, %cst_93 [1] : vector<8x8xf32> to vector<8xf32>
    %156 = vector.shape_cast %155 : vector<8xf32> to vector<8x1xf32>
    %157 = arith.addf %154, %156 : vector<8x1xf32>
    %158 = vector.broadcast %150 : vector<8x1xf32> to vector<8x8xf32>
    %159 = arith.mulf %158, %140 : vector<8x8xf32>
    %cst_94 = arith.constant dense<0.000000e+00> : vector<8x8xf32>
    %160 = tpu.matmul %153, %144, %cst_94 {dimension_numbers = #tpu.dot_dimension_numbers<[1], [0], [0], [1], [0, 0, 1, 1], [], []>} : vector<8x8xf32>, vector<8x8xf32>, vector<8x8xf32> -> vector<8x8xf32>
    %161 = arith.addf %159, %160 : vector<8x8xf32>
    %162 = tpu.reciprocal %157 : vector<8x1xf32> -> vector<8x1xf32>
    %163 = vector.broadcast %162 : vector<8x1xf32> to vector<8x8xf32>
    %164 = arith.mulf %161, %163 : vector<8x8xf32>
    %c3_95 = arith.constant 3 : index
    %c0_96 = arith.constant 0 : index
    %c0_97 = arith.constant 0 : index
    %165 = vector.load %arg9[%c3_95, %c0_96, %c0_97] : memref<4x8x32xf32, #tpu.memory_space<vmem>>, vector<1x8x32xf32>
    %166 = vector.shape_cast %165 : vector<1x8x32xf32> to vector<8x32xf32>
    %cst_98 = arith.constant dense<0.000000e+00> : vector<8x32xf32>
    %167 = tpu.matmul %164, %166, %cst_98 {dimension_numbers = #tpu.dot_dimension_numbers<[1], [0], [0], [1], [0, 0, 1, 1], [], []>} : vector<8x8xf32>, vector<8x32xf32>, vector<8x32xf32> -> vector<8x32xf32>
    %168 = arith.addf %128, %167 : vector<8x32xf32>
    %c0_99 = arith.constant 0 : index
    %c0_100 = arith.constant 0 : index
    %169 = vector.load %arg10[%c0_99, %c0_100] : memref<1x32xf32, #tpu.memory_space<vmem>>, vector<1x32xf32>
    %170 = vector.broadcast %169 : vector<1x32xf32> to vector<8x32xf32>
    %171 = arith.addf %168, %170 : vector<8x32xf32>
    %c0_101 = arith.constant 0 : index
    %c0_102 = arith.constant 0 : index
    %172 = vector.load %arg11[%c0_101, %c0_102] : memref<1x32xf32, #tpu.memory_space<vmem>>, vector<1x32xf32>
    %c0_103 = arith.constant 0 : index
    %c0_104 = arith.constant 0 : index
    %173 = vector.load %arg12[%c0_103, %c0_104] : memref<1x32xf32, #tpu.memory_space<vmem>>, vector<1x32xf32>
    %cst_105 = arith.constant dense<0.000000e+00> : vector<8xf32>
    %174 = vector.multi_reduction <add>, %171, %cst_105 [1] : vector<8x32xf32> to vector<8xf32>
    %175 = vector.shape_cast %174 : vector<8xf32> to vector<8x1xf32>
    %cst_106 = arith.constant 3.200000e+01 : f32
    %176 = vector.broadcast %cst_106 : f32 to vector<8x1xf32>
    %177 = arith.divf %175, %176 : vector<8x1xf32>
    %178 = vector.broadcast %177 : vector<8x1xf32> to vector<8x32xf32>
    %179 = arith.subf %171, %178 : vector<8x32xf32>
    %180 = arith.mulf %179, %179 : vector<8x32xf32>
    %cst_107 = arith.constant dense<0.000000e+00> : vector<8xf32>
    %181 = vector.multi_reduction <add>, %180, %cst_107 [1] : vector<8x32xf32> to vector<8xf32>
    %182 = vector.shape_cast %181 : vector<8xf32> to vector<8x1xf32>
    %cst_108 = arith.constant 3.200000e+01 : f32
    %183 = vector.broadcast %cst_108 : f32 to vector<8x1xf32>
    %184 = arith.divf %182, %183 : vector<8x1xf32>
    %185 = vector.broadcast %177 : vector<8x1xf32> to vector<8x32xf32>
    %186 = arith.subf %171, %185 : vector<8x32xf32>
    %cst_109 = arith.constant 9.99999974E-6 : f32
    %187 = vector.broadcast %cst_109 : f32 to vector<8x1xf32>
    %188 = arith.addf %184, %187 : vector<8x1xf32>
    %189 = math.rsqrt %188 : vector<8x1xf32>
    %190 = vector.broadcast %189 : vector<8x1xf32> to vector<8x32xf32>
    %191 = arith.mulf %186, %190 : vector<8x32xf32>
    %192 = vector.broadcast %172 : vector<1x32xf32> to vector<8x32xf32>
    %193 = arith.mulf %191, %192 : vector<8x32xf32>
    %194 = vector.broadcast %173 : vector<1x32xf32> to vector<8x32xf32>
    %195 = arith.addf %193, %194 : vector<8x32xf32>
    %c0_110 = arith.constant 0 : index
    %c0_111 = arith.constant 0 : index
    %196 = vector.load %arg13[%c0_110, %c0_111] : memref<32x64xf32, #tpu.memory_space<vmem>>, vector<32x64xf32>
    %cst_112 = arith.constant dense<0.000000e+00> : vector<8x64xf32>
    %197 = tpu.matmul %195, %196, %cst_112 {dimension_numbers = #tpu.dot_dimension_numbers<[1], [0], [0], [1], [0, 0, 1, 1], [], []>} : vector<8x32xf32>, vector<32x64xf32>, vector<8x64xf32> -> vector<8x64xf32>
    %c0_113 = arith.constant 0 : index
    %c0_114 = arith.constant 0 : index
    %198 = vector.load %arg14[%c0_113, %c0_114] : memref<1x64xf32, #tpu.memory_space<vmem>>, vector<1x64xf32>
    %199 = vector.broadcast %198 : vector<1x64xf32> to vector<8x64xf32>
    %200 = arith.addf %197, %199 : vector<8x64xf32>
    %cst_115 = arith.constant 0.000000e+00 : f32
    %201 = vector.broadcast %cst_115 : f32 to vector<8x64xf32>
    %202 = arith.maximumf %200, %201 : vector<8x64xf32>
    %c0_116 = arith.constant 0 : index
    %c0_117 = arith.constant 0 : index
    %203 = vector.load %arg15[%c0_116, %c0_117] : memref<64x32xf32, #tpu.memory_space<vmem>>, vector<64x32xf32>
    %cst_118 = arith.constant dense<0.000000e+00> : vector<8x32xf32>
    %204 = tpu.matmul %202, %203, %cst_118 {dimension_numbers = #tpu.dot_dimension_numbers<[1], [0], [0], [1], [0, 0, 1, 1], [], []>} : vector<8x64xf32>, vector<64x32xf32>, vector<8x32xf32> -> vector<8x32xf32>
    %c0_119 = arith.constant 0 : index
    %c0_120 = arith.constant 0 : index
    %205 = vector.load %arg16[%c0_119, %c0_120] : memref<1x32xf32, #tpu.memory_space<vmem>>, vector<1x32xf32>
    %206 = vector.broadcast %205 : vector<1x32xf32> to vector<8x32xf32>
    %207 = arith.addf %204, %206 : vector<8x32xf32>
    %208 = arith.addf %207, %195 : vector<8x32xf32>
    %c0_121 = arith.constant 0 : index
    %c0_122 = arith.constant 0 : index
    %209 = vector.load %arg17[%c0_121, %c0_122] : memref<1x32xf32, #tpu.memory_space<vmem>>, vector<1x32xf32>
    %c0_123 = arith.constant 0 : index
    %c0_124 = arith.constant 0 : index
    %210 = vector.load %arg18[%c0_123, %c0_124] : memref<1x32xf32, #tpu.memory_space<vmem>>, vector<1x32xf32>
    %cst_125 = arith.constant dense<0.000000e+00> : vector<8xf32>
    %211 = vector.multi_reduction <add>, %208, %cst_125 [1] : vector<8x32xf32> to vector<8xf32>
    %212 = vector.shape_cast %211 : vector<8xf32> to vector<8x1xf32>
    %cst_126 = arith.constant 3.200000e+01 : f32
    %213 = vector.broadcast %cst_126 : f32 to vector<8x1xf32>
    %214 = arith.divf %212, %213 : vector<8x1xf32>
    %215 = vector.broadcast %214 : vector<8x1xf32> to vector<8x32xf32>
    %216 = arith.subf %208, %215 : vector<8x32xf32>
    %217 = arith.mulf %216, %216 : vector<8x32xf32>
    %cst_127 = arith.constant dense<0.000000e+00> : vector<8xf32>
    %218 = vector.multi_reduction <add>, %217, %cst_127 [1] : vector<8x32xf32> to vector<8xf32>
    %219 = vector.shape_cast %218 : vector<8xf32> to vector<8x1xf32>
    %cst_128 = arith.constant 3.200000e+01 : f32
    %220 = vector.broadcast %cst_128 : f32 to vector<8x1xf32>
    %221 = arith.divf %219, %220 : vector<8x1xf32>
    %222 = vector.broadcast %214 : vector<8x1xf32> to vector<8x32xf32>
    %223 = arith.subf %208, %222 : vector<8x32xf32>
    %cst_129 = arith.constant 9.99999974E-6 : f32
    %224 = vector.broadcast %cst_129 : f32 to vector<8x1xf32>
    %225 = arith.addf %221, %224 : vector<8x1xf32>
    %226 = math.rsqrt %225 : vector<8x1xf32>
    %227 = vector.broadcast %226 : vector<8x1xf32> to vector<8x32xf32>
    %228 = arith.mulf %223, %227 : vector<8x32xf32>
    %229 = vector.broadcast %209 : vector<1x32xf32> to vector<8x32xf32>
    %230 = arith.mulf %228, %229 : vector<8x32xf32>
    %231 = vector.broadcast %210 : vector<1x32xf32> to vector<8x32xf32>
    %232 = arith.addf %230, %231 : vector<8x32xf32>
    %c0_130 = arith.constant 0 : index
    %c0_131 = arith.constant 0 : index
    %c0_132 = arith.constant 0 : index
    %233 = vector.load %arg19[%c0_130, %c0_131, %c0_132] : memref<1x8x32xf32, #tpu.memory_space<vmem>>, vector<1x8x32xf32>
    %234 = vector.shape_cast %233 : vector<1x8x32xf32> to vector<8x32xf32>
    %235 = vector.shape_cast %232 : vector<8x32xf32> to vector<1x8x32xf32>
    tpu.vector_store %arg19[%c0_130, %c0_131, %c0_132], %235 {strides = array<i32>} : memref<1x8x32xf32, #tpu.memory_space<vmem>>, vector<1x8x32xf32>,
    return
  }
  func.func @transform_0(%arg0: i32, %arg1: i32) -> (i32, i32, i32) {
    %c0_i32 = arith.constant 0 : i32
    %c0_i32_0 = arith.constant 0 : i32
    %c0_i32_1 = arith.constant 0 : i32
    return %arg0, %c0_i32, %c0_i32_0 : i32, i32, i32
  }
  func.func @transform_1(%arg0: i32, %arg1: i32) -> (i32, i32, i32) {
    %c0_i32 = arith.constant 0 : i32
    %c0_i32_0 = arith.constant 0 : i32
    %c0_i32_1 = arith.constant 0 : i32
    %c0_i32_2 = arith.constant 0 : i32
    return %c0_i32, %c0_i32_0, %c0_i32_1 : i32, i32, i32
  }
  func.func @transform_2(%arg0: i32, %arg1: i32) -> (i32, i32, i32) {
    %c0_i32 = arith.constant 0 : i32
    %c0_i32_0 = arith.constant 0 : i32
    %c0_i32_1 = arith.constant 0 : i32
    %c0_i32_2 = arith.constant 0 : i32
    return %c0_i32, %c0_i32_0, %c0_i32_1 : i32, i32, i32
  }
  func.func @transform_3(%arg0: i32, %arg1: i32) -> (i32, i32, i32) {
    %c0_i32 = arith.constant 0 : i32
    %c0_i32_0 = arith.constant 0 : i32
    %c0_i32_1 = arith.constant 0 : i32
    %c0_i32_2 = arith.constant 0 : i32
    return %c0_i32, %c0_i32_0, %c0_i32_1 : i32, i32, i32
  }
  func.func @transform_4(%arg0: i32, %arg1: i32) -> (i32, i32, i32) {
    %c0_i32 = arith.constant 0 : i32
    %c0_i32_0 = arith.constant 0 : i32
    %c0_i32_1 = arith.constant 0 : i32
    %c0_i32_2 = arith.constant 0 : i32
    return %c0_i32, %c0_i32_0, %c0_i32_1 : i32, i32, i32
  }
  func.func @transform_5(%arg0: i32, %arg1: i32) -> (i32, i32, i32) {
    %c0_i32 = arith.constant 0 : i32
    %c0_i32_0 = arith.constant 0 : i32
    %c0_i32_1 = arith.constant 0 : i32
    %c0_i32_2 = arith.constant 0 : i32
    return %c0_i32, %c0_i32_0, %c0_i32_1 : i32, i32, i32
  }
  func.func @transform_6(%arg0: i32, %arg1: i32) -> (i32, i32, i32) {
    %c0_i32 = arith.constant 0 : i32
    %c0_i32_0 = arith.constant 0 : i32
    %c0_i32_1 = arith.constant 0 : i32
    %c0_i32_2 = arith.constant 0 : i32
    return %c0_i32, %c0_i32_0, %c0_i32_1 : i32, i32, i32
  }
  func.func @transform_7(%arg0: i32, %arg1: i32) -> (i32, i32, i32) {
    %c0_i32 = arith.constant 0 : i32
    %c0_i32_0 = arith.constant 0 : i32
    %c0_i32_1 = arith.constant 0 : i32
    %c0_i32_2 = arith.constant 0 : i32
    return %c0_i32, %c0_i32_0, %c0_i32_1 : i32, i32, i32
  }
  func.func @transform_8(%arg0: i32, %arg1: i32) -> (i32, i32) {
    %c0_i32 = arith.constant 0 : i32
    %c0_i32_0 = arith.constant 0 : i32
    %c0_i32_1 = arith.constant 0 : i32
    return %c0_i32, %c0_i32_0 : i32, i32
  }
  func.func @transform_9(%arg0: i32, %arg1: i32) -> (i32, i32) {
    %c0_i32 = arith.constant 0 : i32
    %c0_i32_0 = arith.constant 0 : i32
    %c0_i32_1 = arith.constant 0 : i32
    return %c0_i32, %c0_i32_0 : i32, i32
  }
  func.func @transform_10(%arg0: i32, %arg1: i32) -> (i32, i32) {
    %c0_i32 = arith.constant 0 : i32
    %c0_i32_0 = arith.constant 0 : i32
    %c0_i32_1 = arith.constant 0 : i32
    return %c0_i32, %c0_i32_0 : i32, i32
  }
  func.func @transform_11(%arg0: i32, %arg1: i32) -> (i32, i32) {
    %c0_i32 = arith.constant 0 : i32
    %c0_i32_0 = arith.constant 0 : i32
    %c0_i32_1 = arith.constant 0 : i32
    return %c0_i32, %c0_i32_0 : i32, i32
  }
  func.func @transform_12(%arg0: i32, %arg1: i32) -> (i32, i32) {
    %c0_i32 = arith.constant 0 : i32
    %c0_i32_0 = arith.constant 0 : i32
    %c0_i32_1 = arith.constant 0 : i32
    return %c0_i32, %c0_i32_0 : i32, i32
  }
  func.func @transform_13(%arg0: i32, %arg1: i32) -> (i32, i32) {
    %c0_i32 = arith.constant 0 : i32
    %c0_i32_0 = arith.constant 0 : i32
    %c0_i32_1 = arith.constant 0 : i32
    return %c0_i32, %c0_i32_0 : i32, i32
  }
  func.func @transform_14(%arg0: i32, %arg1: i32) -> (i32, i32) {
    %c0_i32 = arith.constant 0 : i32
    %c0_i32_0 = arith.constant 0 : i32
    %c0_i32_1 = arith.constant 0 : i32
    return %c0_i32, %c0_i32_0 : i32, i32
  }
  func.func @transform_15(%arg0: i32, %arg1: i32) -> (i32, i32) {
    %c0_i32 = arith.constant 0 : i32
    %c0_i32_0 = arith.constant 0 : i32
    %c0_i32_1 = arith.constant 0 : i32
    return %c0_i32, %c0_i32_0 : i32, i32
  }
  func.func @transform_16(%arg0: i32, %arg1: i32) -> (i32, i32) {
    %c0_i32 = arith.constant 0 : i32
    %c0_i32_0 = arith.constant 0 : i32
    %c0_i32_1 = arith.constant 0 : i32
    return %c0_i32, %c0_i32_0 : i32, i32
  }
  func.func @transform_17(%arg0: i32, %arg1: i32) -> (i32, i32, i32) {
    %c0_i32 = arith.constant 0 : i32
    %c0_i32_0 = arith.constant 0 : i32
    return %arg0, %arg1, %c0_i32 : i32, i32, i32
  }
}

module attributes {stable_mosaic.version = 11 : i64} {
  func.func @_encoder_layer_kernel(%arg0: i32, %arg1: i32, %arg2: memref<1x8x32xf32, #tpu.memory_space<vmem>>, %arg3: memref<4x32x8xf32, #tpu.memory_space<vmem>>, %arg4: memref<4x1x8xf32, #tpu.memory_space<vmem>>, %arg5: memref<4x32x8xf32, #tpu.memory_space<vmem>>, %arg6: memref<4x1x8xf32, #tpu.memory_space<vmem>>, %arg7: memref<4x32x8xf32, #tpu.memory_space<vmem>>, %arg8: memref<4x1x8xf32, #tpu.memory_space<vmem>>, %arg9: memref<4x8x32xf32, #tpu.memory_space<vmem>>, %arg10: memref<1x32xf32, #tpu.memory_space<vmem>>, %arg11: memref<1x32xf32, #tpu.memory_space<vmem>>, %arg12: memref<1x32xf32, #tpu.memory_space<vmem>>, %arg13: memref<32x64xf32, #tpu.memory_space<vmem>>, %arg14: memref<1x64xf32, #tpu.memory_space<vmem>>, %arg15: memref<64x32xf32, #tpu.memory_space<vmem>>, %arg16: memref<1x32xf32, #tpu.memory_space<vmem>>, %arg17: memref<1x32xf32, #tpu.memory_space<vmem>>, %arg18: memref<1x32xf32, #tpu.memory_space<vmem>>, %arg19: memref<1x8x32xf32, #tpu.memory_space<vmem>>, %arg20: memref<4x8x8xf32, #tpu.memory_space<vmem>>, %arg21: memref<4x8x8xf32, #tpu.memory_space<vmem>>) attributes {dimension_semantics = [#tpu.dimension_semantics<parallel>, #tpu.dimension_semantics<arbitrary>], iteration_bounds = array<i64: 2, 1>, scalar_prefetch = 0 : i64, scratch_operands = 2 : i64, tpu.core_type = #tpu.core_type<tc>, window_params = [{transform_indices = @transform_0, window_bounds = array<i64: 1, 8, 32>}, {pipeline_mode = #tpu.pipeline_mode<synchronous>, transform_indices = @transform_1, window_bounds = array<i64: 4, 32, 8>}, {pipeline_mode = #tpu.pipeline_mode<synchronous>, transform_indices = @transform_2, window_bounds = array<i64: 4, 1, 8>}, {pipeline_mode = #tpu.pipeline_mode<synchronous>, transform_indices = @transform_3, window_bounds = array<i64: 4, 32, 8>}, {pipeline_mode = #tpu.pipeline_mode<synchronous>, transform_indices = @transform_4, window_bounds = array<i64: 4, 1, 8>}, {pipeline_mode = #tpu.pipeline_mode<synchronous>, transform_indices = @transform_5, window_bounds = array<i64: 4, 32, 8>}, {pipeline_mode = #tpu.pipeline_mode<synchronous>, transform_indices = @transform_6, window_bounds = array<i64: 4, 1, 8>}, {pipeline_mode = #tpu.pipeline_mode<synchronous>, transform_indices = @transform_7, window_bounds = array<i64: 4, 8, 32>}, {pipeline_mode = #tpu.pipeline_mode<synchronous>, transform_indices = @transform_8, window_bounds = array<i64: 1, 32>}, {pipeline_mode = #tpu.pipeline_mode<synchronous>, transform_indices = @transform_9, window_bounds = array<i64: 1, 32>}, {pipeline_mode = #tpu.pipeline_mode<synchronous>, transform_indices = @transform_10, window_bounds = array<i64: 1, 32>}, {pipeline_mode = #tpu.pipeline_mode<synchronous>, transform_indices = @transform_11, window_bounds = array<i64: 32, 64>}, {pipeline_mode = #tpu.pipeline_mode<synchronous>, transform_indices = @transform_12, window_bounds = array<i64: 1, 64>}, {pipeline_mode = #tpu.pipeline_mode<synchronous>, transform_indices = @transform_13, window_bounds = array<i64: 64, 32>}, {pipeline_mode = #tpu.pipeline_mode<synchronous>, transform_indices = @transform_14, window_bounds = array<i64: 1, 32>}, {pipeline_mode = #tpu.pipeline_mode<synchronous>, transform_indices = @transform_15, window_bounds = array<i64: 1, 32>}, {pipeline_mode = #tpu.pipeline_mode<synchronous>, transform_indices = @transform_16, window_bounds = array<i64: 1, 32>}, {transform_indices = @transform_17, window_bounds = array<i64: 1, 8, 32>}]} {
    %c0_i32 = arith.constant 0 : i32
    %0 = arith.cmpi eq, %arg1, %c0_i32 : i32
    %1 = arith.extui %0 : i1 to i32
    %c0_i32_0 = arith.constant 0 : i32
    %2 = arith.cmpi ne, %1, %c0_i32_0 : i32
    scf.if %2 {
      %c0_133 = arith.constant 0 : index
      %c0_134 = arith.constant 0 : index
      %c0_135 = arith.constant 0 : index
      %236 = vector.load %arg2[%c0_133, %c0_134, %c0_135] : memref<1x8x32xf32, #tpu.memory_space<vmem>>, vector<1x8x32xf32>
      %237 = vector.shape_cast %236 : vector<1x8x32xf32> to vector<8x32xf32>
      %c0_136 = arith.constant 0 : index
      %c0_137 = arith.constant 0 : index
      %c0_138 = arith.constant 0 : index
      %238 = vector.load %arg5[%c0_136, %c0_137, %c0_138] : memref<4x32x8xf32, #tpu.memory_space<vmem>>, vector<1x32x8xf32>
      %239 = vector.shape_cast %238 : vector<1x32x8xf32> to vector<32x8xf32>
      %cst_139 = arith.constant dense<0.000000e+00> : vector<8x8xf32>
      %240 = tpu.matmul %237, %239, %cst_139 {dimension_numbers = #tpu.dot_dimension_numbers<[1], [0], [0], [1], [0, 0, 1, 1], [], []>} : vector<8x32xf32>, vector<32x8xf32>, vector<8x8xf32> -> vector<8x8xf32>
      %c0_140 = arith.constant 0 : index
      %c0_141 = arith.constant 0 : index
      %c0_142 = arith.constant 0 : index
      %241 = vector.load %arg6[%c0_140, %c0_141, %c0_142] : memref<4x1x8xf32, #tpu.memory_space<vmem>>, vector<1x1x8xf32>
      %242 = vector.shape_cast %241 : vector<1x1x8xf32> to vector<1x8xf32>
      %243 = vector.broadcast %242 : vector<1x8xf32> to vector<8x8xf32>
      %244 = arith.addf %240, %243 : vector<8x8xf32>
      %c0_143 = arith.constant 0 : index
      %c0_144 = arith.constant 0 : index
      %c0_145 = arith.constant 0 : index
      %245 = vector.load %arg7[%c0_143, %c0_144, %c0_145] : memref<4x32x8xf32, #tpu.memory_space<vmem>>, vector<1x32x8xf32>
      %246 = vector.shape_cast %245 : vector<1x32x8xf32> to vector<32x8xf32>
      %cst_146 = arith.constant dense<0.000000e+00> : vector<8x8xf32>
      %247 = tpu.matmul %237, %246, %cst_146 {dimension_numbers = #tpu.dot_dimension_numbers<[1], [0], [0], [1], [0, 0, 1, 1], [], []>} : vector<8x32xf32>, vector<32x8xf32>, vector<8x8xf32> -> vector<8x8xf32>
      %c0_147 = arith.constant 0 : index
      %c0_148 = arith.constant 0 : index
      %c0_149 = arith.constant 0 : index
      %248 = vector.load %arg8[%c0_147, %c0_148, %c0_149] : memref<4x1x8xf32, #tpu.memory_space<vmem>>, vector<1x1x8xf32>
      %249 = vector.shape_cast %248 : vector<1x1x8xf32> to vector<1x8xf32>
      %250 = vector.broadcast %249 : vector<1x8xf32> to vector<8x8xf32>
      %251 = arith.addf %247, %250 : vector<8x8xf32>
      %c0_150 = arith.constant 0 : index
      %c0_151 = arith.constant 0 : index
      %c0_152 = arith.constant 0 : index
      %252 = vector.load %arg20[%c0_150, %c0_151, %c0_152] : memref<4x8x8xf32, #tpu.memory_space<vmem>>, vector<1x8x8xf32>
      %253 = vector.shape_cast %252 : vector<1x8x8xf32> to vector<8x8xf32>
      %254 = vector.shape_cast %244 : vector<8x8xf32> to vector<1x8x8xf32>
      tpu.vector_store %arg20[%c0_150, %c0_151, %c0_152], %254 {strides = array<i32>} : memref<4x8x8xf32, #tpu.memory_space<vmem>>, vector<1x8x8xf32>,
      %c0_153 = arith.constant 0 : index
      %c0_154 = arith.constant 0 : index
      %c0_155 = arith.constant 0 : index
      %255 = vector.load %arg21[%c0_153, %c0_154, %c0_155] : memref<4x8x8xf32, #tpu.memory_space<vmem>>, vector<1x8x8xf32>
      %256 = vector.shape_cast %255 : vector<1x8x8xf32> to vector<8x8xf32>
      %257 = vector.shape_cast %251 : vector<8x8xf32> to vector<1x8x8xf32>
      tpu.vector_store %arg21[%c0_153, %c0_154, %c0_155], %257 {strides = array<i32>} : memref<4x8x8xf32, #tpu.memory_space<vmem>>, vector<1x8x8xf32>,
      %c1_156 = arith.constant 1 : index
      %c0_157 = arith.constant 0 : index
      %c0_158 = arith.constant 0 : index
      %258 = vector.load %arg5[%c1_156, %c0_157, %c0_158] : memref<4x32x8xf32, #tpu.memory_space<vmem>>, vector<1x32x8xf32>
      %259 = vector.shape_cast %258 : vector<1x32x8xf32> to vector<32x8xf32>
      %cst_159 = arith.constant dense<0.000000e+00> : vector<8x8xf32>
      %260 = tpu.matmul %237, %259, %cst_159 {dimension_numbers = #tpu.dot_dimension_numbers<[1], [0], [0], [1], [0, 0, 1, 1], [], []>} : vector<8x32xf32>, vector<32x8xf32>, vector<8x8xf32> -> vector<8x8xf32>
      %c1_160 = arith.constant 1 : index
      %c0_161 = arith.constant 0 : index
      %c0_162 = arith.constant 0 : index
      %261 = vector.load %arg6[%c1_160, %c0_161, %c0_162] : memref<4x1x8xf32, #tpu.memory_space<vmem>>, vector<1x1x8xf32>
      %262 = vector.shape_cast %261 : vector<1x1x8xf32> to vector<1x8xf32>
      %263 = vector.broadcast %262 : vector<1x8xf32> to vector<8x8xf32>
      %264 = arith.addf %260, %263 : vector<8x8xf32>
      %c1_163 = arith.constant 1 : index
      %c0_164 = arith.constant 0 : index
      %c0_165 = arith.constant 0 : index
      %265 = vector.load %arg7[%c1_163, %c0_164, %c0_165] : memref<4x32x8xf32, #tpu.memory_space<vmem>>, vector<1x32x8xf32>
      %266 = vector.shape_cast %265 : vector<1x32x8xf32> to vector<32x8xf32>
      %cst_166 = arith.constant dense<0.000000e+00> : vector<8x8xf32>
      %267 = tpu.matmul %237, %266, %cst_166 {dimension_numbers = #tpu.dot_dimension_numbers<[1], [0], [0], [1], [0, 0, 1, 1], [], []>} : vector<8x32xf32>, vector<32x8xf32>, vector<8x8xf32> -> vector<8x8xf32>
      %c1_167 = arith.constant 1 : index
      %c0_168 = arith.constant 0 : index
      %c0_169 = arith.constant 0 : index
      %268 = vector.load %arg8[%c1_167, %c0_168, %c0_169] : memref<4x1x8xf32, #tpu.memory_space<vmem>>, vector<1x1x8xf32>
      %269 = vector.shape_cast %268 : vector<1x1x8xf32> to vector<1x8xf32>
      %270 = vector.broadcast %269 : vector<1x8xf32> to vector<8x8xf32>
      %271 = arith.addf %267, %270 : vector<8x8xf32>
      %c1_170 = arith.constant 1 : index
      %c0_171 = arith.constant 0 : index
      %c0_172 = arith.constant 0 : index
      %272 = vector.load %arg20[%c1_170, %c0_171, %c0_172] : memref<4x8x8xf32, #tpu.memory_space<vmem>>, vector<1x8x8xf32>
      %273 = vector.shape_cast %272 : vector<1x8x8xf32> to vector<8x8xf32>
      %274 = vector.shape_cast %264 : vector<8x8xf32> to vector<1x8x8xf32>
      tpu.vector_store %arg20[%c1_170, %c0_171, %c0_172], %274 {strides = array<i32>} : memref<4x8x8xf32, #tpu.memory_space<vmem>>, vector<1x8x8xf32>,
      %c1_173 = arith.constant 1 : index
      %c0_174 = arith.constant 0 : index
      %c0_175 = arith.constant 0 : index
      %275 = vector.load %arg21[%c1_173, %c0_174, %c0_175] : memref<4x8x8xf32, #tpu.memory_space<vmem>>, vector<1x8x8xf32>
      %276 = vector.shape_cast %275 : vector<1x8x8xf32> to vector<8x8xf32>
      %277 = vector.shape_cast %271 : vector<8x8xf32> to vector<1x8x8xf32>
      tpu.vector_store %arg21[%c1_173, %c0_174, %c0_175], %277 {strides = array<i32>} : memref<4x8x8xf32, #tpu.memory_space<vmem>>, vector<1x8x8xf32>,
      %c2_176 = arith.constant 2 : index
      %c0_177 = arith.constant 0 : index
      %c0_178 = arith.constant 0 : index
      %278 = vector.load %arg5[%c2_176, %c0_177, %c0_178] : memref<4x32x8xf32, #tpu.memory_space<vmem>>, vector<1x32x8xf32>
      %279 = vector.shape_cast %278 : vector<1x32x8xf32> to vector<32x8xf32>
      %cst_179 = arith.constant dense<0.000000e+00> : vector<8x8xf32>
      %280 = tpu.matmul %237, %279, %cst_179 {dimension_numbers = #tpu.dot_dimension_numbers<[1], [0], [0], [1], [0, 0, 1, 1], [], []>} : vector<8x32xf32>, vector<32x8xf32>, vector<8x8xf32> -> vector<8x8xf32>
      %c2_180 = arith.constant 2 : index
      %c0_181 = arith.constant 0 : index
      %c0_182 = arith.constant 0 : index
      %281 = vector.load %arg6[%c2_180, %c0_181, %c0_182] : memref<4x1x8xf32, #tpu.memory_space<vmem>>, vector<1x1x8xf32>
      %282 = vector.shape_cast %281 : vector<1x1x8xf32> to vector<1x8xf32>
      %283 = vector.broadcast %282 : vector<1x8xf32> to vector<8x8xf32>
      %284 = arith.addf %280, %283 : vector<8x8xf32>
      %c2_183 = arith.constant 2 : index
      %c0_184 = arith.constant 0 : index
      %c0_185 = arith.constant 0 : index
      %285 = vector.load %arg7[%c2_183, %c0_184, %c0_185] : memref<4x32x8xf32, #tpu.memory_space<vmem>>, vector<1x32x8xf32>
      %286 = vector.shape_cast %285 : vector<1x32x8xf32> to vector<32x8xf32>
      %cst_186 = arith.constant dense<0.000000e+00> : vector<8x8xf32>
      %287 = tpu.matmul %237, %286, %cst_186 {dimension_numbers = #tpu.dot_dimension_numbers<[1], [0], [0], [1], [0, 0, 1, 1], [], []>} : vector<8x32xf32>, vector<32x8xf32>, vector<8x8xf32> -> vector<8x8xf32>
      %c2_187 = arith.constant 2 : index
      %c0_188 = arith.constant 0 : index
      %c0_189 = arith.constant 0 : index
      %288 = vector.load %arg8[%c2_187, %c0_188, %c0_189] : memref<4x1x8xf32, #tpu.memory_space<vmem>>, vector<1x1x8xf32>
      %289 = vector.shape_cast %288 : vector<1x1x8xf32> to vector<1x8xf32>
      %290 = vector.broadcast %289 : vector<1x8xf32> to vector<8x8xf32>
      %291 = arith.addf %287, %290 : vector<8x8xf32>
      %c2_190 = arith.constant 2 : index
      %c0_191 = arith.constant 0 : index
      %c0_192 = arith.constant 0 : index
      %292 = vector.load %arg20[%c2_190, %c0_191, %c0_192] : memref<4x8x8xf32, #tpu.memory_space<vmem>>, vector<1x8x8xf32>
      %293 = vector.shape_cast %292 : vector<1x8x8xf32> to vector<8x8xf32>
      %294 = vector.shape_cast %284 : vector<8x8xf32> to vector<1x8x8xf32>
      tpu.vector_store %arg20[%c2_190, %c0_191, %c0_192], %294 {strides = array<i32>} : memref<4x8x8xf32, #tpu.memory_space<vmem>>, vector<1x8x8xf32>,
      %c2_193 = arith.constant 2 : index
      %c0_194 = arith.constant 0 : index
      %c0_195 = arith.constant 0 : index
      %295 = vector.load %arg21[%c2_193, %c0_194, %c0_195] : memref<4x8x8xf32, #tpu.memory_space<vmem>>, vector<1x8x8xf32>
      %296 = vector.shape_cast %295 : vector<1x8x8xf32> to vector<8x8xf32>
      %297 = vector.shape_cast %291 : vector<8x8xf32> to vector<1x8x8xf32>
      tpu.vector_store %arg21[%c2_193, %c0_194, %c0_195], %297 {strides = array<i32>} : memref<4x8x8xf32, #tpu.memory_space<vmem>>, vector<1x8x8xf32>,
      %c3_196 = arith.constant 3 : index
      %c0_197 = arith.constant 0 : index
      %c0_198 = arith.constant 0 : index
      %298 = vector.load %arg5[%c3_196, %c0_197, %c0_198] : memref<4x32x8xf32, #tpu.memory_space<vmem>>, vector<1x32x8xf32>
      %299 = vector.shape_cast %298 : vector<1x32x8xf32> to vector<32x8xf32>
      %cst_199 = arith.constant dense<0.000000e+00> : vector<8x8xf32>
      %300 = tpu.matmul %237, %299, %cst_199 {dimension_numbers = #tpu.dot_dimension_numbers<[1], [0], [0], [1], [0, 0, 1, 1], [], []>} : vector<8x32xf32>, vector<32x8xf32>, vector<8x8xf32> -> vector<8x8xf32>
      %c3_200 = arith.constant 3 : index
      %c0_201 = arith.constant 0 : index
      %c0_202 = arith.constant 0 : index
      %301 = vector.load %arg6[%c3_200, %c0_201, %c0_202] : memref<4x1x8xf32, #tpu.memory_space<vmem>>, vector<1x1x8xf32>
      %302 = vector.shape_cast %301 : vector<1x1x8xf32> to vector<1x8xf32>
      %303 = vector.broadcast %302 : vector<1x8xf32> to vector<8x8xf32>
      %304 = arith.addf %300, %303 : vector<8x8xf32>
      %c3_203 = arith.constant 3 : index
      %c0_204 = arith.constant 0 : index
      %c0_205 = arith.constant 0 : index
      %305 = vector.load %arg7[%c3_203, %c0_204, %c0_205] : memref<4x32x8xf32, #tpu.memory_space<vmem>>, vector<1x32x8xf32>
      %306 = vector.shape_cast %305 : vector<1x32x8xf32> to vector<32x8xf32>
      %cst_206 = arith.constant dense<0.000000e+00> : vector<8x8xf32>
      %307 = tpu.matmul %237, %306, %cst_206 {dimension_numbers = #tpu.dot_dimension_numbers<[1], [0], [0], [1], [0, 0, 1, 1], [], []>} : vector<8x32xf32>, vector<32x8xf32>, vector<8x8xf32> -> vector<8x8xf32>
      %c3_207 = arith.constant 3 : index
      %c0_208 = arith.constant 0 : index
      %c0_209 = arith.constant 0 : index
      %308 = vector.load %arg8[%c3_207, %c0_208, %c0_209] : memref<4x1x8xf32, #tpu.memory_space<vmem>>, vector<1x1x8xf32>
      %309 = vector.shape_cast %308 : vector<1x1x8xf32> to vector<1x8xf32>
      %310 = vector.broadcast %309 : vector<1x8xf32> to vector<8x8xf32>
      %311 = arith.addf %307, %310 : vector<8x8xf32>
      %c3_210 = arith.constant 3 : index
      %c0_211 = arith.constant 0 : index
      %c0_212 = arith.constant 0 : index
      %312 = vector.load %arg20[%c3_210, %c0_211, %c0_212] : memref<4x8x8xf32, #tpu.memory_space<vmem>>, vector<1x8x8xf32>
      %313 = vector.shape_cast %312 : vector<1x8x8xf32> to vector<8x8xf32>
      %314 = vector.shape_cast %304 : vector<8x8xf32> to vector<1x8x8xf32>
      tpu.vector_store %arg20[%c3_210, %c0_211, %c0_212], %314 {strides = array<i32>} : memref<4x8x8xf32, #tpu.memory_space<vmem>>, vector<1x8x8xf32>,
      %c3_213 = arith.constant 3 : index
      %c0_214 = arith.constant 0 : index
      %c0_215 = arith.constant 0 : index
      %315 = vector.load %arg21[%c3_213, %c0_214, %c0_215] : memref<4x8x8xf32, #tpu.memory_space<vmem>>, vector<1x8x8xf32>
      %316 = vector.shape_cast %315 : vector<1x8x8xf32> to vector<8x8xf32>
      %317 = vector.shape_cast %311 : vector<8x8xf32> to vector<1x8x8xf32>
      tpu.vector_store %arg21[%c3_213, %c0_214, %c0_215], %317 {strides = array<i32>} : memref<4x8x8xf32, #tpu.memory_space<vmem>>, vector<1x8x8xf32>,
    } else {
    }
    %c8_i32 = arith.constant 8 : i32
    %3 = arith.muli %arg1, %c8_i32 : i32
    %4 = tpu.assume_multiple %3, 8 : i32
    %c0 = arith.constant 0 : index
    %5 = arith.index_cast %4 : i32 to index
    %c0_1 = arith.constant 0 : index
    %6 = vector.load %arg2[%c0, %5, %c0_1] : memref<1x8x32xf32, #tpu.memory_space<vmem>>, vector<1x8x32xf32>
    %7 = vector.shape_cast %6 : vector<1x8x32xf32> to vector<8x32xf32>
    %cst = arith.constant 0.000000e+00 : f32
    %8 = vector.broadcast %cst : f32 to vector<8x32xf32>
    %c0_2 = arith.constant 0 : index
    %c0_3 = arith.constant 0 : index
    %c0_4 = arith.constant 0 : index
    %9 = vector.load %arg3[%c0_2, %c0_3, %c0_4] : memref<4x32x8xf32, #tpu.memory_space<vmem>>, vector<1x32x8xf32>
    %10 = vector.shape_cast %9 : vector<1x32x8xf32> to vector<32x8xf32>
    %cst_5 = arith.constant dense<0.000000e+00> : vector<8x8xf32>
    %11 = tpu.matmul %7, %10, %cst_5 {dimension_numbers = #tpu.dot_dimension_numbers<[1], [0], [0], [1], [0, 0, 1, 1], [], []>} : vector<8x32xf32>, vector<32x8xf32>, vector<8x8xf32> -> vector<8x8xf32>
    %c0_6 = arith.constant 0 : index
    %c0_7 = arith.constant 0 : index
    %c0_8 = arith.constant 0 : index
    %12 = vector.load %arg4[%c0_6, %c0_7, %c0_8] : memref<4x1x8xf32, #tpu.memory_space<vmem>>, vector<1x1x8xf32>
    %13 = vector.shape_cast %12 : vector<1x1x8xf32> to vector<1x8xf32>
    %14 = vector.broadcast %13 : vector<1x8xf32> to vector<8x8xf32>
    %15 = arith.addf %11, %14 : vector<8x8xf32>
    %cst_9 = arith.constant 0.353553385 : f32
    %16 = vector.broadcast %cst_9 : f32 to vector<8x8xf32>
    %17 = arith.mulf %15, %16 : vector<8x8xf32>
    %cst_10 = arith.constant 0xFF800000 : f32
    %18 = vector.broadcast %cst_10 : f32 to vector<8x1xf32>
    %cst_11 = arith.constant 0.000000e+00 : f32
    %19 = vector.broadcast %cst_11 : f32 to vector<8x1xf32>
    %cst_12 = arith.constant 0.000000e+00 : f32
    %20 = vector.broadcast %cst_12 : f32 to vector<8x8xf32>
    %c0_13 = arith.constant 0 : index
    %c0_14 = arith.constant 0 : index
    %c0_15 = arith.constant 0 : index
    %21 = vector.load %arg20[%c0_13, %c0_14, %c0_15] : memref<4x8x8xf32, #tpu.memory_space<vmem>>, vector<1x8x8xf32>
    %22 = vector.shape_cast %21 : vector<1x8x8xf32> to vector<8x8xf32>
    %c0_16 = arith.constant 0 : index
    %c0_17 = arith.constant 0 : index
    %c0_18 = arith.constant 0 : index
    %23 = vector.load %arg21[%c0_16, %c0_17, %c0_18] : memref<4x8x8xf32, #tpu.memory_space<vmem>>, vector<1x8x8xf32>
    %24 = vector.shape_cast %23 : vector<1x8x8xf32> to vector<8x8xf32>
    %cst_19 = arith.constant dense<0.000000e+00> : vector<8x8xf32>
    %25 = tpu.matmul %17, %22, %cst_19 {dimension_numbers = #tpu.dot_dimension_numbers<[1], [1], [0], [0], [0, 0, 1, 0], [], []>} : vector<8x8xf32>, vector<8x8xf32>, vector<8x8xf32> -> vector<8x8xf32>
    %cst_20 = arith.constant dense<0xFF800000> : vector<8xf32>
    %26 = vector.multi_reduction <maximumf>, %25, %cst_20 [1] : vector<8x8xf32> to vector<8xf32>
    %27 = vector.shape_cast %26 : vector<8xf32> to vector<8x1xf32>
    %28 = arith.maximumf %18, %27 : vector<8x1xf32>
    %29 = arith.subf %18, %28 : vector<8x1xf32>
    %30 = math.exp %29 : vector<8x1xf32>
    %31 = vector.broadcast %28 : vector<8x1xf32> to vector<8x8xf32>
    %32 = arith.subf %25, %31 : vector<8x8xf32>
    %33 = math.exp %32 : vector<8x8xf32>
    %34 = arith.mulf %30, %19 : vector<8x1xf32>
    %cst_21 = arith.constant dense<0.000000e+00> : vector<8xf32>
    %35 = vector.multi_reduction <add>, %33, %cst_21 [1] : vector<8x8xf32> to vector<8xf32>
    %36 = vector.shape_cast %35 : vector<8xf32> to vector<8x1xf32>
    %37 = arith.addf %34, %36 : vector<8x1xf32>
    %38 = vector.broadcast %30 : vector<8x1xf32> to vector<8x8xf32>
    %39 = arith.mulf %38, %20 : vector<8x8xf32>
    %cst_22 = arith.constant dense<0.000000e+00> : vector<8x8xf32>
    %40 = tpu.matmul %33, %24, %cst_22 {dimension_numbers = #tpu.dot_dimension_numbers<[1], [0], [0], [1], [0, 0, 1, 1], [], []>} : vector<8x8xf32>, vector<8x8xf32>, vector<8x8xf32> -> vector<8x8xf32>
    %41 = arith.addf %39, %40 : vector<8x8xf32>
    %42 = tpu.reciprocal %37 : vector<8x1xf32> -> vector<8x1xf32>
    %43 = vector.broadcast %42 : vector<8x1xf32> to vector<8x8xf32>
    %44 = arith.mulf %41, %43 : vector<8x8xf32>
    %c0_23 = arith.constant 0 : index
    %c0_24 = arith.constant 0 : index
    %c0_25 = arith.constant 0 : index
    %45 = vector.load %arg9[%c0_23, %c0_24, %c0_25] : memref<4x8x32xf32, #tpu.memory_space<vmem>>, vector<1x8x32xf32>
    %46 = vector.shape_cast %45 : vector<1x8x32xf32> to vector<8x32xf32>
    %cst_26 = arith.constant dense<0.000000e+00> : vector<8x32xf32>
    %47 = tpu.matmul %44, %46, %cst_26 {dimension_numbers = #tpu.dot_dimension_numbers<[1], [0], [0], [1], [0, 0, 1, 1], [], []>} : vector<8x8xf32>, vector<8x32xf32>, vector<8x32xf32> -> vector<8x32xf32>
    %48 = arith.addf %8, %47 : vector<8x32xf32>
    %c1 = arith.constant 1 : index
    %c0_27 = arith.constant 0 : index
    %c0_28 = arith.constant 0 : index
    %49 = vector.load %arg3[%c1, %c0_27, %c0_28] : memref<4x32x8xf32, #tpu.memory_space<vmem>>, vector<1x32x8xf32>
    %50 = vector.shape_cast %49 : vector<1x32x8xf32> to vector<32x8xf32>
    %cst_29 = arith.constant dense<0.000000e+00> : vector<8x8xf32>
    %51 = tpu.matmul %7, %50, %cst_29 {dimension_numbers = #tpu.dot_dimension_numbers<[1], [0], [0], [1], [0, 0, 1, 1], [], []>} : vector<8x32xf32>, vector<32x8xf32>, vector<8x8xf32> -> vector<8x8xf32>
    %c1_30 = arith.constant 1 : index
    %c0_31 = arith.constant 0 : index
    %c0_32 = arith.constant 0 : index
    %52 = vector.load %arg4[%c1_30, %c0_31, %c0_32] : memref<4x1x8xf32, #tpu.memory_space<vmem>>, vector<1x1x8xf32>
    %53 = vector.shape_cast %52 : vector<1x1x8xf32> to vector<1x8xf32>
    %54 = vector.broadcast %53 : vector<1x8xf32> to vector<8x8xf32>
    %55 = arith.addf %51, %54 : vector<8x8xf32>
    %cst_33 = arith.constant 0.353553385 : f32
    %56 = vector.broadcast %cst_33 : f32 to vector<8x8xf32>
    %57 = arith.mulf %55, %56 : vector<8x8xf32>
    %cst_34 = arith.constant 0xFF800000 : f32
    %58 = vector.broadcast %cst_34 : f32 to vector<8x1xf32>
    %cst_35 = arith.constant 0.000000e+00 : f32
    %59 = vector.broadcast %cst_35 : f32 to vector<8x1xf32>
    %cst_36 = arith.constant 0.000000e+00 : f32
    %60 = vector.broadcast %cst_36 : f32 to vector<8x8xf32>
    %c1_37 = arith.constant 1 : index
    %c0_38 = arith.constant 0 : index
    %c0_39 = arith.constant 0 : index
    %61 = vector.load %arg20[%c1_37, %c0_38, %c0_39] : memref<4x8x8xf32, #tpu.memory_space<vmem>>, vector<1x8x8xf32>
    %62 = vector.shape_cast %61 : vector<1x8x8xf32> to vector<8x8xf32>
    %c1_40 = arith.constant 1 : index
    %c0_41 = arith.constant 0 : index
    %c0_42 = arith.constant 0 : index
    %63 = vector.load %arg21[%c1_40, %c0_41, %c0_42] : memref<4x8x8xf32, #tpu.memory_space<vmem>>, vector<1x8x8xf32>
    %64 = vector.shape_cast %63 : vector<1x8x8xf32> to vector<8x8xf32>
    %cst_43 = arith.constant dense<0.000000e+00> : vector<8x8xf32>
    %65 = tpu.matmul %57, %62, %cst_43 {dimension_numbers = #tpu.dot_dimension_numbers<[1], [1], [0], [0], [0, 0, 1, 0], [], []>} : vector<8x8xf32>, vector<8x8xf32>, vector<8x8xf32> -> vector<8x8xf32>
    %cst_44 = arith.constant dense<0xFF800000> : vector<8xf32>
    %66 = vector.multi_reduction <maximumf>, %65, %cst_44 [1] : vector<8x8xf32> to vector<8xf32>
    %67 = vector.shape_cast %66 : vector<8xf32> to vector<8x1xf32>
    %68 = arith.maximumf %58, %67 : vector<8x1xf32>
    %69 = arith.subf %58, %68 : vector<8x1xf32>
    %70 = math.exp %69 : vector<8x1xf32>
    %71 = vector.broadcast %68 : vector<8x1xf32> to vector<8x8xf32>
    %72 = arith.subf %65, %71 : vector<8x8xf32>
    %73 = math.exp %72 : vector<8x8xf32>
    %74 = arith.mulf %70, %59 : vector<8x1xf32>
    %cst_45 = arith.constant dense<0.000000e+00> : vector<8xf32>
    %75 = vector.multi_reduction <add>, %73, %cst_45 [1] : vector<8x8xf32> to vector<8xf32>
    %76 = vector.shape_cast %75 : vector<8xf32> to vector<8x1xf32>
    %77 = arith.addf %74, %76 : vector<8x1xf32>
    %78 = vector.broadcast %70 : vector<8x1xf32> to vector<8x8xf32>
    %79 = arith.mulf %78, %60 : vector<8x8xf32>
    %cst_46 = arith.constant dense<0.000000e+00> : vector<8x8xf32>
    %80 = tpu.matmul %73, %64, %cst_46 {dimension_numbers = #tpu.dot_dimension_numbers<[1], [0], [0], [1], [0, 0, 1, 1], [], []>} : vector<8x8xf32>, vector<8x8xf32>, vector<8x8xf32> -> vector<8x8xf32>
    %81 = arith.addf %79, %80 : vector<8x8xf32>
    %82 = tpu.reciprocal %77 : vector<8x1xf32> -> vector<8x1xf32>
    %83 = vector.broadcast %82 : vector<8x1xf32> to vector<8x8xf32>
    %84 = arith.mulf %81, %83 : vector<8x8xf32>
    %c1_47 = arith.constant 1 : index
    %c0_48 = arith.constant 0 : index
    %c0_49 = arith.constant 0 : index
    %85 = vector.load %arg9[%c1_47, %c0_48, %c0_49] : memref<4x8x32xf32, #tpu.memory_space<vmem>>, vector<1x8x32xf32>
    %86 = vector.shape_cast %85 : vector<1x8x32xf32> to vector<8x32xf32>
    %cst_50 = arith.constant dense<0.000000e+00> : vector<8x32xf32>
    %87 = tpu.matmul %84, %86, %cst_50 {dimension_numbers = #tpu.dot_dimension_numbers<[1], [0], [0], [1], [0, 0, 1, 1], [], []>} : vector<8x8xf32>, vector<8x32xf32>, vector<8x32xf32> -> vector<8x32xf32>
    %88 = arith.addf %48, %87 : vector<8x32xf32>
    %c2 = arith.constant 2 : index
    %c0_51 = arith.constant 0 : index
    %c0_52 = arith.constant 0 : index
    %89 = vector.load %arg3[%c2, %c0_51, %c0_52] : memref<4x32x8xf32, #tpu.memory_space<vmem>>, vector<1x32x8xf32>
    %90 = vector.shape_cast %89 : vector<1x32x8xf32> to vector<32x8xf32>
    %cst_53 = arith.constant dense<0.000000e+00> : vector<8x8xf32>
    %91 = tpu.matmul %7, %90, %cst_53 {dimension_numbers = #tpu.dot_dimension_numbers<[1], [0], [0], [1], [0, 0, 1, 1], [], []>} : vector<8x32xf32>, vector<32x8xf32>, vector<8x8xf32> -> vector<8x8xf32>
    %c2_54 = arith.constant 2 : index
    %c0_55 = arith.constant 0 : index
    %c0_56 = arith.constant 0 : index
    %92 = vector.load %arg4[%c2_54, %c0_55, %c0_56] : memref<4x1x8xf32, #tpu.memory_space<vmem>>, vector<1x1x8xf32>
    %93 = vector.shape_cast %92 : vector<1x1x8xf32> to vector<1x8xf32>
    %94 = vector.broadcast %93 : vector<1x8xf32> to vector<8x8xf32>
    %95 = arith.addf %91, %94 : vector<8x8xf32>
    %cst_57 = arith.constant 0.353553385 : f32
    %96 = vector.broadcast %cst_57 : f32 to vector<8x8xf32>
    %97 = arith.mulf %95, %96 : vector<8x8xf32>
    %cst_58 = arith.constant 0xFF800000 : f32
    %98 = vector.broadcast %cst_58 : f32 to vector<8x1xf32>
    %cst_59 = arith.constant 0.000000e+00 : f32
    %99 = vector.broadcast %cst_59 : f32 to vector<8x1xf32>
    %cst_60 = arith.constant 0.000000e+00 : f32
    %100 = vector.broadcast %cst_60 : f32 to vector<8x8xf32>
    %c2_61 = arith.constant 2 : index
    %c0_62 = arith.constant 0 : index
    %c0_63 = arith.constant 0 : index
    %101 = vector.load %arg20[%c2_61, %c0_62, %c0_63] : memref<4x8x8xf32, #tpu.memory_space<vmem>>, vector<1x8x8xf32>
    %102 = vector.shape_cast %101 : vector<1x8x8xf32> to vector<8x8xf32>
    %c2_64 = arith.constant 2 : index
    %c0_65 = arith.constant 0 : index
    %c0_66 = arith.constant 0 : index
    %103 = vector.load %arg21[%c2_64, %c0_65, %c0_66] : memref<4x8x8xf32, #tpu.memory_space<vmem>>, vector<1x8x8xf32>
    %104 = vector.shape_cast %103 : vector<1x8x8xf32> to vector<8x8xf32>
    %cst_67 = arith.constant dense<0.000000e+00> : vector<8x8xf32>
    %105 = tpu.matmul %97, %102, %cst_67 {dimension_numbers = #tpu.dot_dimension_numbers<[1], [1], [0], [0], [0, 0, 1, 0], [], []>} : vector<8x8xf32>, vector<8x8xf32>, vector<8x8xf32> -> vector<8x8xf32>
    %cst_68 = arith.constant dense<0xFF800000> : vector<8xf32>
    %106 = vector.multi_reduction <maximumf>, %105, %cst_68 [1] : vector<8x8xf32> to vector<8xf32>
    %107 = vector.shape_cast %106 : vector<8xf32> to vector<8x1xf32>
    %108 = arith.maximumf %98, %107 : vector<8x1xf32>
    %109 = arith.subf %98, %108 : vector<8x1xf32>
    %110 = math.exp %109 : vector<8x1xf32>
    %111 = vector.broadcast %108 : vector<8x1xf32> to vector<8x8xf32>
    %112 = arith.subf %105, %111 : vector<8x8xf32>
    %113 = math.exp %112 : vector<8x8xf32>
    %114 = arith.mulf %110, %99 : vector<8x1xf32>
    %cst_69 = arith.constant dense<0.000000e+00> : vector<8xf32>
    %115 = vector.multi_reduction <add>, %113, %cst_69 [1] : vector<8x8xf32> to vector<8xf32>
    %116 = vector.shape_cast %115 : vector<8xf32> to vector<8x1xf32>
    %117 = arith.addf %114, %116 : vector<8x1xf32>
    %118 = vector.broadcast %110 : vector<8x1xf32> to vector<8x8xf32>
    %119 = arith.mulf %118, %100 : vector<8x8xf32>
    %cst_70 = arith.constant dense<0.000000e+00> : vector<8x8xf32>
    %120 = tpu.matmul %113, %104, %cst_70 {dimension_numbers = #tpu.dot_dimension_numbers<[1], [0], [0], [1], [0, 0, 1, 1], [], []>} : vector<8x8xf32>, vector<8x8xf32>, vector<8x8xf32> -> vector<8x8xf32>
    %121 = arith.addf %119, %120 : vector<8x8xf32>
    %122 = tpu.reciprocal %117 : vector<8x1xf32> -> vector<8x1xf32>
    %123 = vector.broadcast %122 : vector<8x1xf32> to vector<8x8xf32>
    %124 = arith.mulf %121, %123 : vector<8x8xf32>
    %c2_71 = arith.constant 2 : index
    %c0_72 = arith.constant 0 : index
    %c0_73 = arith.constant 0 : index
    %125 = vector.load %arg9[%c2_71, %c0_72, %c0_73] : memref<4x8x32xf32, #tpu.memory_space<vmem>>, vector<1x8x32xf32>
    %126 = vector.shape_cast %125 : vector<1x8x32xf32> to vector<8x32xf32>
    %cst_74 = arith.constant dense<0.000000e+00> : vector<8x32xf32>
    %127 = tpu.matmul %124, %126, %cst_74 {dimension_numbers = #tpu.dot_dimension_numbers<[1], [0], [0], [1], [0, 0, 1, 1], [], []>} : vector<8x8xf32>, vector<8x32xf32>, vector<8x32xf32> -> vector<8x32xf32>
    %128 = arith.addf %88, %127 : vector<8x32xf32>
    %c3 = arith.constant 3 : index
    %c0_75 = arith.constant 0 : index
    %c0_76 = arith.constant 0 : index
    %129 = vector.load %arg3[%c3, %c0_75, %c0_76] : memref<4x32x8xf32, #tpu.memory_space<vmem>>, vector<1x32x8xf32>
    %130 = vector.shape_cast %129 : vector<1x32x8xf32> to vector<32x8xf32>
    %cst_77 = arith.constant dense<0.000000e+00> : vector<8x8xf32>
    %131 = tpu.matmul %7, %130, %cst_77 {dimension_numbers = #tpu.dot_dimension_numbers<[1], [0], [0], [1], [0, 0, 1, 1], [], []>} : vector<8x32xf32>, vector<32x8xf32>, vector<8x8xf32> -> vector<8x8xf32>
    %c3_78 = arith.constant 3 : index
    %c0_79 = arith.constant 0 : index
    %c0_80 = arith.constant 0 : index
    %132 = vector.load %arg4[%c3_78, %c0_79, %c0_80] : memref<4x1x8xf32, #tpu.memory_space<vmem>>, vector<1x1x8xf32>
    %133 = vector.shape_cast %132 : vector<1x1x8xf32> to vector<1x8xf32>
    %134 = vector.broadcast %133 : vector<1x8xf32> to vector<8x8xf32>
    %135 = arith.addf %131, %134 : vector<8x8xf32>
    %cst_81 = arith.constant 0.353553385 : f32
    %136 = vector.broadcast %cst_81 : f32 to vector<8x8xf32>
    %137 = arith.mulf %135, %136 : vector<8x8xf32>
    %cst_82 = arith.constant 0xFF800000 : f32
    %138 = vector.broadcast %cst_82 : f32 to vector<8x1xf32>
    %cst_83 = arith.constant 0.000000e+00 : f32
    %139 = vector.broadcast %cst_83 : f32 to vector<8x1xf32>
    %cst_84 = arith.constant 0.000000e+00 : f32
    %140 = vector.broadcast %cst_84 : f32 to vector<8x8xf32>
    %c3_85 = arith.constant 3 : index
    %c0_86 = arith.constant 0 : index
    %c0_87 = arith.constant 0 : index
    %141 = vector.load %arg20[%c3_85, %c0_86, %c0_87] : memref<4x8x8xf32, #tpu.memory_space<vmem>>, vector<1x8x8xf32>
    %142 = vector.shape_cast %141 : vector<1x8x8xf32> to vector<8x8xf32>
    %c3_88 = arith.constant 3 : index
    %c0_89 = arith.constant 0 : index
    %c0_90 = arith.constant 0 : index
    %143 = vector.load %arg21[%c3_88, %c0_89, %c0_90] : memref<4x8x8xf32, #tpu.memory_space<vmem>>, vector<1x8x8xf32>
    %144 = vector.shape_cast %143 : vector<1x8x8xf32> to vector<8x8xf32>
    %cst_91 = arith.constant dense<0.000000e+00> : vector<8x8xf32>
    %145 = tpu.matmul %137, %142, %cst_91 {dimension_numbers = #tpu.dot_dimension_numbers<[1], [1], [0], [0], [0, 0, 1, 0], [], []>} : vector<8x8xf32>, vector<8x8xf32>, vector<8x8xf32> -> vector<8x8xf32>
    %cst_92 = arith.constant dense<0xFF800000> : vector<8xf32>
    %146 = vector.multi_reduction <maximumf>, %145, %cst_92 [1] : vector<8x8xf32> to vector<8xf32>
    %147 = vector.shape_cast %146 : vector<8xf32> to vector<8x1xf32>
    %148 = arith.maximumf %138, %147 : vector<8x1xf32>
    %149 = arith.subf %138, %148 : vector<8x1xf32>
    %150 = math.exp %149 : vector<8x1xf32>
    %151 = vector.broadcast %148 : vector<8x1xf32> to vector<8x8xf32>
    %152 = arith.subf %145, %151 : vector<8x8xf32>
    %153 = math.exp %152 : vector<8x8xf32>
    %154 = arith.mulf %150, %139 : vector<8x1xf32>
    %cst_93 = arith.constant dense<0.000000e+00> : vector<8xf32>
    %155 = vector.multi_reduction <add>, %153, %cst_93 [1] : vector<8x8xf32> to vector<8xf32>
    %156 = vector.shape_cast %155 : vector<8xf32> to vector<8x1xf32>
    %157 = arith.addf %154, %156 : vector<8x1xf32>
    %158 = vector.broadcast %150 : vector<8x1xf32> to vector<8x8xf32>
    %159 = arith.mulf %158, %140 : vector<8x8xf32>
    %cst_94 = arith.constant dense<0.000000e+00> : vector<8x8xf32>
    %160 = tpu.matmul %153, %144, %cst_94 {dimension_numbers = #tpu.dot_dimension_numbers<[1], [0], [0], [1], [0, 0, 1, 1], [], []>} : vector<8x8xf32>, vector<8x8xf32>, vector<8x8xf32> -> vector<8x8xf32>
    %161 = arith.addf %159, %160 : vector<8x8xf32>
    %162 = tpu.reciprocal %157 : vector<8x1xf32> -> vector<8x1xf32>
    %163 = vector.broadcast %162 : vector<8x1xf32> to vector<8x8xf32>
    %164 = arith.mulf %161, %163 : vector<8x8xf32>
    %c3_95 = arith.constant 3 : index
    %c0_96 = arith.constant 0 : index
    %c0_97 = arith.constant 0 : index
    %165 = vector.load %arg9[%c3_95, %c0_96, %c0_97] : memref<4x8x32xf32, #tpu.memory_space<vmem>>, vector<1x8x32xf32>
    %166 = vector.shape_cast %165 : vector<1x8x32xf32> to vector<8x32xf32>
    %cst_98 = arith.constant dense<0.000000e+00> : vector<8x32xf32>
    %167 = tpu.matmul %164, %166, %cst_98 {dimension_numbers = #tpu.dot_dimension_numbers<[1], [0], [0], [1], [0, 0, 1, 1], [], []>} : vector<8x8xf32>, vector<8x32xf32>, vector<8x32xf32> -> vector<8x32xf32>
    %168 = arith.addf %128, %167 : vector<8x32xf32>
    %c0_99 = arith.constant 0 : index
    %c0_100 = arith.constant 0 : index
    %169 = vector.load %arg10[%c0_99, %c0_100] : memref<1x32xf32, #tpu.memory_space<vmem>>, vector<1x32xf32>
    %170 = vector.broadcast %169 : vector<1x32xf32> to vector<8x32xf32>
    %171 = arith.addf %168, %170 : vector<8x32xf32>
    %c0_101 = arith.constant 0 : index
    %c0_102 = arith.constant 0 : index
    %172 = vector.load %arg11[%c0_101, %c0_102] : memref<1x32xf32, #tpu.memory_space<vmem>>, vector<1x32xf32>
    %c0_103 = arith.constant 0 : index
    %c0_104 = arith.constant 0 : index
    %173 = vector.load %arg12[%c0_103, %c0_104] : memref<1x32xf32, #tpu.memory_space<vmem>>, vector<1x32xf32>
    %cst_105 = arith.constant dense<0.000000e+00> : vector<8xf32>
    %174 = vector.multi_reduction <add>, %171, %cst_105 [1] : vector<8x32xf32> to vector<8xf32>
    %175 = vector.shape_cast %174 : vector<8xf32> to vector<8x1xf32>
    %cst_106 = arith.constant 3.200000e+01 : f32
    %176 = vector.broadcast %cst_106 : f32 to vector<8x1xf32>
    %177 = arith.divf %175, %176 : vector<8x1xf32>
    %178 = vector.broadcast %177 : vector<8x1xf32> to vector<8x32xf32>
    %179 = arith.subf %171, %178 : vector<8x32xf32>
    %180 = arith.mulf %179, %179 : vector<8x32xf32>
    %cst_107 = arith.constant dense<0.000000e+00> : vector<8xf32>
    %181 = vector.multi_reduction <add>, %180, %cst_107 [1] : vector<8x32xf32> to vector<8xf32>
    %182 = vector.shape_cast %181 : vector<8xf32> to vector<8x1xf32>
    %cst_108 = arith.constant 3.200000e+01 : f32
    %183 = vector.broadcast %cst_108 : f32 to vector<8x1xf32>
    %184 = arith.divf %182, %183 : vector<8x1xf32>
    %185 = vector.broadcast %177 : vector<8x1xf32> to vector<8x32xf32>
    %186 = arith.subf %171, %185 : vector<8x32xf32>
    %cst_109 = arith.constant 9.99999974E-6 : f32
    %187 = vector.broadcast %cst_109 : f32 to vector<8x1xf32>
    %188 = arith.addf %184, %187 : vector<8x1xf32>
    %189 = math.rsqrt %188 : vector<8x1xf32>
    %190 = vector.broadcast %189 : vector<8x1xf32> to vector<8x32xf32>
    %191 = arith.mulf %186, %190 : vector<8x32xf32>
    %192 = vector.broadcast %172 : vector<1x32xf32> to vector<8x32xf32>
    %193 = arith.mulf %191, %192 : vector<8x32xf32>
    %194 = vector.broadcast %173 : vector<1x32xf32> to vector<8x32xf32>
    %195 = arith.addf %193, %194 : vector<8x32xf32>
    %c0_110 = arith.constant 0 : index
    %c0_111 = arith.constant 0 : index
    %196 = vector.load %arg13[%c0_110, %c0_111] : memref<32x64xf32, #tpu.memory_space<vmem>>, vector<32x64xf32>
    %cst_112 = arith.constant dense<0.000000e+00> : vector<8x64xf32>
    %197 = tpu.matmul %195, %196, %cst_112 {dimension_numbers = #tpu.dot_dimension_numbers<[1], [0], [0], [1], [0, 0, 1, 1], [], []>} : vector<8x32xf32>, vector<32x64xf32>, vector<8x64xf32> -> vector<8x64xf32>
    %c0_113 = arith.constant 0 : index
    %c0_114 = arith.constant 0 : index
    %198 = vector.load %arg14[%c0_113, %c0_114] : memref<1x64xf32, #tpu.memory_space<vmem>>, vector<1x64xf32>
    %199 = vector.broadcast %198 : vector<1x64xf32> to vector<8x64xf32>
    %200 = arith.addf %197, %199 : vector<8x64xf32>
    %cst_115 = arith.constant 0.000000e+00 : f32
    %201 = vector.broadcast %cst_115 : f32 to vector<8x64xf32>
    %202 = arith.maximumf %200, %201 : vector<8x64xf32>
    %c0_116 = arith.constant 0 : index
    %c0_117 = arith.constant 0 : index
    %203 = vector.load %arg15[%c0_116, %c0_117] : memref<64x32xf32, #tpu.memory_space<vmem>>, vector<64x32xf32>
    %cst_118 = arith.constant dense<0.000000e+00> : vector<8x32xf32>
    %204 = tpu.matmul %202, %203, %cst_118 {dimension_numbers = #tpu.dot_dimension_numbers<[1], [0], [0], [1], [0, 0, 1, 1], [], []>} : vector<8x64xf32>, vector<64x32xf32>, vector<8x32xf32> -> vector<8x32xf32>
    %c0_119 = arith.constant 0 : index
    %c0_120 = arith.constant 0 : index
    %205 = vector.load %arg16[%c0_119, %c0_120] : memref<1x32xf32, #tpu.memory_space<vmem>>, vector<1x32xf32>
    %206 = vector.broadcast %205 : vector<1x32xf32> to vector<8x32xf32>
    %207 = arith.addf %204, %206 : vector<8x32xf32>
    %208 = arith.addf %207, %195 : vector<8x32xf32>
    %c0_121 = arith.constant 0 : index
    %c0_122 = arith.constant 0 : index
    %209 = vector.load %arg17[%c0_121, %c0_122] : memref<1x32xf32, #tpu.memory_space<vmem>>, vector<1x32xf32>
    %c0_123 = arith.constant 0 : index
    %c0_124 = arith.constant 0 : index
    %210 = vector.load %arg18[%c0_123, %c0_124] : memref<1x32xf32, #tpu.memory_space<vmem>>, vector<1x32xf32>
    %cst_125 = arith.constant dense<0.000000e+00> : vector<8xf32>
    %211 = vector.multi_reduction <add>, %208, %cst_125 [1] : vector<8x32xf32> to vector<8xf32>
    %212 = vector.shape_cast %211 : vector<8xf32> to vector<8x1xf32>
    %cst_126 = arith.constant 3.200000e+01 : f32
    %213 = vector.broadcast %cst_126 : f32 to vector<8x1xf32>
    %214 = arith.divf %212, %213 : vector<8x1xf32>
    %215 = vector.broadcast %214 : vector<8x1xf32> to vector<8x32xf32>
    %216 = arith.subf %208, %215 : vector<8x32xf32>
    %217 = arith.mulf %216, %216 : vector<8x32xf32>
    %cst_127 = arith.constant dense<0.000000e+00> : vector<8xf32>
    %218 = vector.multi_reduction <add>, %217, %cst_127 [1] : vector<8x32xf32> to vector<8xf32>
    %219 = vector.shape_cast %218 : vector<8xf32> to vector<8x1xf32>
    %cst_128 = arith.constant 3.200000e+01 : f32
    %220 = vector.broadcast %cst_128 : f32 to vector<8x1xf32>
    %221 = arith.divf %219, %220 : vector<8x1xf32>
    %222 = vector.broadcast %214 : vector<8x1xf32> to vector<8x32xf32>
    %223 = arith.subf %208, %222 : vector<8x32xf32>
    %cst_129 = arith.constant 9.99999974E-6 : f32
    %224 = vector.broadcast %cst_129 : f32 to vector<8x1xf32>
    %225 = arith.addf %221, %224 : vector<8x1xf32>
    %226 = math.rsqrt %225 : vector<8x1xf32>
    %227 = vector.broadcast %226 : vector<8x1xf32> to vector<8x32xf32>
    %228 = arith.mulf %223, %227 : vector<8x32xf32>
    %229 = vector.broadcast %209 : vector<1x32xf32> to vector<8x32xf32>
    %230 = arith.mulf %228, %229 : vector<8x32xf32>
    %231 = vector.broadcast %210 : vector<1x32xf32> to vector<8x32xf32>
    %232 = arith.addf %230, %231 : vector<8x32xf32>
    %c0_130 = arith.constant 0 : index
    %c0_131 = arith.constant 0 : index
    %c0_132 = arith.constant 0 : index
    %233 = vector.load %arg19[%c0_130, %c0_131, %c0_132] : memref<1x8x32xf32, #tpu.memory_space<vmem>>, vector<1x8x32xf32>
    %234 = vector.shape_cast %233 : vector<1x8x32xf32> to vector<8x32xf32>
    %235 = vector.shape_cast %232 : vector<8x32xf32> to vector<1x8x32xf32>
    tpu.vector_store %arg19[%c0_130, %c0_131, %c0_132], %235 {strides = array<i32>} : memref<1x8x32xf32, #tpu.memory_space<vmem>>, vector<1x8x32xf32>,
    return
  }
  func.func @transform_0(%arg0: i32, %arg1: i32) -> (i32, i32, i32) {
    %c0_i32 = arith.constant 0 : i32
    %c0_i32_0 = arith.constant 0 : i32
    %c0_i32_1 = arith.constant 0 : i32
    return %arg0, %c0_i32, %c0_i32_0 : i32, i32, i32
  }
  func.func @transform_1(%arg0: i32, %arg1: i32) -> (i32, i32, i32) {
    %c0_i32 = arith.constant 0 : i32
    %c0_i32_0 = arith.constant 0 : i32
    %c0_i32_1 = arith.constant 0 : i32
    %c0_i32_2 = arith.constant 0 : i32
    return %c0_i32, %c0_i32_0, %c0_i32_1 : i32, i32, i32
  }
  func.func @transform_2(%arg0: i32, %arg1: i32) -> (i32, i32, i32) {
    %c0_i32 = arith.constant 0 : i32
    %c0_i32_0 = arith.constant 0 : i32
    %c0_i32_1 = arith.constant 0 : i32
    %c0_i32_2 = arith.constant 0 : i32
    return %c0_i32, %c0_i32_0, %c0_i32_1 : i32, i32, i32
  }
  func.func @transform_3(%arg0: i32, %arg1: i32) -> (i32, i32, i32) {
    %c0_i32 = arith.constant 0 : i32
    %c0_i32_0 = arith.constant 0 : i32
    %c0_i32_1 = arith.constant 0 : i32
    %c0_i32_2 = arith.constant 0 : i32
    return %c0_i32, %c0_i32_0, %c0_i32_1 : i32, i32, i32
  }
  func.func @transform_4(%arg0: i32, %arg1: i32) -> (i32, i32, i32) {
    %c0_i32 = arith.constant 0 : i32
    %c0_i32_0 = arith.constant 0 : i32
    %c0_i32_1 = arith.constant 0 : i32
    %c0_i32_2 = arith.constant 0 : i32
    return %c0_i32, %c0_i32_0, %c0_i32_1 : i32, i32, i32
  }
  func.func @transform_5(%arg0: i32, %arg1: i32) -> (i32, i32, i32) {
    %c0_i32 = arith.constant 0 : i32
    %c0_i32_0 = arith.constant 0 : i32
    %c0_i32_1 = arith.constant 0 : i32
    %c0_i32_2 = arith.constant 0 : i32
    return %c0_i32, %c0_i32_0, %c0_i32_1 : i32, i32, i32
  }
  func.func @transform_6(%arg0: i32, %arg1: i32) -> (i32, i32, i32) {
    %c0_i32 = arith.constant 0 : i32
    %c0_i32_0 = arith.constant 0 : i32
    %c0_i32_1 = arith.constant 0 : i32
    %c0_i32_2 = arith.constant 0 : i32
    return %c0_i32, %c0_i32_0, %c0_i32_1 : i32, i32, i32
  }
  func.func @transform_7(%arg0: i32, %arg1: i32) -> (i32, i32, i32) {
    %c0_i32 = arith.constant 0 : i32
    %c0_i32_0 = arith.constant 0 : i32
    %c0_i32_1 = arith.constant 0 : i32
    %c0_i32_2 = arith.constant 0 : i32
    return %c0_i32, %c0_i32_0, %c0_i32_1 : i32, i32, i32
  }
  func.func @transform_8(%arg0: i32, %arg1: i32) -> (i32, i32) {
    %c0_i32 = arith.constant 0 : i32
    %c0_i32_0 = arith.constant 0 : i32
    %c0_i32_1 = arith.constant 0 : i32
    return %c0_i32, %c0_i32_0 : i32, i32
  }
  func.func @transform_9(%arg0: i32, %arg1: i32) -> (i32, i32) {
    %c0_i32 = arith.constant 0 : i32
    %c0_i32_0 = arith.constant 0 : i32
    %c0_i32_1 = arith.constant 0 : i32
    return %c0_i32, %c0_i32_0 : i32, i32
  }
  func.func @transform_10(%arg0: i32, %arg1: i32) -> (i32, i32) {
    %c0_i32 = arith.constant 0 : i32
    %c0_i32_0 = arith.constant 0 : i32
    %c0_i32_1 = arith.constant 0 : i32
    return %c0_i32, %c0_i32_0 : i32, i32
  }
  func.func @transform_11(%arg0: i32, %arg1: i32) -> (i32, i32) {
    %c0_i32 = arith.constant 0 : i32
    %c0_i32_0 = arith.constant 0 : i32
    %c0_i32_1 = arith.constant 0 : i32
    return %c0_i32, %c0_i32_0 : i32, i32
  }
  func.func @transform_12(%arg0: i32, %arg1: i32) -> (i32, i32) {
    %c0_i32 = arith.constant 0 : i32
    %c0_i32_0 = arith.constant 0 : i32
    %c0_i32_1 = arith.constant 0 : i32
    return %c0_i32, %c0_i32_0 : i32, i32
  }
  func.func @transform_13(%arg0: i32, %arg1: i32) -> (i32, i32) {
    %c0_i32 = arith.constant 0 : i32
    %c0_i32_0 = arith.constant 0 : i32
    %c0_i32_1 = arith.constant 0 : i32
    return %c0_i32, %c0_i32_0 : i32, i32
  }
  func.func @transform_14(%arg0: i32, %arg1: i32) -> (i32, i32) {
    %c0_i32 = arith.constant 0 : i32
    %c0_i32_0 = arith.constant 0 : i32
    %c0_i32_1 = arith.constant 0 : i32
    return %c0_i32, %c0_i32_0 : i32, i32
  }
  func.func @transform_15(%arg0: i32, %arg1: i32) -> (i32, i32) {
    %c0_i32 = arith.constant 0 : i32
    %c0_i32_0 = arith.constant 0 : i32
    %c0_i32_1 = arith.constant 0 : i32
    return %c0_i32, %c0_i32_0 : i32, i32
  }
  func.func @transform_16(%arg0: i32, %arg1: i32) -> (i32, i32) {
    %c0_i32 = arith.constant 0 : i32
    %c0_i32_0 = arith.constant 0 : i32
    %c0_i32_1 = arith.constant 0 : i32
    return %c0_i32, %c0_i32_0 : i32, i32
  }
  func.func @transform_17(%arg0: i32, %arg1: i32) -> (i32, i32, i32) {
    %c0_i32 = arith.constant 0 : i32
    %c0_i32_0 = arith.constant 0 : i32
    return %arg0, %arg1, %c0_i32 : i32, i32, i32
  }
}

</mosaic_0001>

<bundles_post_ra>
// kernel: transformer_encoder.3
= control target key start
LH: loop header
LB: loop body
LE: loop exit
PB: predicated region body
PF: predicated region fallthrough
CT: control target
= control target key end

     0   :  { %s4191_s0 = inlined_call_operand.vmem [shape: f32[2,8,32], index: 0, kind: input, shape index: {}]   ;;  %s4192_s1 = inlined_call_operand.vmem [shape: f32[4,32,8], index: 1, kind: input, shape index: {}]   ;;  %s4193_s2 = inlined_call_operand.vmem [shape: f32[4,1,8], index: 2, kind: input, shape index: {}]   ;;  %s4194_s3 = inlined_call_operand.vmem [shape: f32[4,32,8], index: 3, kind: input, shape index: {}]   ;;  %s4195_s4 = inlined_call_operand.vmem [shape: f32[4,1,8], index: 4, kind: input, shape index: {}]   ;;  %s4196_s5 = inlined_call_operand.vmem [shape: f32[4,32,8], index: 5, kind: input, shape index: {}]   ;;  %s4197_s6 = inlined_call_operand.vmem [shape: f32[4,1,8], index: 6, kind: input, shape index: {}]   ;;  %s4198_s7 = inlined_call_operand.vmem [shape: f32[4,8,32], index: 7, kind: input, shape index: {}]   ;;  %s4199_s8 = inlined_call_operand.vmem [shape: f32[1,32], index: 8, kind: input, shape index: {}]   ;;  %s4200_s9 = inlined_call_operand.vmem [shape: f32[1,32], index: 9, kind: input, shape index: {}]   ;;  %s4201_s10 = inlined_call_operand.vmem [shape: f32[1,32], index: 10, kind: input, shape index: {}]   ;;  %s4202_s11 = inlined_call_operand.vmem [shape: f32[32,64], index: 11, kind: input, shape index: {}]   ;;  %s4203_s12 = inlined_call_operand.vmem [shape: f32[1,64], index: 12, kind: input, shape index: {}]   ;;  %s4204_s13 = inlined_call_operand.vmem [shape: f32[64,32], index: 13, kind: input, shape index: {}]   ;;  %s4205_s14 = inlined_call_operand.vmem [shape: f32[1,32], index: 14, kind: input, shape index: {}]   ;;  %s4206_s15 = inlined_call_operand.vmem [shape: f32[1,32], index: 15, kind: input, shape index: {}]   ;;  %s4207_s16 = inlined_call_operand.vmem [shape: f32[1,32], index: 16, kind: input, shape index: {}]   ;;  %s4208_s17 = inlined_call_operand.hbm [shape: f32[2,8,32], index: 17, kind: output, shape index: {}]  }
   0x1   :  { %4218 = sst [smem:[#allocation14_spill]] %s4191_s0 }
   0x2   :  { %4219 = sst [smem:[#allocation15_spill]] %s4192_s1 }
   0x3   :  { %22 = vsyncpa [#allocation5], 0 }
   0x4   :  { %24 = vsyncpa [#allocation5 + $0x1], 0  ;;  %s3669_s24 = smov 0   ;;  %s3671_s25 = smov 0  }
   0x5   :  { %s3673_s26 = smov 0   ;;  %s3675_s27 = smov 0  }
   0x6   :  { %s3677_s28 = smov 0   ;;  %s3679_s29 = smov 0  }
   0x7 LB: > { %4220 = sst [smem:[#allocation7_spill]] %s3553_s24  ;;  %s2891_s0 = sadd.s32 4294967295, %s3573_s29   ;;  %s3573_s29 = sphi %s3679_s29, %s30_s29   ;;  %s3569_s28 = sphi %s3677_s28, %s4237_s28   ;;  %s3565_s27 = sphi %s3675_s27, %s4236_s27   ;;  %s3561_s26 = sphi %s3673_s26, %s4235_s26   ;;  %s3557_s25 = sphi %s3671_s25, %s4239_s25   ;;  %s3553_s24 = sphi %s3669_s24, %s4238_s24  }
   0x8   : > { %4221 = sst [smem:[#allocation8_spill]] %s3561_s26  ;;  %s2892_s30 = sadd.s32 4294967294, %s3573_s29  }
   0x9   : > { %4222 = sst [smem:[#allocation9_spill]] %s3569_s28  ;;  %s42_s18 = sadd.s32 1, %s3569_s28 }
   0xa   : > { %4223 = sst [smem:[#allocation10_spill]] %s3573_s29  ;;  %s413_s19 = sadd.s32 1, %s3561_s26 }
   0xb   : > { %p44_p0 = scmp.ge.s32.totalorder %s42_s18, 2  ;;  %p423_p1 = scmp.ne.s32.totalorder %s3561_s26, %s3557_s25 }
   0xc   : > { %p424_p2 = scmp.eq.s32.totalorder %s2891_s0, 1  ;;  %p429_p3 = scmp.ne.s32.totalorder %s3557_s25, %s3553_s24 }
   0xd   : > { %s4241_s18 = smov (%p44_p0, %s42_s18), 0  ;;  %p430_p5 = scmp.eq.s32.totalorder %s2892_s30, 1 }
   0xe   : > { %4224 = sst [smem:[#allocation11_spill]] %s4241_s18  ;;  %p3709_p4 = por %p424_p2, %p423_p1 }
   0xf   : > { %s408_s20 = ssub.s32 %s3569_s28, %s4241_s18  ;;  %p2895_p6 = scmp.ge.s32.totalorder %s3573_s29, 1 }
  0x10   : > { %p411_p7 = scmp.eq.s32.totalorder %s408_s20, 0  ;;  %p3716_p8 = por %p430_p5, %p429_p3 }
  0x11   : > { %p503_p9 = scmp.lt.s32.totalorder %s3573_s29, 3 }
  0x12   : > { %s4226_s21 = scalar_select %p3716_p8, 1, 0 }
  0x13   : > { %s3722_s22 = scalar_select %p411_p7, %s3561_s26, %s413_s19  }
  0x14   : > { %4227 = sst [smem:[#allocation12_spill]] %s4226_s21  ;;  %p504_p10 = pnand %p2895_p6, %p503_p9 }
  0x15   : > { %4228 = sst [smem:[#allocation13_spill]] %s3722_s22  ;;  %v563_v0 = vld [vmem:[%s4194_s3] sm:$0xff] (!%p504_p10)  ;;  %v564_v1 = vld [vmem:[%s4194_s3 + $0x8] sm:$0xff] (!%p504_p10)  ;;  %v565_v2 = vld [vmem:[%s4194_s3 + $0x10] sm:$0xff] (!%p504_p10)  ;;  %v3575_v3 = vmov (!%p504_p10), 0.0|0.0   ;;  %vm3576_vm0 = vmmov (!%p504_p10), 0  }
  0x16   : > { %507 = sbr.rel (%p504_p10) target bundleno = 3934 (0xf5e), region = 88  ;;  %3319 = vmatprep.subr.bf16.mxu0 (!%p504_p10), %v3575_v3  ;;  %v3320_v4 = vpack.c.bf16 (!%p504_p10), %v564_v1, %v563_v0  ;;  %v566_v5 = vld [vmem:[%s4194_s3 + $0x18] sm:$0xff] (!%p504_p10)  ;;  %v3577_v6 = vmov (!%p504_p10), 0.0   ;;  %p554_p11 = scmp.lt.s32.totalorder (!%p504_p10), %s3565_s27, 1  ;;  %3325 = vmatprep.subr.bf16.mxu1 (!%p504_p10), %v3575_v3  ;;  %v2902_v8 = vld [vmem:[%s4194_s3 + $0x20] sm:$0xff] (!%p504_p10)  ;;  %v2903_v9 = vld [vmem:[%s4194_s3 + $0x28] sm:$0xff] (!%p504_p10) }
  0x17   : > { %3105 = vmatprep.mubr.msk.f32.mxu0 (!%p504_p10), %vm3576_vm0, %v3577_v6  ;;  %3116 = vmatprep.mubr.msk.f32.mxu1 (!%p504_p10), %vm3576_vm0, %v3577_v6  ;;  %v3323_v7 = vpack.c.bf16 (!%p504_p10), %v566_v5, %v565_v2  ;;  %s4229_s22 = sld [smem:[#allocation14_spill]] (!%p504_p10)  ;;  %vm574_vm1 = vcmask (!%p504_p10), 261120   ;;  %v3332_v11 = vpack.c.bf16 (!%p504_p10), %v2903_v9, %v2902_v8  ;;  %v2904_v12 = vld [vmem:[%s4194_s3 + $0x30] sm:$0xff] (!%p504_p10)  ;;  %v2905_v13 = vld [vmem:[%s4194_s3 + $0x38] sm:$0xff] (!%p504_p10)  ;;  %v2916_v15 = vld [vmem:[%s4194_s3 + $0x40] sm:$0xff] (!%p504_p10)  ;;  %s4230_s0 = sld [smem:[#allocation15_spill]] (!%p504_p10) }
  0x18   : > { %3321 = vmatpush3.bf16.msra.mxu0 (!%p504_p10), %v3320_v4  ;;  %v3335_v14 = vpack.c.bf16 (!%p504_p10), %v2905_v13, %v2904_v12  ;;  %v2917_v16 = vld [vmem:[%s4194_s3 + $0x48] sm:$0xff] (!%p504_p10)  ;;  %v2918_v18 = vld [vmem:[%s4194_s3 + $0x50] sm:$0xff] (!%p504_p10)  ;;  %v2919_v19 = vld [vmem:[%s4194_s3 + $0x58] sm:$0xff] (!%p504_p10)  ;;  %vm729_vm2 = vcmask (!%p504_p10), 64512   ;;  %vm2701_vm3 = vcmask (!%p504_p10), 523264   ;;  %s551_s29 = sand.u32 (!%p504_p10), 1, %s3557_s25  }
  0x19   : > { %3322 = vmatprep.subr.bf16.mxu0 (!%p504_p10), %v3575_v3  ;;  %v3344_v17 = vpack.c.bf16 (!%p504_p10), %v2917_v16, %v2916_v15  ;;  %v3347_v20 = vpack.c.bf16 (!%p504_p10), %v2919_v19, %v2918_v18  ;;  %v2930_v21 = vld [vmem:[%s4194_s3 + $0x60] sm:$0xff] (!%p504_p10)  ;;  %v2931_v22 = vld [vmem:[%s4194_s3 + $0x68] sm:$0xff] (!%p504_p10)  ;;  %v2932_v24 = vld [vmem:[%s4194_s3 + $0x70] sm:$0xff] (!%p504_p10)  ;;  %s2896_s21 = sshll.u32 (!%p504_p10), %s551_s29, 3  ;;  %s2996_s19 = sshll.u32 (!%p504_p10), %s3565_s27, 7 }
  0x1a   : > { %v3356_v23 = vpack.c.bf16 (!%p504_p10), %v2931_v22, %v2930_v21  ;;  %v2933_v25 = vld [vmem:[%s4194_s3 + $0x78] sm:$0xff] (!%p504_p10)  ;;  %v648_v33 = vld [vmem:[%s4196_s5] sm:$0xff] (!%p504_p10)  ;;  %v649_v34 = vld [vmem:[%s4196_s5 + $0x8] sm:$0xff] (!%p504_p10)  ;;  %s553_s18 = scalar_lea.vmem (!%p504_p10), [#allocation4], %s2896_s21 }
  0x1b   : > { %v3359_v26 = vpack.c.bf16 (!%p504_p10), %v2933_v25, %v2932_v24  ;;  %v650_v35 = vld [vmem:[%s4196_s5 + $0x10] sm:$0xff] (!%p504_p10)  ;;  %v3326_v36 = vpack.c.bf16 (!%p504_p10), %v649_v34, %v648_v33  ;;  %v651_v37 = vld [vmem:[%s4196_s5 + $0x18] sm:$0xff] (!%p504_p10)  ;;  %v2898_v39 = vld [vmem:[%s4195_s4] ss:$0 sm:$0xff] (!%p504_p10)  ;;  %s2821_s23 = sshll.u32 (!%p504_p10), %s553_s18, 4  ;;  %s4145_s23 = int_to_ptr.vmem [resolvable:$true] %s2821_s23 }
  0x1c   : > { %3324 = vmatpush3.bf16.msra.mxu0 (!%p504_p10), %v3323_v7  ;;  %v3329_v38 = vpack.c.bf16 (!%p504_p10), %v651_v37, %v650_v35  ;;  %v2907_v43 = vld [vmem:[%s4195_s4 + $0x1] ss:$0 sm:$0xff] (!%p504_p10)  ;;  %v2921_v48 = vld [vmem:[%s4195_s4 + $0x2] ss:$0 sm:$0xff] (!%p504_p10)  ;;  %v2935_v52 = vld [vmem:[%s4195_s4 + $0x3] ss:$0 sm:$0xff] (!%p504_p10) }
  0x1d   : > { %s555_s24 = scalar_select %p554_p11, %s3565_s27, 1  ;;  %3331 = vmatprep.subr.bf16.mxu0 %v3575_v3  ;;  %v1245_v27 = vld [vmem:[%s4230_s0] sm:$0xff]  ;;  %v1246_v28 = vld [vmem:[%s4230_s0 + $0x8] sm:$0xff]  ;;  %v1247_v30 = vld [vmem:[%s4230_s0 + $0x10] sm:$0xff]  ;;  %3327 = vmatpush3.bf16.msra.mxu1 %v3326_v36 }
  0x1e   : > { %v3368_v29 = vpack.c.bf16 %v1246_v28, %v1245_v27  ;;  %v1248_v31 = vld [vmem:[%s4230_s0 + $0x18] sm:$0xff]  ;;  %3328 = vmatprep.subr.bf16.mxu1 %v3575_v3  ;;  %v2944_v56 = vld [vmem:[%s4193_s2] ss:$0 sm:$0xff]  ;;  %v2950_v58 = vld [vmem:[%s4230_s0 + $0x28] sm:$0xff]  ;;  %s3495_s28 = scalar_lea.vmem %s4145_s23, 128  ;;  %s3578_s27 = smov [#allocation4]  }
  0x1f   : > { %s2897_s30 = sshll.u32 %s555_s24, 3  ;;  %v3371_v32 = vpack.c.bf16 %v1248_v31, %v1247_v30  ;;  %v2949_v57 = vld [vmem:[%s4230_s0 + $0x20] sm:$0xff]  ;;  %v2951_v0 = vld [vmem:[%s4230_s0 + $0x30] sm:$0xff]  ;;  %v2952_v1 = vld [vmem:[%s4230_s0 + $0x38] sm:$0xff]  ;;  %s2807_s24 = scalar_lea.sflag [#allocation5], %s551_s29 }
  0x20   : > { %s557_s26 = scalar_lea.vmem %s4229_s22, %s2897_s30  ;;  %v3374_v62 = vpack.c.bf16 %v2950_v58, %v2949_v57  ;;  %v3377_v2 = vpack.c.bf16 %v2952_v1, %v2951_v0  ;;  %v2909_v4 = vld [vmem:[%s4196_s5 + $0x20] sm:$0xff]  ;;  %v2910_v5 = vld [vmem:[%s4196_s5 + $0x28] sm:$0xff]  ;;  %v2911_v7 = vld [vmem:[%s4196_s5 + $0x30] sm:$0xff]  ;;  %p3496_p12 = scmp.ne.s32.totalorder %s4145_s23, %s3495_s28 }
  0x21   : > { %v3754_v10 = vld [vmem:[%s557_s26] sm:$0xff]  ;;  %3330 = vmatpush3.bf16.msra.mxu1 %v3329_v38  ;;  %v3338_v8 = vpack.c.bf16 %v2910_v5, %v2909_v4  ;;  %v2912_v9 = vld [vmem:[%s4196_s5 + $0x38] sm:$0xff]  ;;  %v2924_v13 = vld [vmem:[%s4196_s5 + $0x48] sm:$0xff]  ;;  %s3499_s21 = sshll.u32 %s3578_s27, 4  ;;  %s3500_s21 = int_to_ptr.vmem [resolvable:$false] %s3499_s21 }
  0x22   : > { %3106 = vmatmul.mubr.msk.f32.vlgmr.msra.gmra.mrb[0].mxu0 %vm574_vm1, %v3754_v10  ;;  %3337 = vmatprep.subr.bf16.mxu1 %v3575_v3  ;;  %v2923_v12 = vld [vmem:[%s4196_s5 + $0x40] sm:$0xff]  ;;  %v2926_v18 = vld [vmem:[%s4196_s5 + $0x58] sm:$0xff]  ;;  %v2939_v28 = vld [vmem:[%s4196_s5 + $0x70] sm:$0xff]  ;;  %p3497_p13 = pnand %p3496_p12, %p3709_p4  ;;  %s3501_s30 = scalar_lea.vmem %s3500_s21, 256 }
  0x23   : > { %3333 = vmatpush3.bf16.msra.mxu0 %v3332_v11  ;;  %3127 = vmatprep.mubr.msk.f32.mxu0 %vm3576_vm0, %v3577_v6  ;;  %v3341_v11 = vpack.c.bf16 %v2912_v9, %v2911_v7  ;;  %v3350_v15 = vpack.c.bf16 %v2924_v13, %v2923_v12  ;;  %v2937_v25 = vld [vmem:[%s4196_s5 + $0x60] sm:$0xff]  ;;  %v2959_v4 = vld [vmem:[%s4198_s7 + $0x8] sm:$0xff]  ;;  %p3502_p1 = scmp.lt.s32.totalorder %s4145_s23, %s3500_s21  ;;  %p3503_p2 = scmp.lt.s32.totalorder %s3501_s30, %s3495_s28 }
  0x24   : > { %3334 = vmatprep.subr.bf16.mxu0 %v3575_v3  ;;  %3117 = vmatmul.mubr.msk.f32.vlgmr.msra.gmra.mrb[0].mxu1 %vm574_vm1, %v3754_v10  ;;  %v2914_v34 = vld [vmem:[%s4197_s6 + $0x1] ss:$0 sm:$0xff]  ;;  %v2928_v38 = vld [vmem:[%s4197_s6 + $0x2] ss:$0 sm:$0xff]  ;;  %p3498_p0 = pneg %p3497_p13 }
  0x25   : > { %3138 = vmatprep.mubr.msk.f32.mxu1 %vm3576_vm0, %v3577_v6  ;;  %3339 = vmatpush3.bf16.msra.mxu1 %v3338_v8  ;;  %p3504_p3 = por %p3503_p2, %p3502_p1 }
  0x26   : > { %3340 = vmatprep.subr.bf16.mxu1 %v3575_v3 }
  0x27   : > { %3336 = vmatpush3.bf16.msra.mxu0 %v3335_v14  ;;  %v2900_v14 = vld [vmem:[%s4197_s6] ss:$0 sm:$0xff]  ;;  %p3505_p5 = pnand %p3504_p3, %p3498_p0 }
  0x28   : > { %3343 = vmatprep.subr.bf16.mxu0 %v3575_v3 }
  0x29   : > { %3342 = vmatpush3.bf16.msra.mxu1 %v3341_v11 }
  0x2a   : > { %3128 = vmatmul.mubr.msk.f32.vlgmr.msra.gmra.mrb[2].mxu0 %vm574_vm1, %v3754_v10  ;;  %3349 = vmatprep.subr.bf16.mxu1 %v3575_v3 }
  0x2b   : > { %3345 = vmatpush3.bf16.msra.mxu0 %v3344_v17  ;;  %3149 = vmatprep.mubr.msk.f32.mxu0 %vm3576_vm0, %v3577_v6  ;;  %v2925_v17 = vld [vmem:[%s4196_s5 + $0x50] sm:$0xff] }
  0x2c   : > { %3346 = vmatprep.subr.bf16.mxu0 %v3575_v3  ;;  %3139 = vmatmul.mubr.msk.f32.vlgmr.msra.gmra.mrb[2].mxu1 %vm574_vm1, %v3754_v10  ;;  %v3353_v21 = vpack.c.bf16 %v2926_v18, %v2925_v17 }
  0x2d   : > { %3351 = vmatpush3.bf16.msra.mxu1 %v3350_v15  ;;  %3160 = vmatprep.mubr.msk.f32.mxu1 %vm3576_vm0, %v3577_v6 }
  0x2e   : > { %3352 = vmatprep.subr.bf16.mxu1 %v3575_v3 }
  0x2f   : > { %3348 = vmatpush3.bf16.msra.mxu0 %v3347_v20 }
  0x30   : > { %3355 = vmatprep.subr.bf16.mxu0 %v3575_v3 }
  0x31   : > { %3354 = vmatpush3.bf16.msra.mxu1 %v3353_v21 }
  0x32   : > { %3150 = vmatmul.mubr.msk.f32.vlgmr.msra.gmra.mrb[4].mxu0 %vm574_vm1, %v3754_v10  ;;  %3361 = vmatprep.subr.bf16.mxu1 %v3575_v3 }
  0x33   : > { %3357 = vmatpush3.bf16.msra.mxu0 %v3356_v23  ;;  %3171 = vmatprep.mubr.msk.f32.mxu0 %vm3576_vm0, %v3577_v6 }
  0x34   : > { %3358 = vmatprep.subr.bf16.mxu0 %v3575_v3  ;;  %3161 = vmatmul.mubr.msk.f32.vlgmr.msra.gmra.mrb[4].mxu1 %vm574_vm1, %v3754_v10 }
  0x35   : > { %3182 = vmatprep.mubr.msk.f32.mxu1 %vm3576_vm0, %v3577_v6 }
  0x37   : > { %3360 = vmatpush3.bf16.msra.mxu0 %v3359_v26  ;;  %v2938_v26 = vld [vmem:[%s4196_s5 + $0x68] sm:$0xff] }
  0x38   : > { %3367 = vmatprep.subr.bf16.mxu0 %v3575_v3  ;;  %v3362_v27 = vpack.c.bf16 %v2938_v26, %v2937_v25 }
  0x3a   : > { %3172 = vmatmul.mubr.msk.f32.vlgmr.msra.gmra.mrb[6].mxu0 %vm574_vm1, %v3754_v10  ;;  %3363 = vmatpush3.bf16.msra.mxu1 %v3362_v27 }
  0x3b   : > { %3369 = vmatpush3.bf16.msra.mxu0 %v3368_v29  ;;  %3193 = vmatprep.mubr.msk.f32.mxu0 %vm3576_vm0, %v3577_v6  ;;  %v2940_v29 = vld [vmem:[%s4196_s5 + $0x78] sm:$0xff] }
  0x3c   : > { %3370 = vmatprep.subr.bf16.mxu0 %v3575_v3  ;;  %3364 = vmatprep.subr.bf16.mxu1 %v3575_v3  ;;  %v3365_v30 = vpack.c.bf16 %v2940_v29, %v2939_v28 }
  0x3e   : > { %3366 = vmatpush3.bf16.msra.mxu1 %v3365_v30 }
  0x3f   : > { %3372 = vmatpush3.bf16.msra.mxu0 %v3371_v32  ;;  %3201 = vmatprep.subr.mxu1 %v3577_v6 }
  0x40   : > { %3196 = vmatprep.subr.mxu0 %v3577_v6 }
  0x41   : > { %3183 = vmatmul.mubr.msk.f32.vlgmr.msra.gmra.mrb[6].mxu1 %vm574_vm1, %v3754_v10 }
  0x42   : > { %3194 = vmatmul.mubr.msk.f32.vlgmr.msra.gmra.mrb[8].mxu0 %vm574_vm1, %v3754_v10  ;;  %3203 = vmatprep.mubr.msk.f32.mxu1 %vm3576_vm0, %v3577_v6 }
  0x43   : > { %3198 = vmatprep.mubr.msk.f32.mxu0 %vm3576_vm0, %v3577_v6 }
  0xf5   : > { %v644_v40 = vpop.f32.mrb[0].mxu0 }
  0xf6   : > { %v645_v41 = vadd.f32 %v2898_v39, %v644_v40  ;;  %v3107_v42 = vpop.f32.mrb[1].mxu0 }
  0xf7   : > { %v725_v16 = vpop.f32.mrb[0].mxu1 }
  0xf8   : > { %730 = vst.msk [vmem:[#allocation2] sm:$0xff] %vm729_vm2, %v645_v41  ;;  %v726_v19 = vadd.f32 %v2900_v14, %v725_v16  ;;  %v3118_v20 = vpop.f32.mrb[1].mxu1 }
  0xfa   : > { %731 = vst.msk [vmem:[#allocation3] sm:$0xff] %vm729_vm2, %v726_v19 }
  0xfd   : > { %v811_v44 = vpop.f32.mrb[2].mxu0 }
  0xfe   : > { %v812_v45 = vadd.f32 %v2907_v43, %v811_v44  ;;  %v3129_v46 = vpop.f32.mrb[3].mxu0 }
  0xff   : > { %v1331_v47 = vld [vmem:[#allocation2] sm:$0xff]  ;;  %v894_v35 = vpop.f32.mrb[2].mxu1 }
 0x100   : > { %899 = vst.msk [vmem:[#allocation2 + $0x8] sm:$0xff] %vm729_vm2, %v812_v45  ;;  %3197 = vmatpush3.xpose.msk.msra.mxu0 %vm729_vm2, %v1331_v47  ;;  %v895_v36 = vadd.f32 %v2914_v34, %v894_v35  ;;  %v3140_v37 = vpop.f32.mrb[3].mxu1  ;;  %v2954_v45 = vld [vmem:[%s4193_s2 + $0x1] ss:$0 sm:$0xff] }
 0x101   : > { %3373 = vmatprep.subr.bf16.mxu0 %v3575_v3  ;;  %v1332_v32 = vld [vmem:[#allocation3] sm:$0xff] }
 0x102   : > { %3202 = vmatpush3.msra.mxu1 %v1332_v32  ;;  %901 = vst.msk [vmem:[#allocation3 + $0x8] sm:$0xff] %vm729_vm2, %v895_v36  ;;  %v2965_v32 = vld [vmem:[%s4230_s0 + $0x58] sm:$0xff] }
 0x103   : > { %3217 = vmatprep.subr.mxu1 %v3577_v6 }
 0x105   : > { %v981_v49 = vpop.f32.mrb[4].mxu0 }
 0x106   : > { %v982_v50 = vadd.f32 %v2921_v48, %v981_v49  ;;  %v3151_v51 = vpop.f32.mrb[5].mxu0 }
 0x107   : > { %v1064_v39 = vpop.f32.mrb[4].mxu1  ;;  %v1586_v49 = vld [vmem:[#allocation2 + $0x8] sm:$0xff]  ;;  %v2942_v51 = vld [vmem:[%s4197_s6 + $0x3] ss:$0 sm:$0xff] }
 0x108   : > { %1069 = vst.msk [vmem:[#allocation2 + $0x10] sm:$0xff] %vm729_vm2, %v982_v50  ;;  %v1065_v40 = vadd.f32 %v2928_v38, %v1064_v39  ;;  %v3162_v41 = vpop.f32.mrb[5].mxu1  ;;  %v2967_v39 = vld [vmem:[%s4193_s2 + $0x2] ss:$0 sm:$0xff] }
 0x109   : > { %v1588_v50 = vld [vmem:[#allocation3 + $0x8] sm:$0xff] }
 0x10a   : > { %1071 = vst.msk [vmem:[#allocation3 + $0x10] sm:$0xff] %vm729_vm2, %v1065_v40 }
 0x10d   : > { %v1151_v53 = vpop.f32.mrb[6].mxu0 }
 0x10e   : > { %v1152_v54 = vadd.f32 %v2935_v52, %v1151_v53  ;;  %v3173_v55 = vpop.f32.mrb[7].mxu0 }
 0x10f   : > { %v1988_v17 = vld [vmem:[#allocation2 + $0x10] sm:$0xff] }
 0x110   : > { %1239 = vst.msk [vmem:[#allocation2 + $0x18] sm:$0xff] %vm729_vm2, %v1152_v54 }
 0x114   : > { %v1234_v52 = vpop.f32.mrb[6].mxu1 }
 0x115   : > { %v1326_v59 = vpop.f32.mrb[8].mxu0  ;;  %v1235_v53 = vadd.f32 %v2942_v51, %v1234_v52  ;;  %v3184_v54 = vpop.f32.mrb[7].mxu1  ;;  %v2974_v51 = vld [vmem:[%s4230_s0 + $0x60] sm:$0xff]  ;;  %v2975_v52 = vld [vmem:[%s4230_s0 + $0x68] sm:$0xff] }
 0x116   : > { %v1327_v60 = vadd.f32 %v2944_v56, %v1326_v59  ;;  %v3195_v61 = vpop.f32.mrb[9].mxu0  ;;  %v2976_v54 = vld [vmem:[%s4230_s0 + $0x70] sm:$0xff] }
 0x117   : > { %1241 = vst.msk [vmem:[#allocation3 + $0x18] sm:$0xff] %vm729_vm2, %v1235_v53  ;;  %v3386_v53 = vpack.c.bf16 %v2975_v52, %v2974_v51  ;;  %v2603_v52 = vld [vmem:[%s4202_s11 + $0x10] sm:$0xff] }
 0x118   : > { %v1330_v63 = vmul.f32 0.35355338, %v1327_v60 }
 0x11a   : > { %3199 = vmatmul.mubr.msk.f32.vlgmr.msra.gmra.mrb[10].mxu0 %vm729_vm2, %v1330_v63 }
 0x11b   : > { %3375 = vmatpush3.bf16.msra.mxu0 %v3374_v62  ;;  %3214 = vmatprep.mubr.msk.f32.mxu0 %vm3576_vm0, %v3577_v6 }
 0x11c   : > { %3376 = vmatprep.subr.bf16.mxu0 %v3575_v3 }
 0x11f   : > { %3378 = vmatpush3.bf16.msra.mxu0 %v3377_v2  ;;  %v1500_v2 = vld [vmem:[%s4198_s7] sm:$0xff] }
 0x120   : > { %3227 = vmatprep.subr.mxu0 %v3577_v6 }
 0x122   : > { %3215 = vmatmul.mubr.msk.f32.vlgmr.msra.gmra.mrb[12].mxu0 %vm574_vm1, %v3754_v10 }
 0x123   : > { %3229 = vmatprep.mubr.msk.f32.mxu0 %vm3576_vm0, %v3577_v6  ;;  %3228 = vmatpush3.msra.mxu0 %v2959_v4 }
 0x124   : > { %3379 = vmatprep.subr.bf16.mxu0 %v3575_v3 }
 0x1ed   : > { %v1406_v22 = vpop.f32.mrb[10].mxu0 }
 0x1ee   : > { %v3200_v23 = vpop.f32.mrb[11].mxu0  ;;  %v1410_v24 = vsel %vm729_vm2, %v1406_v22, -inf }
 0x1ef   : > { %1411 = vmax.xlane.f32.xlu0 %v1410_v24  ;;  %v2962_v23 = vld [vmem:[%s4230_s0 + $0x40] sm:$0xff]  ;;  %v2963_v24 = vld [vmem:[%s4230_s0 + $0x48] sm:$0xff] }
 0x1f0   : > { %v3380_v29 = vpack.c.bf16 %v2963_v24, %v2962_v23 }
 0x1f5   : > { %v1580_v31 = vpop.f32.mrb[12].mxu0 }
 0x1f6   : > { %v3216_v33 = vpop.f32.mrb[13].mxu0  ;;  %v1581_v46 = vadd.f32 %v2954_v45, %v1580_v31  ;;  %v2964_v31 = vld [vmem:[%s4230_s0 + $0x50] sm:$0xff] }
 0x1f7   : > { %v3383_v33 = vpack.c.bf16 %v2965_v32, %v2964_v31 }
 0x1f8   : > { %v1584_v48 = vmul.f32 0.35355338, %v1581_v46 }
 0x27c   : > { %v1412_v42 = vpop.xlane.xlu0 %1411 }
 0x27d   : > { %v1416_v43 = vsub.f32 %v1406_v22, %v1412_v42  ;;  %v1413_v5 = vsub.f32 -inf, %v1412_v42 }
 0x27f   : > { %v1417_v44 = vmul.f32 1.442695, %v1416_v43  ;;  %v1414_v7 = vmul.f32 1.442695, %v1413_v5 }
 0x281   : > { %3467 = vpow2.f32 %v1417_v44  ;;  %v1990_v44 = vld [vmem:[#allocation3 + $0x10] sm:$0xff] }
 0x28b   : > { %v3468_v47 = vpop.eup %3467 }
 0x28c   : > { %3204 = vmatmul.mubr.msk.f32.vlgmr.msra.gmra.mrb[8].mxu1 %vm729_vm2, %v3468_v47  ;;  %v1420_v1 = vsel %vm729_vm2, %v3468_v47, 0.0 }
 0x28d   : > { %3218 = vmatpush3.xpose.msk.msra.mxu1 %vm729_vm2, %v1586_v49  ;;  %3219 = vmatprep.mubr.msk.f32.mxu1 %vm3576_vm0, %v3577_v6 }
 0x28e   : > { %3222 = vmatprep.subr.mxu1 %v3577_v6 }
 0x290   : > { %3220 = vmatmul.mubr.msk.f32.vlgmr.msra.gmra.mrb[10].mxu1 %vm729_vm2, %v1584_v48 }
 0x291   : > { %3223 = vmatpush3.msra.mxu1 %v1588_v50  ;;  %3224 = vmatprep.mubr.msk.f32.mxu1 %vm3576_vm0, %v3577_v6 }
 0x292   : > { %3232 = vmatprep.subr.mxu1 %v3577_v6 }
 0x35f   : > { %v1493_v55 = vpop.f32.mrb[8].mxu1 }
 0x360   : > { %v3205_v56 = vpop.f32.mrb[9].mxu1 }
 0x363   : > { %v1661_v57 = vpop.f32.mrb[10].mxu1 }
 0x364   : > { %v3221_v58 = vpop.f32.mrb[11].mxu1  ;;  %v1665_v59 = vsel %vm729_vm2, %v1661_v57, -inf }
 0x365   : > { %1666 = vmax.xlane.f32.xlu0 %v1665_v59  ;;  %v2972_v59 = vld [vmem:[%s4198_s7 + $0x10] sm:$0xff] }
 0x3f2   : > { %v1667_v60 = vpop.xlane.xlu0 %1666 }
 0x3f3   : > { %v1671_v61 = vsub.f32 %v1661_v57, %v1667_v60  ;;  %v1668_v18 = vsub.f32 -inf, %v1667_v60 }
 0x3f5   : > { %v1672_v62 = vmul.f32 1.442695, %v1671_v61  ;;  %v1669_v19 = vmul.f32 1.442695, %v1668_v18 }
 0x3f7   : > { %3469 = vpow2.f32 %v1672_v62 }
 0x3f8   : > { %3471 = vpow2.f32 %v1414_v7 }
 0x401   : > { %v3470_v63 = vpop.eup %3469 }
 0x402   : > { %3225 = vmatmul.mubr.msk.f32.vlgmr.msra.gmra.mrb[12].mxu1 %vm729_vm2, %v3470_v63  ;;  %v1675_v0 = vsel %vm729_vm2, %v3470_v63, 0.0  ;;  %v3472_v8 = vpop.eup %3471 }
 0x403   : > { %1676 = vadd.xlane.f32.xlu1 %v1675_v0  ;;  %3234 = vmatprep.mubr.msk.f32.mxu1 %vm3576_vm0, %v3577_v6  ;;  %v1419_v11 = vmul.f32 0.0, %v3472_v8  ;;  %v2318_v8 = vld [vmem:[#allocation2 + $0x18] sm:$0xff] }
 0x404   : > { %3233 = vmatpush3.msra.mxu1 %v1500_v2 }
 0x405   : > { %3248 = vmatprep.subr.mxu1 %v3577_v6  ;;  %v1497_v14 = vadd.f32 %v1493_v55, %v1419_v11  ;;  %v2977_v55 = vld [vmem:[%s4230_s0 + $0x78] sm:$0xff]  ;;  %s4143_s0 = scalar_lea.hbm %s4208_s17, %s2996_s19 }
 0x406   : > { %v3389_v58 = vpack.c.bf16 %v2977_v55, %v2976_v54  ;;  %v2686_v55 = vld [vmem:[%s4204_s13] sm:$0xff] }
 0x407   : > { %1421 = vadd.xlane.f32.xlu1 %v1420_v1 }
 0x490   : > { %v1677_v9 = vpop.xlane.xlu1 %1676 }
 0x494   : > { %v1422_v12 = vpop.xlane.xlu1 %1421 }
 0x495   : > { %v1423_v13 = vadd.f32 %v1422_v12, %v1419_v11 }
 0x497   : > { %3473 = vrcp.f32 %v1423_v13 }
 0x498   : > { %3475 = vpow2.f32 %v1669_v19 }
 0x4a1   : > { %v3474_v15 = vpop.eup %3473 }
 0x4a2   : > { %v1499_v16 = vmul.f32 %v3474_v15, %v1497_v14  ;;  %v3476_v20 = vpop.eup %3475  ;;  %v2320_v15 = vld [vmem:[#allocation3 + $0x18] sm:$0xff] }
 0x4a3   : > { %v1674_v21 = vmul.f32 0.0, %v3476_v20 }
 0x4a4   : > { %3235 = vmatmul.mubr.msk.f32.vlgmr.msra.gmra.mrb[14].mxu1 %vm729_vm2, %v1499_v16 }
 0x4a5   : > { %3249 = vmatpush3.xpose.msk.msra.mxu1 %vm729_vm2, %v1988_v17  ;;  %3250 = vmatprep.mubr.msk.f32.mxu1 %vm3576_vm0, %v3577_v6  ;;  %v1678_v22 = vadd.f32 %v1677_v9, %v1674_v21  ;;  %v2979_v9 = vld [vmem:[%s4193_s2 + $0x3] ss:$0 sm:$0xff] }
 0x4a6   : > { %3253 = vmatprep.subr.mxu1 %v3577_v6 }
 0x4a7   : > { %3477 = vrcp.f32 %v1678_v22 }
 0x4b1   : > { %v3478_v28 = vpop.eup %3477 }
 0x4d5   : > { %v1748_v25 = vpop.f32.mrb[12].mxu1 }
 0x4d6   : > { %v1752_v26 = vadd.f32 %v1748_v25, %v1674_v21  ;;  %v3226_v27 = vpop.f32.mrb[13].mxu1 }
 0x4d7   : > { %v2984_v27 = vld [vmem:[%s4198_s7 + $0x18] sm:$0xff] }
 0x4d8   : > { %v1754_v30 = vmul.f32 %v3478_v28, %v1752_v26 }
 0x4da   : > { %3230 = vmatmul.mubr.msk.f32.vlgmr.msra.gmra.mrb[14].mxu0 %vm729_vm2, %v1754_v30 }
 0x4db   : > { %3381 = vmatpush3.bf16.msra.mxu0 %v3380_v29  ;;  %3245 = vmatprep.mubr.msk.f32.mxu0 %vm3576_vm0, %v3577_v6 }
 0x4dc   : > { %3382 = vmatprep.subr.bf16.mxu0 %v3575_v3 }
 0x4df   : > { %3384 = vmatpush3.bf16.msra.mxu0 %v3383_v33 }
 0x4e0   : > { %3258 = vmatprep.subr.mxu0 %v3577_v6 }
 0x4e2   : > { %3246 = vmatmul.mubr.msk.f32.vlgmr.msra.gmra.mrb[16].mxu0 %vm574_vm1, %v3754_v10 }
 0x4e3   : > { %3260 = vmatprep.mubr.msk.f32.mxu0 %vm3576_vm0, %v3577_v6  ;;  %3259 = vmatpush3.msra.mxu0 %v2972_v59  ;;  %v2689_v59 = vld [vmem:[%s4204_s13 + $0x18] sm:$0xff] }
 0x4e4   : > { %3274 = vmatprep.subr.mxu0 %v3577_v6 }
 0x577   : > { %v1899_v34 = vpop.f32.mrb[14].mxu1 }
 0x578   : > { %v3236_v35 = vpop.f32.mrb[15].mxu1 }
 0x5ad   : > { %v1826_v36 = vpop.f32.mrb[14].mxu0 }
 0x5ae   : > { %v4011_v37 = vadd.f32 %v1899_v34, %v1826_v36  ;;  %v3231_v38 = vpop.f32.mrb[15].mxu0 }
 0x5b5   : > { %v1982_v40 = vpop.f32.mrb[16].mxu0 }
 0x5b6   : > { %v1983_v41 = vadd.f32 %v2967_v39, %v1982_v40  ;;  %v3247_v42 = vpop.f32.mrb[17].mxu0  ;;  %v2986_v40 = vld [vmem:[%s4199_s8] ss:$0 sm:$0xff] }
 0x5b8   : > { %v1986_v43 = vmul.f32 0.35355338, %v1983_v41 }
 0x5ba   : > { %3251 = vmatmul.mubr.msk.f32.vlgmr.msra.gmra.mrb[16].mxu1 %vm729_vm2, %v1986_v43 }
 0x5bb   : > { %3254 = vmatpush3.msra.mxu1 %v1990_v44  ;;  %3255 = vmatprep.mubr.msk.f32.mxu1 %vm3576_vm0, %v3577_v6 }
 0x5bc   : > { %3385 = vmatprep.subr.bf16.mxu1 %v3575_v3 }
 0x68d   : > { %v2063_v45 = vpop.f32.mrb[16].mxu1 }
 0x68e   : > { %v3252_v46 = vpop.f32.mrb[17].mxu1  ;;  %v2067_v47 = vsel %vm729_vm2, %v2063_v45, -inf }
 0x68f   : > { %2068 = vmax.xlane.f32.xlu0 %v2067_v47 }
 0x71c   : > { %v2069_v48 = vpop.xlane.xlu0 %2068 }
 0x71d   : > { %v2073_v49 = vsub.f32 %v2063_v45, %v2069_v48  ;;  %v2070_v60 = vsub.f32 -inf, %v2069_v48 }
 0x71f   : > { %v2074_v50 = vmul.f32 1.442695, %v2073_v49  ;;  %v2071_v61 = vmul.f32 1.442695, %v2070_v60 }
 0x721   : > { %3479 = vpow2.f32 %v2074_v50  ;;  %v2602_v50 = vld [vmem:[%s4202_s11 + $0x8] sm:$0xff] }
 0x722   : > { %3481 = vpow2.f32 %v2071_v61  ;;  %v2690_v61 = vld [vmem:[%s4204_s13 + $0x20] sm:$0xff] }
 0x72b   : > { %v3480_v56 = vpop.eup %3479 }
 0x72c   : > { %3256 = vmatmul.mubr.msk.f32.vlgmr.msra.gmra.mrb[18].mxu1 %vm729_vm2, %v3480_v56  ;;  %v2077_v57 = vsel %vm729_vm2, %v3480_v56, 0.0  ;;  %v3482_v62 = vpop.eup %3481  ;;  %v2687_v56 = vld [vmem:[%s4204_s13 + $0x8] sm:$0xff] }
 0x72d   : > { %3387 = vmatpush3.bf16.msra.mxu1 %v3386_v53  ;;  %2078 = vadd.xlane.f32.xlu1 %v2077_v57  ;;  %v2076_v0 = vmul.f32 0.0, %v3482_v62  ;;  %v2604_v53 = vld [vmem:[%s4202_s11 + $0x18] sm:$0xff]  ;;  %v2688_v57 = vld [vmem:[%s4204_s13 + $0x10] sm:$0xff]  ;;  %v2691_v62 = vld [vmem:[%s4204_s13 + $0x28] sm:$0xff] }
 0x72e   : > { %3388 = vmatprep.subr.bf16.mxu1 %v3575_v3  ;;  %3271 = vmatprep.mubr.msk.f32.mxu1 %vm3576_vm0, %v3577_v6  ;;  %v3395_v54 = vpack.c.bf16 %v2604_v53, %v2603_v52  ;;  %v3401_v60 = vpack.c.bf16 %v2689_v59, %v2688_v57 }
 0x731   : > { %3390 = vmatpush3.bf16.msra.mxu1 %v3389_v58  ;;  %v3398_v58 = vpack.c.bf16 %v2687_v56, %v2686_v55 }
 0x732   : > { %3284 = vmatprep.subr.mxu1 %v3577_v6 }
 0x734   : > { %3272 = vmatmul.mubr.msk.f32.vlgmr.msra.gmra.mrb[20].mxu1 %vm574_vm1, %v3754_v10 }
 0x735   : > { %3286 = vmatprep.mubr.msk.f32.mxu1 %vm3576_vm0, %v3577_v6  ;;  %3285 = vmatpush3.msra.mxu1 %v2984_v27 }
 0x736   : > { %3397 = vmatprep.subr.bf16.mxu1 %v3575_v3 }
 0x7ba   : > { %v2079_v63 = vpop.xlane.xlu1 %2078 }
 0x7bb   : > { %v2080_v1 = vadd.f32 %v2079_v63, %v2076_v0  ;;  %v3404_v63 = vpack.c.bf16 %v2691_v62, %v2690_v61 }
 0x7bd   : > { %3483 = vrcp.f32 %v2080_v1 }
 0x7c7   : > { %v3484_v5 = vpop.eup %3483 }
 0x7ff   : > { %v2150_v2 = vpop.f32.mrb[18].mxu1 }
 0x800   : > { %v2154_v10 = vadd.f32 %v2150_v2, %v2076_v0  ;;  %v3257_v4 = vpop.f32.mrb[19].mxu1 }
 0x801   : > { %v2987_v4 = vld [vmem:[%s4200_s9] ss:$0 sm:$0xff] }
 0x802   : > { %v2156_v7 = vmul.f32 %v3484_v5, %v2154_v10 }
 0x804   : > { %3261 = vmatmul.mubr.msk.f32.vlgmr.msra.gmra.mrb[18].mxu0 %vm729_vm2, %v2156_v7  ;;  %v2988_v7 = vld [vmem:[%s4201_s10] ss:$0 sm:$0xff] }
 0x805   : > { %3275 = vmatpush3.xpose.msk.msra.mxu0 %vm729_vm2, %v2318_v8  ;;  %3276 = vmatprep.mubr.msk.f32.mxu0 %vm3576_vm0, %v3577_v6 }
 0x806   : > { %3279 = vmatprep.subr.mxu0 %v3577_v6 }
 0x807   : > { %v2312_v11 = vpop.f32.mrb[20].mxu1 }
 0x808   : > { %v2313_v12 = vadd.f32 %v2979_v9, %v2312_v11  ;;  %v3273_v13 = vpop.f32.mrb[21].mxu1  ;;  %v2693_v11 = vld [vmem:[%s4204_s13 + $0x38] sm:$0xff] }
 0x809   : > { %v2989_v13 = vld [vmem:[%s4203_s12] ss:$0 sm:$0xff] }
 0x80a   : > { %v2316_v14 = vmul.f32 0.35355338, %v2313_v12 }
 0x80c   : > { %3277 = vmatmul.mubr.msk.f32.vlgmr.msra.gmra.mrb[20].mxu0 %vm729_vm2, %v2316_v14 }
 0x80d   : > { %3280 = vmatpush3.msra.mxu0 %v2320_v15  ;;  %3281 = vmatprep.mubr.msk.f32.mxu0 %vm3576_vm0, %v3577_v6 }
 0x80e   : > { %3391 = vmatprep.subr.bf16.mxu0 %v3575_v3 }
 0x8d7   : > { %v2228_v16 = vpop.f32.mrb[18].mxu0 }
 0x8d8   : > { %v2232_v17 = vadd.f32 %v2228_v16, %v4011_v37  ;;  %v3262_v18 = vpop.f32.mrb[19].mxu0 }
 0x8d9   : > { %v2991_v18 = vld [vmem:[%s4205_s14] ss:$0 sm:$0xff] }
 0x8df   : > { %v2393_v19 = vpop.f32.mrb[20].mxu0 }
 0x8e0   : > { %v3278_v20 = vpop.f32.mrb[21].mxu0  ;;  %v2397_v21 = vsel %vm729_vm2, %v2393_v19, -inf }
 0x8e1   : > { %2398 = vmax.xlane.f32.xlu0 %v2397_v21 }
 0x96e   : > { %v2399_v22 = vpop.xlane.xlu0 %2398 }
 0x96f   : > { %v2403_v23 = vsub.f32 %v2393_v19, %v2399_v22  ;;  %v2400_v28 = vsub.f32 -inf, %v2399_v22 }
 0x971   : > { %v2404_v24 = vmul.f32 1.442695, %v2403_v23  ;;  %v2401_v29 = vmul.f32 1.442695, %v2400_v28 }
 0x973   : > { %3485 = vpow2.f32 %v2404_v24 }
 0x974   : > { %3487 = vpow2.f32 %v2401_v29 }
 0x97d   : > { %v3486_v25 = vpop.eup %3485 }
 0x97e   : > { %3282 = vmatmul.mubr.msk.f32.vlgmr.msra.gmra.mrb[22].mxu0 %vm729_vm2, %v3486_v25  ;;  %v2407_v26 = vsel %vm729_vm2, %v3486_v25, 0.0  ;;  %v3488_v30 = vpop.eup %3487 }
 0x97f   : > { %2408 = vadd.xlane.f32.xlu1 %v2407_v26  ;;  %3297 = vmatprep.mubr.msk.f32.mxu0 %vm3576_vm0, %v3577_v6  ;;  %v2406_v32 = vmul.f32 0.0, %v3488_v30 }
 0xa0c   : > { %v2409_v31 = vpop.xlane.xlu1 %2408 }
 0xa0d   : > { %v2410_v33 = vadd.f32 %v2409_v31, %v2406_v32 }
 0xa0f   : > { %3489 = vrcp.f32 %v2410_v33  ;;  %v2993_v33 = vld [vmem:[%s4206_s15] ss:$0 sm:$0xff] }
 0xa19   : > { %v3490_v37 = vpop.eup %3489 }
 0xa51   : > { %v2480_v34 = vpop.f32.mrb[22].mxu0 }
 0xa52   : > { %v2484_v35 = vadd.f32 %v2480_v34, %v2406_v32  ;;  %v3283_v36 = vpop.f32.mrb[23].mxu0 }
 0xa54   : > { %v2486_v38 = vmul.f32 %v3490_v37, %v2484_v35  ;;  %v2994_v35 = vld [vmem:[%s4207_s16] ss:$0 sm:$0xff] }
 0xa56   : > { %3287 = vmatmul.mubr.msk.f32.vlgmr.msra.gmra.mrb[22].mxu1 %vm729_vm2, %v2486_v38 }
 0xa57   : > { %3316 = vmatprep.mubr.msk.f32.mxu1 %vm3576_vm0, %v3577_v6  ;;  %v2601_v6 = vld [vmem:[%s4202_s11] sm:$0xff]  ;;  %3399 = vmatpush3.bf16.msra.mxu1 %v3398_v58 }
 0xa58   : > { %v3392_v51 = vpack.c.bf16 %v2602_v50, %v2601_v6  ;;  %3400 = vmatprep.subr.bf16.mxu1 %v3575_v3 }
 0xa5a   : > { %3393 = vmatpush3.bf16.msra.mxu0 %v3392_v51 }
 0xa5b   : > { %3394 = vmatprep.subr.bf16.mxu0 %v3575_v3  ;;  %3402 = vmatpush3.bf16.msra.mxu1 %v3401_v60 }
 0xa5c   : > { %3403 = vmatprep.subr.bf16.mxu1 %v3575_v3 }
 0xa5e   : > { %3396 = vmatpush3.bf16.msra.mxu0 %v3395_v54 }
 0xa5f   : > { %3405 = vmatpush3.bf16.msra.mxu1 %v3404_v63 }
 0xa60   : > { %3406 = vmatprep.subr.bf16.mxu1 %v3575_v3  ;;  %v2692_v3 = vld [vmem:[%s4204_s13 + $0x30] sm:$0xff] }
 0xa61   : > { %v3407_v12 = vpack.c.bf16 %v2693_v11, %v2692_v3 }
 0xa63   : > { %3408 = vmatpush3.bf16.msra.mxu1 %v3407_v12 }
 0xb29   : > { %v2558_v39 = vpop.f32.mrb[22].mxu1 }
 0xb2a   : > { %v2562_v41 = vadd.f32 %v2558_v39, %v2232_v17  ;;  %v3288_v42 = vpop.f32.mrb[23].mxu1 }
 0xb2c   : > { %v2570_v43 = vadd.f32 %v2986_v40, %v2562_v41 }
 0xb2e   : > { %v2573_v44 = vsel %vm574_vm1, %v2570_v43, 0.0 }
 0xb2f   : > { %2574 = vadd.xlane.f32.xlu0 %v2573_v44 }
 0xbbc   : > { %v2575_v45 = vpop.xlane.xlu0 %2574 }
 0xbbd   : > { %v2577_v46 = vmul.f32 0.03125, %v2575_v45 }
 0xbbf   : > { %v2578_v47 = vsub.f32 %v2570_v43, %v2577_v46 }
 0xbc1   : > { %v2579_v48 = vmul.f32 %v2578_v47, %v2578_v47 }
 0xbc3   : > { %v2580_v49 = vsel %vm574_vm1, %v2579_v48, 0.0 }
 0xbc4   : > { %2581 = vadd.xlane.f32.xlu1 %v2580_v49 }
 0xc51   : > { %v2582_v0 = vpop.xlane.xlu1 %2581 }
 0xc52   : > { %v2583_v1 = vmul.f32 0.03125, %v2582_v0 }
 0xc54   : > { %v2584_v2 = vadd.f32 1e-05, %v2583_v1 }
 0xc56   : > { %3491 = vrsqrt.f32 %v2584_v2 }
 0xc60   : > { %v3492_v10 = vpop.eup %3491 }
 0xc61   : > { %v2586_v5 = vmul.f32 %v3492_v10, %v2578_v47 }
 0xc63   : > { %v2593_v8 = vmul.f32 %v2987_v4, %v2586_v5 }
 0xc65   : > { %v2600_v9 = vadd.f32 %v2988_v7, %v2593_v8 }
 0xc67   : > { %3298 = vmatmul.mubr.msk.f32.vlgmr.msra.gmra.mrb[24].mxu0 %vm574_vm1, %v2600_v9 }
 0xd3a   : > { %v2681_v14 = vpop.f32.mrb[24].mxu0 }
 0xd3b   : > { %v2682_v15 = vadd.f32 %v2989_v13, %v2681_v14  ;;  %v3299_v16 = vpop.f32.mrb[25].mxu0 }
 0xd3d   : > { %v2685_v17 = vmax.f32 %v2682_v15, 0.0 }
 0xd3f   : > { %3317 = vmatmul.mubr.msk.f32.vlgmr.msra.gmra.mrb[24].mxu1 %vm2701_vm3, %v2685_v17 }
 0xe12   : > { %v2771_v19 = vpop.f32.mrb[24].mxu1 }
 0xe13   : > { %v2772_v20 = vadd.f32 %v2991_v18, %v2771_v19  ;;  %v3318_v21 = vpop.f32.mrb[25].mxu1 }
 0xe15   : > { %v2775_v22 = vadd.f32 %v2772_v20, %v2600_v9 }
 0xe17   : > { %v2778_v23 = vsel %vm574_vm1, %v2775_v22, 0.0 }
 0xe18   : > { %2779 = vadd.xlane.f32.xlu0 %v2778_v23 }
 0xea5   : > { %v2780_v24 = vpop.xlane.xlu0 %2779 }
 0xea6   : > { %v2781_v25 = vmul.f32 0.03125, %v2780_v24 }
 0xea8   : > { %v2782_v26 = vsub.f32 %v2775_v22, %v2781_v25 }
 0xeaa   : > { %v2783_v27 = vmul.f32 %v2782_v26, %v2782_v26 }
 0xeac   : > { %v2784_v28 = vsel %vm574_vm1, %v2783_v27, 0.0 }
 0xead   : > { %2785 = vadd.xlane.f32.xlu1 %v2784_v28 }
 0xf3a   : > { %v2786_v29 = vpop.xlane.xlu1 %2785 }
 0xf3b   : > { %v2787_v30 = vmul.f32 0.03125, %v2786_v29 }
 0xf3d   : > { %v2788_v31 = vadd.f32 1e-05, %v2787_v30 }
 0xf3f   : > { %3493 = vrsqrt.f32 %v2788_v31 }
 0xf49   : > { %v3494_v32 = vpop.eup %3493 }
 0xf4a   : > { %v2790_v34 = vmul.f32 %v3494_v32, %v2782_v26 }
 0xf4c   : > { %v2797_v36 = vmul.f32 %v2993_v33, %v2790_v34 }
 0xf4e   : > { %v2804_v37 = vadd.f32 %v2994_v35, %v2797_v36 }
 0xf50   : > { %2805 = vst.msk [vmem:[%s553_s18] sm:$0xff] %vm574_vm1, %v2804_v37 }
 0xf51   : > { %3508 = shalt.err (!%p3505_p5)
}
 0xf52   : > { %s3509_s29 = scalar_lea.hbm %s4143_s0, 128  ;;  %s3513_s18 = scalar_lea.hbm %s4208_s17, 256 }
 0xf53   : > { %p3510_p6 = scmp.ne.s32.totalorder %s4143_s0, %s3509_s29  ;;  %p3514_p10 = scmp.lt.u32.totalorder %s4143_s0, %s4208_s17 }
 0xf54   : > { %p3515_p11 = scmp.lt.u32.totalorder %s3513_s18, %s3509_s29  ;;  %p3517_p13 = scmp.lt.u32.totalorder %s3509_s29, %s4143_s0 }
 0xf55   : > { %p3511_p7 = pnand %p3510_p6, %p3709_p4 }
 0xf56   : > { %p3516_p12 = por %p3515_p11, %p3514_p10 }
 0xf57   : > { %p3512_p9 = pneg %p3511_p7 }
 0xf58   : > { %p3518_p0 = por %p3517_p13, %p3516_p12 }
 0xf5a   : > { %p3519_p1 = pnand %p3518_p0, %p3512_p9 }
 0xf5c   : > { %3522 = shalt.err (!%p3519_p1)
}
 0xf5d   : > { %3409 = dma.vmem_to_hbm [thread:$0]  (%p3709_p4), %s4145_s23, 128, %s4143_s0, %s2807_s24  }
 0xf5e PF: > { %s4231_s28 = sld [smem:[#allocation10_spill]]  ;;  %s4232_s27 = sld [smem:[#allocation7_spill]] }
 0xf64   : > { %p3415_p2 = scmp.ge.s32.totalorder %s4231_s28, 2  ;;  %s2833_s30 = sand.u32 1, %s4232_s27  }
 0xf65   : > { %s2834_s20 = scalar_lea.sflag [#allocation5], %s2833_s30 }
 0xf66   : > { %p3412_p3 = pnand %p3415_p2, %p3716_p8 }
 0xf68   : > { %3548 = dma.done.wait (!%p3412_p3), %s2834_s20, 128  }
 0xf69   : > { %3550 = vsyncadd (!%p3412_p3), %s2834_s20, 4294967168  ;;  %s30_s29 = sadd.s32 1, %s4231_s28   ;;  %s4234_s19 = sld [smem:[#allocation8_spill]] }
 0xf6a   : > { %p27_p5 = scmp.ge.s32.totalorder %s30_s29, 4   ;;  %s4235_s26 = sld [smem:[#allocation13_spill]] }
 0xf6b   : > { %s4236_s27 = sld [smem:[#allocation9_spill]]  ;;  %s4237_s28 = sld [smem:[#allocation11_spill]] }
 0xf6c   : > { %s4238_s24 = smov %s3557_s25  ;;  %29 = sbr.rel (!%p27_p5) target bundleno = 7 (0x7), region = 161 }
 0xf6f   : > { %s4239_s25 = smov %s4234_s19 }
 0xf73   :  { %2839 = vsyncpa [#allocation5], 1 }
 0xf74   :  { %2841 = vsyncpa [#allocation5 + $0x1], 1 }

// kernel: transformer_encoder.2
= control target key start
LH: loop header
LB: loop body
LE: loop exit
PB: predicated region body
PF: predicated region fallthrough
CT: control target
= control target key end

     0   :  { %s3573_s24 = smov 0   ;;  %s3575_s25 = smov 0   ;;  %s4023_s0 = inlined_call_operand.vmem [shape: f32[2,8,32], index: 0, kind: input, shape index: {}]   ;;  %s4024_s1 = inlined_call_operand.vmem [shape: f32[4,32,8], index: 1, kind: input, shape index: {}]   ;;  %s4025_s2 = inlined_call_operand.vmem [shape: f32[4,1,8], index: 2, kind: input, shape index: {}]   ;;  %s4026_s3 = inlined_call_operand.vmem [shape: f32[4,32,8], index: 3, kind: input, shape index: {}]   ;;  %s4027_s4 = inlined_call_operand.vmem [shape: f32[4,1,8], index: 4, kind: input, shape index: {}]   ;;  %s4028_s5 = inlined_call_operand.vmem [shape: f32[4,32,8], index: 5, kind: input, shape index: {}]   ;;  %s4029_s6 = inlined_call_operand.vmem [shape: f32[4,1,8], index: 6, kind: input, shape index: {}]   ;;  %s4030_s7 = inlined_call_operand.vmem [shape: f32[4,8,32], index: 7, kind: input, shape index: {}]   ;;  %s4031_s8 = inlined_call_operand.vmem [shape: f32[1,32], index: 8, kind: input, shape index: {}]   ;;  %s4032_s9 = inlined_call_operand.vmem [shape: f32[1,32], index: 9, kind: input, shape index: {}]   ;;  %s4033_s10 = inlined_call_operand.vmem [shape: f32[1,32], index: 10, kind: input, shape index: {}]   ;;  %s4034_s11 = inlined_call_operand.vmem [shape: f32[32,64], index: 11, kind: input, shape index: {}]   ;;  %s4035_s12 = inlined_call_operand.vmem [shape: f32[1,64], index: 12, kind: input, shape index: {}]   ;;  %s4036_s13 = inlined_call_operand.vmem [shape: f32[64,32], index: 13, kind: input, shape index: {}]   ;;  %s4037_s14 = inlined_call_operand.vmem [shape: f32[1,32], index: 14, kind: input, shape index: {}]   ;;  %s4038_s15 = inlined_call_operand.vmem [shape: f32[1,32], index: 15, kind: input, shape index: {}]   ;;  %s4039_s16 = inlined_call_operand.vmem [shape: f32[1,32], index: 16, kind: input, shape index: {}]   ;;  %s4040_s17 = inlined_call_operand.vmem [shape: f32[2,8,32], index: 17, kind: output, shape index: {}]  }
   0x1   :  { %4043 = sst [smem:[#allocation4_spill]] %s4023_s0  ;;  %s3577_s26 = smov 0  }
   0x2   :  { %4044 = sst [smem:[#allocation5_spill]] %s4024_s1 }
   0x3 LB: > { %s39_s27 = sadd.s32 1, %s3474_s25  ;;  %p2889_p0 = scmp.ge.s32.totalorder %s3478_s26, 1  ;;  %s3478_s26 = sphi %s3577_s26, %s27_s26   ;;  %s3474_s25 = sphi %s3575_s25, %s4049_s25   ;;  %s3470_s24 = sphi %s3573_s24, %s4048_s24  }
   0x4   : > { %p41_p1 = scmp.ge.s32.totalorder %s39_s27, 2  ;;  %p500_p2 = scmp.lt.s32.totalorder %s3478_s26, 3 }
   0x6   : > { %s4051_s27 = smov (%p41_p1, %s39_s27), 0  ;;  %p501_p3 = pnand %p2889_p0, %p500_p2 }
   0x7   : > { %v569_v0 = vld [vmem:[%s4026_s3] sm:$0xff] (!%p501_p3)  ;;  %v570_v1 = vld [vmem:[%s4026_s3 + $0x8] sm:$0xff] (!%p501_p3)  ;;  %v571_v2 = vld [vmem:[%s4026_s3 + $0x10] sm:$0xff] (!%p501_p3)  ;;  %v3480_v3 = vmov (!%p501_p3), 0.0|0.0   ;;  %vm3481_vm0 = vmmov (!%p501_p3), 0   ;;  %v3482_v6 = vmov (!%p501_p3), 0.0  }
   0x8   : > { %504 = sbr.rel (%p501_p3) target bundleno = 3906 (0xf42), region = 88  ;;  %3311 = vmatprep.subr.bf16.mxu0 (!%p501_p3), %v3480_v3  ;;  %v3312_v4 = vpack.c.bf16 (!%p501_p3), %v570_v1, %v569_v0  ;;  %v572_v5 = vld [vmem:[%s4026_s3 + $0x18] sm:$0xff] (!%p501_p3)  ;;  %3097 = vmatprep.mubr.msk.f32.mxu0 (!%p501_p3), %vm3481_vm0, %v3482_v6  ;;  %p553_p4 = scmp.lt.s32.totalorder (!%p501_p3), %s3470_s24, 1  ;;  %v2896_v8 = vld [vmem:[%s4026_s3 + $0x20] sm:$0xff] (!%p501_p3)  ;;  %v2897_v9 = vld [vmem:[%s4026_s3 + $0x28] sm:$0xff] (!%p501_p3)  ;;  %vm580_vm1 = vcmask (!%p501_p3), 261120  }
   0x9   : > { %3317 = vmatprep.subr.bf16.mxu1 (!%p501_p3), %v3480_v3  ;;  %3108 = vmatprep.mubr.msk.f32.mxu1 (!%p501_p3), %vm3481_vm0, %v3482_v6  ;;  %v3315_v7 = vpack.c.bf16 (!%p501_p3), %v572_v5, %v571_v2  ;;  %s4045_s18 = sld [smem:[#allocation4_spill]] (!%p501_p3)  ;;  %v3324_v11 = vpack.c.bf16 (!%p501_p3), %v2897_v9, %v2896_v8  ;;  %v2898_v12 = vld [vmem:[%s4026_s3 + $0x30] sm:$0xff] (!%p501_p3)  ;;  %v2899_v13 = vld [vmem:[%s4026_s3 + $0x38] sm:$0xff] (!%p501_p3)  ;;  %v2910_v15 = vld [vmem:[%s4026_s3 + $0x40] sm:$0xff] (!%p501_p3)  ;;  %s4046_s21 = sld [smem:[#allocation5_spill]] (!%p501_p3)  ;;  %vm735_vm2 = vcmask (!%p501_p3), 64512  }
   0xa   : > { %3313 = vmatpush3.bf16.msra.mxu0 (!%p501_p3), %v3312_v4  ;;  %v3327_v14 = vpack.c.bf16 (!%p501_p3), %v2899_v13, %v2898_v12  ;;  %v2911_v16 = vld [vmem:[%s4026_s3 + $0x48] sm:$0xff] (!%p501_p3)  ;;  %v2912_v18 = vld [vmem:[%s4026_s3 + $0x50] sm:$0xff] (!%p501_p3)  ;;  %v2913_v19 = vld [vmem:[%s4026_s3 + $0x58] sm:$0xff] (!%p501_p3)  ;;  %vm2707_vm3 = vcmask (!%p501_p3), 523264  }
   0xb   : > { %3314 = vmatprep.subr.bf16.mxu0 (!%p501_p3), %v3480_v3  ;;  %v3336_v17 = vpack.c.bf16 (!%p501_p3), %v2911_v16, %v2910_v15  ;;  %v3339_v20 = vpack.c.bf16 (!%p501_p3), %v2913_v19, %v2912_v18  ;;  %v2924_v21 = vld [vmem:[%s4026_s3 + $0x60] sm:$0xff] (!%p501_p3)  ;;  %v2925_v22 = vld [vmem:[%s4026_s3 + $0x68] sm:$0xff] (!%p501_p3)  ;;  %v2926_v24 = vld [vmem:[%s4026_s3 + $0x70] sm:$0xff] (!%p501_p3) }
   0xc   : > { %v3348_v23 = vpack.c.bf16 (!%p501_p3), %v2925_v22, %v2924_v21  ;;  %v2927_v25 = vld [vmem:[%s4026_s3 + $0x78] sm:$0xff] (!%p501_p3)  ;;  %v654_v33 = vld [vmem:[%s4028_s5] sm:$0xff] (!%p501_p3)  ;;  %v655_v34 = vld [vmem:[%s4028_s5 + $0x8] sm:$0xff] (!%p501_p3) }
   0xd   : > { %v3351_v26 = vpack.c.bf16 (!%p501_p3), %v2927_v25, %v2926_v24  ;;  %v656_v35 = vld [vmem:[%s4028_s5 + $0x10] sm:$0xff] (!%p501_p3)  ;;  %v3318_v36 = vpack.c.bf16 (!%p501_p3), %v655_v34, %v654_v33  ;;  %v657_v37 = vld [vmem:[%s4028_s5 + $0x18] sm:$0xff] (!%p501_p3)  ;;  %v2892_v39 = vld [vmem:[%s4027_s4] ss:$0 sm:$0xff] (!%p501_p3) }
   0xe   : > { %3316 = vmatpush3.bf16.msra.mxu0 (!%p501_p3), %v3315_v7  ;;  %v3321_v38 = vpack.c.bf16 (!%p501_p3), %v657_v37, %v656_v35  ;;  %v2901_v43 = vld [vmem:[%s4027_s4 + $0x1] ss:$0 sm:$0xff] (!%p501_p3)  ;;  %v2915_v48 = vld [vmem:[%s4027_s4 + $0x2] ss:$0 sm:$0xff] (!%p501_p3)  ;;  %v2929_v52 = vld [vmem:[%s4027_s4 + $0x3] ss:$0 sm:$0xff] (!%p501_p3) }
   0xf   : > { %s4053_s24 = smov (!%p553_p4, %s3470_s24), 1  ;;  %3323 = vmatprep.subr.bf16.mxu0 %v3480_v3  ;;  %v1251_v27 = vld [vmem:[%s4046_s21] sm:$0xff]  ;;  %v1252_v28 = vld [vmem:[%s4046_s21 + $0x8] sm:$0xff]  ;;  %v1253_v30 = vld [vmem:[%s4046_s21 + $0x10] sm:$0xff]  ;;  %3319 = vmatpush3.bf16.msra.mxu1 %v3318_v36 }
  0x10   : > { %s4042_s29 = sshll.u32 %s4053_s24, 3  ;;  %v3360_v29 = vpack.c.bf16 %v1252_v28, %v1251_v27  ;;  %v1254_v31 = vld [vmem:[%s4046_s21 + $0x18] sm:$0xff]  ;;  %3320 = vmatprep.subr.bf16.mxu1 %v3480_v3  ;;  %v2938_v56 = vld [vmem:[%s4025_s2] ss:$0 sm:$0xff]  ;;  %v2944_v58 = vld [vmem:[%s4046_s21 + $0x28] sm:$0xff]  ;;  %s4047_s0 = sshll.u32 %s4053_s24, 3 }
  0x11   : > { %s556_s19 = scalar_lea.vmem %s4045_s18, %s4042_s29  ;;  %v3363_v32 = vpack.c.bf16 %v1254_v31, %v1253_v30  ;;  %v2943_v57 = vld [vmem:[%s4046_s21 + $0x20] sm:$0xff]  ;;  %v2945_v0 = vld [vmem:[%s4046_s21 + $0x30] sm:$0xff]  ;;  %v2946_v1 = vld [vmem:[%s4046_s21 + $0x38] sm:$0xff] }
  0x12   : > { %v3624_v10 = vld [vmem:[%s556_s19] sm:$0xff]  ;;  %v3366_v62 = vpack.c.bf16 %v2944_v58, %v2943_v57  ;;  %v3369_v2 = vpack.c.bf16 %v2946_v1, %v2945_v0  ;;  %v2904_v5 = vld [vmem:[%s4028_s5 + $0x28] sm:$0xff]  ;;  %v2905_v7 = vld [vmem:[%s4028_s5 + $0x30] sm:$0xff]  ;;  %s563_s19 = scalar_lea.vmem %s4040_s17, %s4047_s0 }
  0x13   : > { %3098 = vmatmul.mubr.msk.f32.vlgmr.msra.gmra.mrb[0].mxu0 %vm580_vm1, %v3624_v10  ;;  %3322 = vmatpush3.bf16.msra.mxu1 %v3321_v38  ;;  %v2903_v4 = vld [vmem:[%s4028_s5 + $0x20] sm:$0xff]  ;;  %v2906_v9 = vld [vmem:[%s4028_s5 + $0x38] sm:$0xff]  ;;  %v2918_v13 = vld [vmem:[%s4028_s5 + $0x48] sm:$0xff] }
  0x14   : > { %3325 = vmatpush3.bf16.msra.mxu0 %v3324_v11  ;;  %3119 = vmatprep.mubr.msk.f32.mxu0 %vm3481_vm0, %v3482_v6  ;;  %v3330_v8 = vpack.c.bf16 %v2904_v5, %v2903_v4  ;;  %v3333_v11 = vpack.c.bf16 %v2906_v9, %v2905_v7  ;;  %v2917_v12 = vld [vmem:[%s4028_s5 + $0x40] sm:$0xff]  ;;  %v2920_v18 = vld [vmem:[%s4028_s5 + $0x58] sm:$0xff]  ;;  %v2933_v28 = vld [vmem:[%s4028_s5 + $0x70] sm:$0xff] }
  0x15   : > { %3326 = vmatprep.subr.bf16.mxu0 %v3480_v3  ;;  %3329 = vmatprep.subr.bf16.mxu1 %v3480_v3  ;;  %v3342_v15 = vpack.c.bf16 %v2918_v13, %v2917_v12  ;;  %v2931_v25 = vld [vmem:[%s4028_s5 + $0x60] sm:$0xff]  ;;  %v2953_v4 = vld [vmem:[%s4030_s7 + $0x8] sm:$0xff] }
  0x16   : > { %3109 = vmatmul.mubr.msk.f32.vlgmr.msra.gmra.mrb[0].mxu1 %vm580_vm1, %v3624_v10  ;;  %v2908_v34 = vld [vmem:[%s4029_s6 + $0x1] ss:$0 sm:$0xff]  ;;  %v2922_v38 = vld [vmem:[%s4029_s6 + $0x2] ss:$0 sm:$0xff] }
  0x17   : > { %3130 = vmatprep.mubr.msk.f32.mxu1 %vm3481_vm0, %v3482_v6  ;;  %3331 = vmatpush3.bf16.msra.mxu1 %v3330_v8 }
  0x18   : > { %3328 = vmatpush3.bf16.msra.mxu0 %v3327_v14  ;;  %3332 = vmatprep.subr.bf16.mxu1 %v3480_v3  ;;  %v2894_v14 = vld [vmem:[%s4029_s6] ss:$0 sm:$0xff] }
  0x19   : > { %3335 = vmatprep.subr.bf16.mxu0 %v3480_v3 }
  0x1b   : > { %3120 = vmatmul.mubr.msk.f32.vlgmr.msra.gmra.mrb[2].mxu0 %vm580_vm1, %v3624_v10  ;;  %3334 = vmatpush3.bf16.msra.mxu1 %v3333_v11 }
  0x1c   : > { %3337 = vmatpush3.bf16.msra.mxu0 %v3336_v17  ;;  %3141 = vmatprep.mubr.msk.f32.mxu0 %vm3481_vm0, %v3482_v6  ;;  %v2919_v17 = vld [vmem:[%s4028_s5 + $0x50] sm:$0xff] }
  0x1d   : > { %3338 = vmatprep.subr.bf16.mxu0 %v3480_v3  ;;  %3341 = vmatprep.subr.bf16.mxu1 %v3480_v3  ;;  %v3345_v21 = vpack.c.bf16 %v2920_v18, %v2919_v17 }
  0x1e   : > { %3131 = vmatmul.mubr.msk.f32.vlgmr.msra.gmra.mrb[2].mxu1 %vm580_vm1, %v3624_v10 }
  0x1f   : > { %3343 = vmatpush3.bf16.msra.mxu1 %v3342_v15  ;;  %3152 = vmatprep.mubr.msk.f32.mxu1 %vm3481_vm0, %v3482_v6 }
  0x20   : > { %3340 = vmatpush3.bf16.msra.mxu0 %v3339_v20  ;;  %3344 = vmatprep.subr.bf16.mxu1 %v3480_v3 }
  0x21   : > { %3347 = vmatprep.subr.bf16.mxu0 %v3480_v3 }
  0x23   : > { %3142 = vmatmul.mubr.msk.f32.vlgmr.msra.gmra.mrb[4].mxu0 %vm580_vm1, %v3624_v10  ;;  %3346 = vmatpush3.bf16.msra.mxu1 %v3345_v21 }
  0x24   : > { %3349 = vmatpush3.bf16.msra.mxu0 %v3348_v23  ;;  %3163 = vmatprep.mubr.msk.f32.mxu0 %vm3481_vm0, %v3482_v6 }
  0x25   : > { %3350 = vmatprep.subr.bf16.mxu0 %v3480_v3  ;;  %3353 = vmatprep.subr.bf16.mxu1 %v3480_v3 }
  0x26   : > { %3153 = vmatmul.mubr.msk.f32.vlgmr.msra.gmra.mrb[4].mxu1 %vm580_vm1, %v3624_v10 }
  0x27   : > { %3174 = vmatprep.mubr.msk.f32.mxu1 %vm3481_vm0, %v3482_v6 }
  0x28   : > { %3352 = vmatpush3.bf16.msra.mxu0 %v3351_v26  ;;  %v2932_v26 = vld [vmem:[%s4028_s5 + $0x68] sm:$0xff] }
  0x29   : > { %3359 = vmatprep.subr.bf16.mxu0 %v3480_v3  ;;  %v3354_v27 = vpack.c.bf16 %v2932_v26, %v2931_v25 }
  0x2b   : > { %3164 = vmatmul.mubr.msk.f32.vlgmr.msra.gmra.mrb[6].mxu0 %vm580_vm1, %v3624_v10  ;;  %3355 = vmatpush3.bf16.msra.mxu1 %v3354_v27 }
  0x2c   : > { %3361 = vmatpush3.bf16.msra.mxu0 %v3360_v29  ;;  %3185 = vmatprep.mubr.msk.f32.mxu0 %vm3481_vm0, %v3482_v6  ;;  %v2934_v29 = vld [vmem:[%s4028_s5 + $0x78] sm:$0xff] }
  0x2d   : > { %3362 = vmatprep.subr.bf16.mxu0 %v3480_v3  ;;  %3356 = vmatprep.subr.bf16.mxu1 %v3480_v3  ;;  %v3357_v30 = vpack.c.bf16 %v2934_v29, %v2933_v28 }
  0x2f   : > { %3358 = vmatpush3.bf16.msra.mxu1 %v3357_v30 }
  0x30   : > { %3364 = vmatpush3.bf16.msra.mxu0 %v3363_v32  ;;  %3193 = vmatprep.subr.mxu1 %v3482_v6 }
  0x31   : > { %3188 = vmatprep.subr.mxu0 %v3482_v6 }
  0x32   : > { %3175 = vmatmul.mubr.msk.f32.vlgmr.msra.gmra.mrb[6].mxu1 %vm580_vm1, %v3624_v10 }
  0x33   : > { %3186 = vmatmul.mubr.msk.f32.vlgmr.msra.gmra.mrb[8].mxu0 %vm580_vm1, %v3624_v10  ;;  %3195 = vmatprep.mubr.msk.f32.mxu1 %vm3481_vm0, %v3482_v6 }
  0x34   : > { %3190 = vmatprep.mubr.msk.f32.mxu0 %vm3481_vm0, %v3482_v6 }
  0xe6   : > { %v650_v40 = vpop.f32.mrb[0].mxu0 }
  0xe7   : > { %v651_v41 = vadd.f32 %v2892_v39, %v650_v40  ;;  %v3099_v42 = vpop.f32.mrb[1].mxu0 }
  0xe9   : > { %736 = vst.msk [vmem:[#allocation2] sm:$0xff] %vm735_vm2, %v651_v41  ;;  %v731_v16 = vpop.f32.mrb[0].mxu1 }
  0xea   : > { %v732_v19 = vadd.f32 %v2894_v14, %v731_v16  ;;  %v3110_v20 = vpop.f32.mrb[1].mxu1 }
  0xec   : > { %737 = vst.msk [vmem:[#allocation3] sm:$0xff] %vm735_vm2, %v732_v19 }
  0xee   : > { %v817_v44 = vpop.f32.mrb[2].mxu0 }
  0xef   : > { %v818_v45 = vadd.f32 %v2901_v43, %v817_v44  ;;  %v3121_v46 = vpop.f32.mrb[3].mxu0 }
  0xf0   : > { %v1337_v47 = vld [vmem:[#allocation2] sm:$0xff] }
  0xf1   : > { %905 = vst.msk [vmem:[#allocation2 + $0x8] sm:$0xff] %vm735_vm2, %v818_v45  ;;  %3189 = vmatpush3.xpose.msk.msra.mxu0 %vm735_vm2, %v1337_v47  ;;  %v900_v35 = vpop.f32.mrb[2].mxu1  ;;  %v2948_v45 = vld [vmem:[%s4025_s2 + $0x1] ss:$0 sm:$0xff] }
  0xf2   : > { %3365 = vmatprep.subr.bf16.mxu0 %v3480_v3  ;;  %v901_v36 = vadd.f32 %v2908_v34, %v900_v35  ;;  %v3132_v37 = vpop.f32.mrb[3].mxu1 }
  0xf3   : > { %v1338_v32 = vld [vmem:[#allocation3] sm:$0xff] }
  0xf4   : > { %3194 = vmatpush3.msra.mxu1 %v1338_v32  ;;  %907 = vst.msk [vmem:[#allocation3 + $0x8] sm:$0xff] %vm735_vm2, %v901_v36  ;;  %v2959_v32 = vld [vmem:[%s4046_s21 + $0x58] sm:$0xff] }
  0xf5   : > { %3209 = vmatprep.subr.mxu1 %v3482_v6 }
  0xf6   : > { %v987_v49 = vpop.f32.mrb[4].mxu0 }
  0xf7   : > { %v988_v50 = vadd.f32 %v2915_v48, %v987_v49  ;;  %v3143_v51 = vpop.f32.mrb[5].mxu0 }
  0xf8   : > { %v1592_v49 = vld [vmem:[#allocation2 + $0x8] sm:$0xff]  ;;  %v2936_v51 = vld [vmem:[%s4029_s6 + $0x3] ss:$0 sm:$0xff] }
  0xf9   : > { %1075 = vst.msk [vmem:[#allocation2 + $0x10] sm:$0xff] %vm735_vm2, %v988_v50  ;;  %v1070_v39 = vpop.f32.mrb[4].mxu1 }
  0xfa   : > { %v1071_v40 = vadd.f32 %v2922_v38, %v1070_v39  ;;  %v3154_v41 = vpop.f32.mrb[5].mxu1  ;;  %v2961_v39 = vld [vmem:[%s4025_s2 + $0x2] ss:$0 sm:$0xff] }
  0xfb   : > { %v1594_v50 = vld [vmem:[#allocation3 + $0x8] sm:$0xff] }
  0xfc   : > { %1077 = vst.msk [vmem:[#allocation3 + $0x10] sm:$0xff] %vm735_vm2, %v1071_v40 }
  0xfe   : > { %v1157_v53 = vpop.f32.mrb[6].mxu0 }
  0xff   : > { %v1158_v54 = vadd.f32 %v2929_v52, %v1157_v53  ;;  %v3165_v55 = vpop.f32.mrb[7].mxu0 }
 0x100   : > { %v1994_v17 = vld [vmem:[#allocation2 + $0x10] sm:$0xff] }
 0x101   : > { %1245 = vst.msk [vmem:[#allocation2 + $0x18] sm:$0xff] %vm735_vm2, %v1158_v54 }
 0x105   : > { %v1240_v52 = vpop.f32.mrb[6].mxu1 }
 0x106   : > { %v1332_v59 = vpop.f32.mrb[8].mxu0  ;;  %v1241_v53 = vadd.f32 %v2936_v51, %v1240_v52  ;;  %v3176_v54 = vpop.f32.mrb[7].mxu1  ;;  %v2968_v51 = vld [vmem:[%s4046_s21 + $0x60] sm:$0xff]  ;;  %v2969_v52 = vld [vmem:[%s4046_s21 + $0x68] sm:$0xff] }
 0x107   : > { %v1333_v60 = vadd.f32 %v2938_v56, %v1332_v59  ;;  %v3187_v61 = vpop.f32.mrb[9].mxu0  ;;  %v2970_v54 = vld [vmem:[%s4046_s21 + $0x70] sm:$0xff] }
 0x108   : > { %1247 = vst.msk [vmem:[#allocation3 + $0x18] sm:$0xff] %vm735_vm2, %v1241_v53  ;;  %v3378_v53 = vpack.c.bf16 %v2969_v52, %v2968_v51  ;;  %v2609_v52 = vld [vmem:[%s4034_s11 + $0x10] sm:$0xff] }
 0x109   : > { %v1336_v63 = vmul.f32 0.35355338, %v1333_v60 }
 0x10b   : > { %3191 = vmatmul.mubr.msk.f32.vlgmr.msra.gmra.mrb[10].mxu0 %vm735_vm2, %v1336_v63 }
 0x10c   : > { %3367 = vmatpush3.bf16.msra.mxu0 %v3366_v62  ;;  %3206 = vmatprep.mubr.msk.f32.mxu0 %vm3481_vm0, %v3482_v6 }
 0x10d   : > { %3368 = vmatprep.subr.bf16.mxu0 %v3480_v3 }
 0x110   : > { %3370 = vmatpush3.bf16.msra.mxu0 %v3369_v2  ;;  %v1506_v2 = vld [vmem:[%s4030_s7] sm:$0xff] }
 0x111   : > { %3219 = vmatprep.subr.mxu0 %v3482_v6 }
 0x113   : > { %3207 = vmatmul.mubr.msk.f32.vlgmr.msra.gmra.mrb[12].mxu0 %vm580_vm1, %v3624_v10 }
 0x114   : > { %3221 = vmatprep.mubr.msk.f32.mxu0 %vm3481_vm0, %v3482_v6  ;;  %3220 = vmatpush3.msra.mxu0 %v2953_v4 }
 0x115   : > { %3371 = vmatprep.subr.bf16.mxu0 %v3480_v3 }
 0x1de   : > { %v1412_v22 = vpop.f32.mrb[10].mxu0 }
 0x1df   : > { %v3192_v23 = vpop.f32.mrb[11].mxu0  ;;  %v1416_v24 = vsel %vm735_vm2, %v1412_v22, -inf }
 0x1e0   : > { %1417 = vmax.xlane.f32.xlu0 %v1416_v24  ;;  %v2956_v23 = vld [vmem:[%s4046_s21 + $0x40] sm:$0xff]  ;;  %v2957_v24 = vld [vmem:[%s4046_s21 + $0x48] sm:$0xff] }
 0x1e1   : > { %v3372_v29 = vpack.c.bf16 %v2957_v24, %v2956_v23 }
 0x1e6   : > { %v1586_v31 = vpop.f32.mrb[12].mxu0 }
 0x1e7   : > { %v3208_v33 = vpop.f32.mrb[13].mxu0  ;;  %v1587_v46 = vadd.f32 %v2948_v45, %v1586_v31  ;;  %v2958_v31 = vld [vmem:[%s4046_s21 + $0x50] sm:$0xff] }
 0x1e8   : > { %v3375_v33 = vpack.c.bf16 %v2959_v32, %v2958_v31 }
 0x1e9   : > { %v1590_v48 = vmul.f32 0.35355338, %v1587_v46 }
 0x26d   : > { %v1418_v42 = vpop.xlane.xlu0 %1417 }
 0x26e   : > { %v1422_v43 = vsub.f32 %v1412_v22, %v1418_v42  ;;  %v1419_v5 = vsub.f32 -inf, %v1418_v42 }
 0x270   : > { %v1423_v44 = vmul.f32 1.442695, %v1422_v43  ;;  %v1420_v7 = vmul.f32 1.442695, %v1419_v5 }
 0x272   : > { %3428 = vpow2.f32 %v1423_v44  ;;  %v1996_v44 = vld [vmem:[#allocation3 + $0x10] sm:$0xff] }
 0x27c   : > { %v3429_v47 = vpop.eup %3428 }
 0x27d   : > { %3196 = vmatmul.mubr.msk.f32.vlgmr.msra.gmra.mrb[8].mxu1 %vm735_vm2, %v3429_v47  ;;  %v1426_v1 = vsel %vm735_vm2, %v3429_v47, 0.0 }
 0x27e   : > { %3210 = vmatpush3.xpose.msk.msra.mxu1 %vm735_vm2, %v1592_v49  ;;  %3211 = vmatprep.mubr.msk.f32.mxu1 %vm3481_vm0, %v3482_v6 }
 0x27f   : > { %3214 = vmatprep.subr.mxu1 %v3482_v6 }
 0x281   : > { %3212 = vmatmul.mubr.msk.f32.vlgmr.msra.gmra.mrb[10].mxu1 %vm735_vm2, %v1590_v48 }
 0x282   : > { %3215 = vmatpush3.msra.mxu1 %v1594_v50  ;;  %3216 = vmatprep.mubr.msk.f32.mxu1 %vm3481_vm0, %v3482_v6 }
 0x283   : > { %3224 = vmatprep.subr.mxu1 %v3482_v6 }
 0x350   : > { %v1499_v55 = vpop.f32.mrb[8].mxu1 }
 0x351   : > { %v3197_v56 = vpop.f32.mrb[9].mxu1 }
 0x354   : > { %v1667_v57 = vpop.f32.mrb[10].mxu1 }
 0x355   : > { %v3213_v58 = vpop.f32.mrb[11].mxu1  ;;  %v1671_v59 = vsel %vm735_vm2, %v1667_v57, -inf }
 0x356   : > { %1672 = vmax.xlane.f32.xlu0 %v1671_v59  ;;  %v2966_v59 = vld [vmem:[%s4030_s7 + $0x10] sm:$0xff] }
 0x3e3   : > { %v1673_v60 = vpop.xlane.xlu0 %1672 }
 0x3e4   : > { %v1677_v61 = vsub.f32 %v1667_v57, %v1673_v60  ;;  %v1674_v18 = vsub.f32 -inf, %v1673_v60 }
 0x3e6   : > { %v1678_v62 = vmul.f32 1.442695, %v1677_v61  ;;  %v1675_v19 = vmul.f32 1.442695, %v1674_v18 }
 0x3e8   : > { %3430 = vpow2.f32 %v1678_v62 }
 0x3e9   : > { %3432 = vpow2.f32 %v1420_v7 }
 0x3f2   : > { %v3431_v63 = vpop.eup %3430 }
 0x3f3   : > { %3217 = vmatmul.mubr.msk.f32.vlgmr.msra.gmra.mrb[12].mxu1 %vm735_vm2, %v3431_v63  ;;  %v1681_v0 = vsel %vm735_vm2, %v3431_v63, 0.0  ;;  %v3433_v8 = vpop.eup %3432 }
 0x3f4   : > { %1682 = vadd.xlane.f32.xlu1 %v1681_v0  ;;  %3226 = vmatprep.mubr.msk.f32.mxu1 %vm3481_vm0, %v3482_v6  ;;  %v1425_v11 = vmul.f32 0.0, %v3433_v8  ;;  %v2324_v8 = vld [vmem:[#allocation2 + $0x18] sm:$0xff] }
 0x3f5   : > { %3225 = vmatpush3.msra.mxu1 %v1506_v2 }
 0x3f6   : > { %3240 = vmatprep.subr.mxu1 %v3482_v6  ;;  %v1503_v14 = vadd.f32 %v1499_v55, %v1425_v11  ;;  %v2971_v55 = vld [vmem:[%s4046_s21 + $0x78] sm:$0xff] }
 0x3f7   : > { %v3381_v58 = vpack.c.bf16 %v2971_v55, %v2970_v54  ;;  %v2692_v55 = vld [vmem:[%s4036_s13] sm:$0xff] }
 0x3f8   : > { %1427 = vadd.xlane.f32.xlu1 %v1426_v1 }
 0x481   : > { %v1683_v9 = vpop.xlane.xlu1 %1682 }
 0x485   : > { %v1428_v12 = vpop.xlane.xlu1 %1427 }
 0x486   : > { %v1429_v13 = vadd.f32 %v1428_v12, %v1425_v11 }
 0x488   : > { %3434 = vrcp.f32 %v1429_v13 }
 0x489   : > { %3436 = vpow2.f32 %v1675_v19 }
 0x492   : > { %v3435_v15 = vpop.eup %3434 }
 0x493   : > { %v1505_v16 = vmul.f32 %v3435_v15, %v1503_v14  ;;  %v3437_v20 = vpop.eup %3436  ;;  %v2326_v15 = vld [vmem:[#allocation3 + $0x18] sm:$0xff] }
 0x494   : > { %v1680_v21 = vmul.f32 0.0, %v3437_v20 }
 0x495   : > { %3227 = vmatmul.mubr.msk.f32.vlgmr.msra.gmra.mrb[14].mxu1 %vm735_vm2, %v1505_v16 }
 0x496   : > { %3241 = vmatpush3.xpose.msk.msra.mxu1 %vm735_vm2, %v1994_v17  ;;  %3242 = vmatprep.mubr.msk.f32.mxu1 %vm3481_vm0, %v3482_v6  ;;  %v1684_v22 = vadd.f32 %v1683_v9, %v1680_v21  ;;  %v2973_v9 = vld [vmem:[%s4025_s2 + $0x3] ss:$0 sm:$0xff] }
 0x497   : > { %3245 = vmatprep.subr.mxu1 %v3482_v6 }
 0x498   : > { %3438 = vrcp.f32 %v1684_v22 }
 0x4a2   : > { %v3439_v28 = vpop.eup %3438 }
 0x4c6   : > { %v1754_v25 = vpop.f32.mrb[12].mxu1 }
 0x4c7   : > { %v1758_v26 = vadd.f32 %v1754_v25, %v1680_v21  ;;  %v3218_v27 = vpop.f32.mrb[13].mxu1 }
 0x4c8   : > { %v2978_v27 = vld [vmem:[%s4030_s7 + $0x18] sm:$0xff] }
 0x4c9   : > { %v1760_v30 = vmul.f32 %v3439_v28, %v1758_v26 }
 0x4cb   : > { %3222 = vmatmul.mubr.msk.f32.vlgmr.msra.gmra.mrb[14].mxu0 %vm735_vm2, %v1760_v30 }
 0x4cc   : > { %3373 = vmatpush3.bf16.msra.mxu0 %v3372_v29  ;;  %3237 = vmatprep.mubr.msk.f32.mxu0 %vm3481_vm0, %v3482_v6 }
 0x4cd   : > { %3374 = vmatprep.subr.bf16.mxu0 %v3480_v3 }
 0x4d0   : > { %3376 = vmatpush3.bf16.msra.mxu0 %v3375_v33 }
 0x4d1   : > { %3250 = vmatprep.subr.mxu0 %v3482_v6 }
 0x4d3   : > { %3238 = vmatmul.mubr.msk.f32.vlgmr.msra.gmra.mrb[16].mxu0 %vm580_vm1, %v3624_v10 }
 0x4d4   : > { %3252 = vmatprep.mubr.msk.f32.mxu0 %vm3481_vm0, %v3482_v6  ;;  %3251 = vmatpush3.msra.mxu0 %v2966_v59  ;;  %v2695_v59 = vld [vmem:[%s4036_s13 + $0x18] sm:$0xff] }
 0x4d5   : > { %3266 = vmatprep.subr.mxu0 %v3482_v6 }
 0x568   : > { %v1905_v34 = vpop.f32.mrb[14].mxu1 }
 0x569   : > { %v3228_v35 = vpop.f32.mrb[15].mxu1 }
 0x59e   : > { %v1832_v36 = vpop.f32.mrb[14].mxu0 }
 0x59f   : > { %v3881_v37 = vadd.f32 %v1905_v34, %v1832_v36  ;;  %v3223_v38 = vpop.f32.mrb[15].mxu0 }
 0x5a6   : > { %v1988_v40 = vpop.f32.mrb[16].mxu0 }
 0x5a7   : > { %v1989_v41 = vadd.f32 %v2961_v39, %v1988_v40  ;;  %v3239_v42 = vpop.f32.mrb[17].mxu0  ;;  %v2980_v40 = vld [vmem:[%s4031_s8] ss:$0 sm:$0xff] }
 0x5a9   : > { %v1992_v43 = vmul.f32 0.35355338, %v1989_v41 }
 0x5ab   : > { %3243 = vmatmul.mubr.msk.f32.vlgmr.msra.gmra.mrb[16].mxu1 %vm735_vm2, %v1992_v43 }
 0x5ac   : > { %3246 = vmatpush3.msra.mxu1 %v1996_v44  ;;  %3247 = vmatprep.mubr.msk.f32.mxu1 %vm3481_vm0, %v3482_v6 }
 0x5ad   : > { %3377 = vmatprep.subr.bf16.mxu1 %v3480_v3 }
 0x67e   : > { %v2069_v45 = vpop.f32.mrb[16].mxu1 }
 0x67f   : > { %v3244_v46 = vpop.f32.mrb[17].mxu1  ;;  %v2073_v47 = vsel %vm735_vm2, %v2069_v45, -inf }
 0x680   : > { %2074 = vmax.xlane.f32.xlu0 %v2073_v47 }
 0x70d   : > { %v2075_v48 = vpop.xlane.xlu0 %2074 }
 0x70e   : > { %v2079_v49 = vsub.f32 %v2069_v45, %v2075_v48  ;;  %v2076_v60 = vsub.f32 -inf, %v2075_v48 }
 0x710   : > { %v2080_v50 = vmul.f32 1.442695, %v2079_v49  ;;  %v2077_v61 = vmul.f32 1.442695, %v2076_v60 }
 0x712   : > { %3440 = vpow2.f32 %v2080_v50  ;;  %v2608_v50 = vld [vmem:[%s4034_s11 + $0x8] sm:$0xff] }
 0x713   : > { %3442 = vpow2.f32 %v2077_v61  ;;  %v2696_v61 = vld [vmem:[%s4036_s13 + $0x20] sm:$0xff] }
 0x71c   : > { %v3441_v56 = vpop.eup %3440 }
 0x71d   : > { %3248 = vmatmul.mubr.msk.f32.vlgmr.msra.gmra.mrb[18].mxu1 %vm735_vm2, %v3441_v56  ;;  %v2083_v57 = vsel %vm735_vm2, %v3441_v56, 0.0  ;;  %v3443_v62 = vpop.eup %3442  ;;  %v2693_v56 = vld [vmem:[%s4036_s13 + $0x8] sm:$0xff] }
 0x71e   : > { %3379 = vmatpush3.bf16.msra.mxu1 %v3378_v53  ;;  %2084 = vadd.xlane.f32.xlu1 %v2083_v57  ;;  %v2082_v0 = vmul.f32 0.0, %v3443_v62  ;;  %v2610_v53 = vld [vmem:[%s4034_s11 + $0x18] sm:$0xff]  ;;  %v2694_v57 = vld [vmem:[%s4036_s13 + $0x10] sm:$0xff]  ;;  %v2697_v62 = vld [vmem:[%s4036_s13 + $0x28] sm:$0xff] }
 0x71f   : > { %3380 = vmatprep.subr.bf16.mxu1 %v3480_v3  ;;  %3263 = vmatprep.mubr.msk.f32.mxu1 %vm3481_vm0, %v3482_v6  ;;  %v3387_v54 = vpack.c.bf16 %v2610_v53, %v2609_v52  ;;  %v3393_v60 = vpack.c.bf16 %v2695_v59, %v2694_v57 }
 0x722   : > { %3382 = vmatpush3.bf16.msra.mxu1 %v3381_v58  ;;  %v3390_v58 = vpack.c.bf16 %v2693_v56, %v2692_v55 }
 0x723   : > { %3276 = vmatprep.subr.mxu1 %v3482_v6 }
 0x725   : > { %3264 = vmatmul.mubr.msk.f32.vlgmr.msra.gmra.mrb[20].mxu1 %vm580_vm1, %v3624_v10 }
 0x726   : > { %3278 = vmatprep.mubr.msk.f32.mxu1 %vm3481_vm0, %v3482_v6  ;;  %3277 = vmatpush3.msra.mxu1 %v2978_v27 }
 0x727   : > { %3389 = vmatprep.subr.bf16.mxu1 %v3480_v3 }
 0x7ab   : > { %v2085_v63 = vpop.xlane.xlu1 %2084 }
 0x7ac   : > { %v2086_v1 = vadd.f32 %v2085_v63, %v2082_v0  ;;  %v3396_v63 = vpack.c.bf16 %v2697_v62, %v2696_v61 }
 0x7ae   : > { %3444 = vrcp.f32 %v2086_v1 }
 0x7b8   : > { %v3445_v5 = vpop.eup %3444 }
 0x7f0   : > { %v2156_v2 = vpop.f32.mrb[18].mxu1 }
 0x7f1   : > { %v2160_v10 = vadd.f32 %v2156_v2, %v2082_v0  ;;  %v3249_v4 = vpop.f32.mrb[19].mxu1 }
 0x7f2   : > { %v2981_v4 = vld [vmem:[%s4032_s9] ss:$0 sm:$0xff] }
 0x7f3   : > { %v2162_v7 = vmul.f32 %v3445_v5, %v2160_v10 }
 0x7f5   : > { %3253 = vmatmul.mubr.msk.f32.vlgmr.msra.gmra.mrb[18].mxu0 %vm735_vm2, %v2162_v7  ;;  %v2982_v7 = vld [vmem:[%s4033_s10] ss:$0 sm:$0xff] }
 0x7f6   : > { %3267 = vmatpush3.xpose.msk.msra.mxu0 %vm735_vm2, %v2324_v8  ;;  %3268 = vmatprep.mubr.msk.f32.mxu0 %vm3481_vm0, %v3482_v6 }
 0x7f7   : > { %3271 = vmatprep.subr.mxu0 %v3482_v6 }
 0x7f8   : > { %v2318_v11 = vpop.f32.mrb[20].mxu1 }
 0x7f9   : > { %v2319_v12 = vadd.f32 %v2973_v9, %v2318_v11  ;;  %v3265_v13 = vpop.f32.mrb[21].mxu1  ;;  %v2699_v11 = vld [vmem:[%s4036_s13 + $0x38] sm:$0xff] }
 0x7fa   : > { %v2983_v13 = vld [vmem:[%s4035_s12] ss:$0 sm:$0xff] }
 0x7fb   : > { %v2322_v14 = vmul.f32 0.35355338, %v2319_v12 }
 0x7fd   : > { %3269 = vmatmul.mubr.msk.f32.vlgmr.msra.gmra.mrb[20].mxu0 %vm735_vm2, %v2322_v14 }
 0x7fe   : > { %3272 = vmatpush3.msra.mxu0 %v2326_v15  ;;  %3273 = vmatprep.mubr.msk.f32.mxu0 %vm3481_vm0, %v3482_v6 }
 0x7ff   : > { %3383 = vmatprep.subr.bf16.mxu0 %v3480_v3 }
 0x8c8   : > { %v2234_v16 = vpop.f32.mrb[18].mxu0 }
 0x8c9   : > { %v2238_v17 = vadd.f32 %v2234_v16, %v3881_v37  ;;  %v3254_v18 = vpop.f32.mrb[19].mxu0 }
 0x8ca   : > { %v2985_v18 = vld [vmem:[%s4037_s14] ss:$0 sm:$0xff] }
 0x8d0   : > { %v2399_v19 = vpop.f32.mrb[20].mxu0 }
 0x8d1   : > { %v3270_v20 = vpop.f32.mrb[21].mxu0  ;;  %v2403_v21 = vsel %vm735_vm2, %v2399_v19, -inf }
 0x8d2   : > { %2404 = vmax.xlane.f32.xlu0 %v2403_v21 }
 0x95f   : > { %v2405_v22 = vpop.xlane.xlu0 %2404 }
 0x960   : > { %v2409_v23 = vsub.f32 %v2399_v19, %v2405_v22  ;;  %v2406_v28 = vsub.f32 -inf, %v2405_v22 }
 0x962   : > { %v2410_v24 = vmul.f32 1.442695, %v2409_v23  ;;  %v2407_v29 = vmul.f32 1.442695, %v2406_v28 }
 0x964   : > { %3446 = vpow2.f32 %v2410_v24 }
 0x965   : > { %3448 = vpow2.f32 %v2407_v29 }
 0x96e   : > { %v3447_v25 = vpop.eup %3446 }
 0x96f   : > { %3274 = vmatmul.mubr.msk.f32.vlgmr.msra.gmra.mrb[22].mxu0 %vm735_vm2, %v3447_v25  ;;  %v2413_v26 = vsel %vm735_vm2, %v3447_v25, 0.0  ;;  %v3449_v30 = vpop.eup %3448 }
 0x970   : > { %2414 = vadd.xlane.f32.xlu1 %v2413_v26  ;;  %3289 = vmatprep.mubr.msk.f32.mxu0 %vm3481_vm0, %v3482_v6  ;;  %v2412_v32 = vmul.f32 0.0, %v3449_v30 }
 0x9fd   : > { %v2415_v31 = vpop.xlane.xlu1 %2414 }
 0x9fe   : > { %v2416_v33 = vadd.f32 %v2415_v31, %v2412_v32 }
 0xa00   : > { %3450 = vrcp.f32 %v2416_v33  ;;  %v2987_v33 = vld [vmem:[%s4038_s15] ss:$0 sm:$0xff] }
 0xa0a   : > { %v3451_v37 = vpop.eup %3450 }
 0xa42   : > { %v2486_v34 = vpop.f32.mrb[22].mxu0 }
 0xa43   : > { %v2490_v35 = vadd.f32 %v2486_v34, %v2412_v32  ;;  %v3275_v36 = vpop.f32.mrb[23].mxu0 }
 0xa45   : > { %v2492_v38 = vmul.f32 %v3451_v37, %v2490_v35  ;;  %v2988_v35 = vld [vmem:[%s4039_s16] ss:$0 sm:$0xff] }
 0xa47   : > { %3279 = vmatmul.mubr.msk.f32.vlgmr.msra.gmra.mrb[22].mxu1 %vm735_vm2, %v2492_v38 }
 0xa48   : > { %3308 = vmatprep.mubr.msk.f32.mxu1 %vm3481_vm0, %v3482_v6  ;;  %v2607_v6 = vld [vmem:[%s4034_s11] sm:$0xff]  ;;  %3391 = vmatpush3.bf16.msra.mxu1 %v3390_v58 }
 0xa49   : > { %v3384_v51 = vpack.c.bf16 %v2608_v50, %v2607_v6  ;;  %3392 = vmatprep.subr.bf16.mxu1 %v3480_v3 }
 0xa4b   : > { %3385 = vmatpush3.bf16.msra.mxu0 %v3384_v51 }
 0xa4c   : > { %3386 = vmatprep.subr.bf16.mxu0 %v3480_v3  ;;  %3394 = vmatpush3.bf16.msra.mxu1 %v3393_v60 }
 0xa4d   : > { %3395 = vmatprep.subr.bf16.mxu1 %v3480_v3 }
 0xa4f   : > { %3388 = vmatpush3.bf16.msra.mxu0 %v3387_v54 }
 0xa50   : > { %3397 = vmatpush3.bf16.msra.mxu1 %v3396_v63 }
 0xa51   : > { %3398 = vmatprep.subr.bf16.mxu1 %v3480_v3  ;;  %v2698_v3 = vld [vmem:[%s4036_s13 + $0x30] sm:$0xff] }
 0xa52   : > { %v3399_v12 = vpack.c.bf16 %v2699_v11, %v2698_v3 }
 0xa54   : > { %3400 = vmatpush3.bf16.msra.mxu1 %v3399_v12 }
 0xb1a   : > { %v2564_v39 = vpop.f32.mrb[22].mxu1 }
 0xb1b   : > { %v2568_v41 = vadd.f32 %v2564_v39, %v2238_v17  ;;  %v3280_v42 = vpop.f32.mrb[23].mxu1 }
 0xb1d   : > { %v2576_v43 = vadd.f32 %v2980_v40, %v2568_v41 }
 0xb1f   : > { %v2579_v44 = vsel %vm580_vm1, %v2576_v43, 0.0 }
 0xb20   : > { %2580 = vadd.xlane.f32.xlu0 %v2579_v44 }
 0xbad   : > { %v2581_v45 = vpop.xlane.xlu0 %2580 }
 0xbae   : > { %v2583_v46 = vmul.f32 0.03125, %v2581_v45 }
 0xbb0   : > { %v2584_v47 = vsub.f32 %v2576_v43, %v2583_v46 }
 0xbb2   : > { %v2585_v48 = vmul.f32 %v2584_v47, %v2584_v47 }
 0xbb4   : > { %v2586_v49 = vsel %vm580_vm1, %v2585_v48, 0.0 }
 0xbb5   : > { %2587 = vadd.xlane.f32.xlu1 %v2586_v49 }
 0xc42   : > { %v2588_v0 = vpop.xlane.xlu1 %2587 }
 0xc43   : > { %v2589_v1 = vmul.f32 0.03125, %v2588_v0 }
 0xc45   : > { %v2590_v2 = vadd.f32 1e-05, %v2589_v1 }
 0xc47   : > { %3452 = vrsqrt.f32 %v2590_v2 }
 0xc51   : > { %v3453_v10 = vpop.eup %3452 }
 0xc52   : > { %v2592_v5 = vmul.f32 %v3453_v10, %v2584_v47 }
 0xc54   : > { %v2599_v8 = vmul.f32 %v2981_v4, %v2592_v5 }
 0xc56   : > { %v2606_v9 = vadd.f32 %v2982_v7, %v2599_v8 }
 0xc58   : > { %3290 = vmatmul.mubr.msk.f32.vlgmr.msra.gmra.mrb[24].mxu0 %vm580_vm1, %v2606_v9 }
 0xd2b   : > { %v2687_v14 = vpop.f32.mrb[24].mxu0 }
 0xd2c   : > { %v2688_v15 = vadd.f32 %v2983_v13, %v2687_v14  ;;  %v3291_v16 = vpop.f32.mrb[25].mxu0 }
 0xd2e   : > { %v2691_v17 = vmax.f32 %v2688_v15, 0.0 }
 0xd30   : > { %3309 = vmatmul.mubr.msk.f32.vlgmr.msra.gmra.mrb[24].mxu1 %vm2707_vm3, %v2691_v17 }
 0xe03   : > { %v2777_v19 = vpop.f32.mrb[24].mxu1 }
 0xe04   : > { %v2778_v20 = vadd.f32 %v2985_v18, %v2777_v19  ;;  %v3310_v21 = vpop.f32.mrb[25].mxu1 }
 0xe06   : > { %v2781_v22 = vadd.f32 %v2778_v20, %v2606_v9 }
 0xe08   : > { %v2784_v23 = vsel %vm580_vm1, %v2781_v22, 0.0 }
 0xe09   : > { %2785 = vadd.xlane.f32.xlu0 %v2784_v23 }
 0xe96   : > { %v2786_v24 = vpop.xlane.xlu0 %2785 }
 0xe97   : > { %v2787_v25 = vmul.f32 0.03125, %v2786_v24 }
 0xe99   : > { %v2788_v26 = vsub.f32 %v2781_v22, %v2787_v25 }
 0xe9b   : > { %v2789_v27 = vmul.f32 %v2788_v26, %v2788_v26 }
 0xe9d   : > { %v2790_v28 = vsel %vm580_vm1, %v2789_v27, 0.0 }
 0xe9e   : > { %2791 = vadd.xlane.f32.xlu1 %v2790_v28 }
 0xf2b   : > { %v2792_v29 = vpop.xlane.xlu1 %2791 }
 0xf2c   : > { %v2793_v30 = vmul.f32 0.03125, %v2792_v29 }
 0xf2e   : > { %v2794_v31 = vadd.f32 1e-05, %v2793_v30 }
 0xf30   : > { %3454 = vrsqrt.f32 %v2794_v31 }
 0xf3a   : > { %v3455_v32 = vpop.eup %3454 }
 0xf3b   : > { %v2796_v34 = vmul.f32 %v3455_v32, %v2788_v26 }
 0xf3d   : > { %v2803_v36 = vmul.f32 %v2987_v33, %v2796_v34 }
 0xf3f   : > { %v2810_v37 = vadd.f32 %v2988_v35, %v2803_v36 }
 0xf41   : > { %2811 = vst.msk [vmem:[%s563_s19] sm:$0xff] %vm580_vm1, %v2810_v37 }
 0xf42 PF: > { %s27_s26 = sadd.s32 1, %s3478_s26   ;;  %s4048_s24 = smov %s3474_s25 }
 0xf43   : > { %p24_p5 = scmp.ge.s32.totalorder %s27_s26, 4   ;;  %s4049_s25 = smov %s4051_s27 }
 0xf45   :  { %26 = sbr.rel (!%p24_p5) target bundleno = 3 (0x3), region = 156 }

</bundles_post_ra>
